<compile_context>
chip_gen: v7x
topology: tpu7x:2x2x1
jax: 0.10.0
libtpu: 0.0.40
codegen_flags: <defaults>
</compile_context>

<pallas_src>
import functools

import jax
import jax.numpy as jnp
from jax.experimental import pallas as pl
from jax.experimental.pallas import tpu as pltpu

LANE = 128
SUB = 8


def _round_up(x, m):
    return (x + m - 1) // m * m


# ---------------------------------------------------------------------------
# Kernel
# ---------------------------------------------------------------------------
def _layernorm(x, n_valid, g, b, eps=1e-5):
    """LayerNorm over the last axis where only the first `n_valid` lanes are real.

    Padded lanes of `x` are zero and padded lanes of gamma/beta are zero, so the
    output's padded lanes are exactly zero.  Two-pass variance (no E[x^2]-mu^2
    cancellation); padded lanes are masked out of the variance sum.
    """
    width = x.shape[-1]
    inv_n = 1.0 / float(n_valid)
    mu = jnp.sum(x, axis=-1, keepdims=True) * inv_n
    d = x - mu
    if n_valid != width:  # static (trace-time) branch
        lane = jax.lax.broadcasted_iota(jnp.int32, x.shape, x.ndim - 1)
        d = jnp.where(lane < n_valid, d, 0.0)
    var = jnp.sum(d * d, axis=-1, keepdims=True) * inv_n
    return d * jax.lax.rsqrt(var + eps) * g + b


def r_actor_kernel(
    obs_dim, hidden, hp,
    # data (one batch tile each; masks already folded into h)
    obs_ref, h_ref, avail_ref,
    # MLPBase params (padded, resident)
    ln0g_ref, ln0b_ref, w1_ref, b1_ref, ln1g_ref, ln1b_ref,
    w2_ref, b2_ref, ln2g_ref, ln2b_ref,
    # fused GRU params (x-half / h-half of the stacked gate weight)
    wgx_ref, wgh_ref, bg_ref, lnr_g_ref, lnr_b_ref,
    # action head params
    wact_ref, bact_ref,
    # outputs: hidden state (TB, HP) and lane-dense aux block (TB, 128)
    h_out_ref, aux_ref,
):
    f32 = jnp.float32

    # ---- MLPBase ----
    x = _layernorm(obs_ref[...], obs_dim, ln0g_ref[...], ln0b_ref[...])
    x = jnp.maximum(
        jnp.dot(x, w1_ref[...], preferred_element_type=f32) + b1_ref[...], 0.0)
    x = _layernorm(x, hidden, ln1g_ref[...], ln1b_ref[...])
    x = jnp.maximum(
        jnp.dot(x, w2_ref[...], preferred_element_type=f32) + b2_ref[...], 0.0)
    x = _layernorm(x, hidden, ln2g_ref[...], ln2b_ref[...])

    # ---- RNNLayer: GRU cell (masks folded into h in the wrapper) ----
    h = h_ref[...]                                        # (TB, HP)
    # gate blocks: [ gi_r+gh_r | gi_z+gh_z | gi_n | gh_n ], each HP lanes wide;
    # two accumulated dots (x-half, h-half) instead of a concat + single dot.
    g = (jnp.dot(x, wgx_ref[...], preferred_element_type=f32)
         + jnp.dot(h, wgh_ref[...], preferred_element_type=f32)
         + bg_ref[...])
    r = jax.nn.sigmoid(g[:, 0:hp])
    z = jax.nn.sigmoid(g[:, hp:2 * hp])
    n = jnp.tanh(g[:, 2 * hp:3 * hp] + r * g[:, 3 * hp:4 * hp])
    h_new = (1.0 - z) * n + z * h                         # padded lanes stay 0
    h_out_ref[...] = h_new

    feat = _layernorm(h_new, hidden, lnr_g_ref[...], lnr_b_ref[...])

    # ---- ACTLayer: categorical head, deterministic mode ----
    logits = jnp.dot(feat, wact_ref[...], preferred_element_type=f32) + bact_ref[...]
    logits = jnp.where(avail_ref[...] > 0.5, logits, jnp.float32(-1e10))

    m = jnp.max(logits, axis=-1, keepdims=True)
    lse = jnp.log(jnp.sum(jnp.exp(logits - m), axis=-1, keepdims=True)) + m

    ap = logits.shape[-1]
    iota = jax.lax.broadcasted_iota(jnp.int32, logits.shape, 1)
    # first index attaining the maximum (matches torch argmax tie-breaking)
    a_idx = jnp.min(jnp.where(logits >= m, iota, jnp.int32(ap)),
                    axis=-1, keepdims=True)               # (TB, 1) int32

    # Pack the scalar-per-row results into one lane-dense (TB, 128) block:
    #   lane 0 = action index (exact as f32, indices are tiny), lane 1 = logp.
    lane = jax.lax.broadcasted_iota(jnp.int32, aux_ref.shape, 1)
    aux_ref[...] = jnp.where(lane == 0, a_idx.astype(f32),
                             jnp.where(lane == 1, m - lse, 0.0))


# ---------------------------------------------------------------------------
# Parameter preparation (fuse GRU weights, pad all feature axes to 128 lanes)
# ---------------------------------------------------------------------------
def init_params(key, obs_dim, hidden, action_dim):
    ks = jax.random.split(key, 8)
    s = 0.1
    return {
        "ln0_g": jnp.ones((1, obs_dim), jnp.float32),
        "ln0_b": jnp.zeros((1, obs_dim), jnp.float32),
        "w1": s * jax.random.normal(ks[0], (obs_dim, hidden), jnp.float32),
        "b1": jnp.zeros((1, hidden), jnp.float32),
        "ln1_g": jnp.ones((1, hidden), jnp.float32),
        "ln1_b": jnp.zeros((1, hidden), jnp.float32),
        "w2": s * jax.random.normal(ks[1], (hidden, hidden), jnp.float32),
        "b2": jnp.zeros((1, hidden), jnp.float32),
        "ln2_g": jnp.ones((1, hidden), jnp.float32),
        "ln2_b": jnp.zeros((1, hidden), jnp.float32),
        # GRU (PyTorch gate order [r, z, n] along the 3*hidden columns)
        "w_ih": s * jax.random.normal(ks[2], (hidden, 3 * hidden), jnp.float32),
        "w_hh": s * jax.random.normal(ks[3], (hidden, 3 * hidden), jnp.float32),
        "b_ih": jnp.zeros((1, 3 * hidden), jnp.float32),
        "b_hh": jnp.zeros((1, 3 * hidden), jnp.float32),
        "lnr_g": jnp.ones((1, hidden), jnp.float32),
        "lnr_b": jnp.zeros((1, hidden), jnp.float32),
        "w_act": s * jax.random.normal(ks[4], (hidden, action_dim), jnp.float32),
        "b_act": jnp.zeros((1, action_dim), jnp.float32),
    }


def prepare_params(params, obs_dim, hidden, action_dim):
    """One-time: fuse GRU weights (kept as x-half / h-half so the kernel needs no
    concat) and zero-pad every feature axis to 128 lanes."""
    OP = _round_up(obs_dim, LANE)
    HP = _round_up(hidden, LANE)
    AP = _round_up(action_dim, LANE)
    H = hidden
    f32 = jnp.float32

    def pad2(a, r, c):
        a = jnp.asarray(a, f32)
        return jnp.zeros((r, c), f32).at[:a.shape[0], :a.shape[1]].set(a)

    w_ih, w_hh = params["w_ih"], params["w_hh"]
    b_ih = params["b_ih"].reshape(1, 3 * H)
    b_hh = params["b_hh"].reshape(1, 3 * H)

    # fused GRU gate columns: [ r | z | gi_n | gh_n ] blocks, each HP lanes wide
    wgx = jnp.zeros((HP, 4 * HP), f32)
    wgx = wgx.at[0:H, 0:H].set(w_ih[:, 0:H])
    wgx = wgx.at[0:H, HP:HP + H].set(w_ih[:, H:2 * H])
    wgx = wgx.at[0:H, 2 * HP:2 * HP + H].set(w_ih[:, 2 * H:3 * H])

    wgh = jnp.zeros((HP, 4 * HP), f32)
    wgh = wgh.at[0:H, 0:H].set(w_hh[:, 0:H])
    wgh = wgh.at[0:H, HP:HP + H].set(w_hh[:, H:2 * H])
    wgh = wgh.at[0:H, 3 * HP:3 * HP + H].set(w_hh[:, 2 * H:3 * H])

    bg = jnp.zeros((1, 4 * HP), f32)
    bg = bg.at[:, 0:H].set(b_ih[:, 0:H] + b_hh[:, 0:H])
    bg = bg.at[:, HP:HP + H].set(b_ih[:, H:2 * H] + b_hh[:, H:2 * H])
    bg = bg.at[:, 2 * HP:2 * HP + H].set(b_ih[:, 2 * H:3 * H])
    bg = bg.at[:, 3 * HP:3 * HP + H].set(b_hh[:, 2 * H:3 * H])

    return {
        "ln0_g": pad2(params["ln0_g"], 1, OP),
        "ln0_b": pad2(params["ln0_b"], 1, OP),
        "w1": pad2(params["w1"], OP, HP),
        "b1": pad2(params["b1"], 1, HP),
        "ln1_g": pad2(params["ln1_g"], 1, HP),
        "ln1_b": pad2(params["ln1_b"], 1, HP),
        "w2": pad2(params["w2"], HP, HP),
        "b2": pad2(params["b2"], 1, HP),
        "ln2_g": pad2(params["ln2_g"], 1, HP),
        "ln2_b": pad2(params["ln2_b"], 1, HP),
        "w_gru_x": wgx,
        "w_gru_h": wgh,
        "b_gru": bg,
        "lnr_g": pad2(params["lnr_g"], 1, HP),
        "lnr_b": pad2(params["lnr_b"], 1, HP),
        "w_act": pad2(params["w_act"], HP, AP),
        "b_act": pad2(params["b_act"], 1, AP),
    }


_KP_ORDER = ("ln0_g", "ln0_b", "w1", "b1", "ln1_g", "ln1_b",
             "w2", "b2", "ln2_g", "ln2_b",
             "w_gru_x", "w_gru_h", "b_gru", "lnr_g", "lnr_b",
             "w_act", "b_act")


# ---------------------------------------------------------------------------
# Forward wrapper
# ---------------------------------------------------------------------------
@functools.partial(jax.jit, static_argnames=("obs_dim", "hidden", "action_dim", "block_b"))
def r_actor_forward(kparams, obs, rnn_states, masks, available_actions,
                    *, obs_dim, hidden, action_dim, block_b=256):
    """obs: (B, obs_dim) f32; rnn_states: (B, recurrent_N=1, H) f32;
    masks: (B, 1) f32; available_actions: (B, A) f32.
    Returns (actions (B,1) i32, action_log_probs (B,1) f32, rnn_states (B,1,H) f32)."""
    B = obs.shape[0]
    H = hidden
    OP = _round_up(obs_dim, LANE)
    HP = _round_up(H, LANE)
    AP = _round_up(action_dim, LANE)

    # Batch tile: up to block_b rows (256 fills the v6e/v7x MXU row height), but keep
    # at least 2 grid steps when B allows so v7x's two TensorCores both get work.
    tb_full = _round_up(B, SUB)
    tb_half = _round_up(max((B + 1) // 2, SUB), SUB)
    TB = max(SUB, min(block_b, tb_full, tb_half))
    Bp = _round_up(B, TB)

    def pad_b(a, width):
        a = jnp.asarray(a, jnp.float32)
        return jnp.zeros((Bp, width), jnp.float32).at[:B, :a.shape[1]].set(a)

    obs_p = pad_b(obs, OP)
    # Fold the reset mask into the hidden state here (fuses into the XLA pad) so the
    # kernel needs neither the (TB,1) mask input nor the lane-broadcast multiply.
    h_masked = rnn_states.reshape(B, H).astype(jnp.float32) * masks.astype(jnp.float32)
    h_p = pad_b(h_masked, HP)
    avail_p = pad_b(available_actions, AP)

    flat_params = [kparams[k] for k in _KP_ORDER]

    def data_spec(width):
        return pl.BlockSpec((TB, width), lambda i: (i, 0))

    def weight_spec(p):
        return pl.BlockSpec(p.shape, lambda i: (0, 0))   # resident across the grid

    in_specs = ([data_spec(OP), data_spec(HP), data_spec(AP)]
                + [weight_spec(p) for p in flat_params])
    out_specs = (data_spec(HP), data_spec(LANE))

    kernel = functools.partial(r_actor_kernel, obs_dim, H, HP)

    h_new, aux = pl.pallas_call(
        kernel,
        grid=(Bp // TB,),
        out_shape=(
            jax.ShapeDtypeStruct((Bp, HP), jnp.float32),   # hidden state
            jax.ShapeDtypeStruct((Bp, LANE), jnp.float32),  # lane 0: action, lane 1: logp
        ),
        in_specs=in_specs,
        out_specs=out_specs,
        input_output_aliases={1: 0},   # padded h input reuses the h output buffer
        compiler_params=pltpu.CompilerParams(
            dimension_semantics=("parallel",)),
    )(obs_p, h_p, avail_p, *flat_params)

    actions = aux[:B, 0:1].astype(jnp.int32)
    logp = aux[:B, 1:2]
    return actions, logp, h_new[:B, :H].reshape(B, 1, H)


# ---------------------------------------------------------------------------
# Pure-JAX reference (mirrors the PyTorch forward, f32)
# ---------------------------------------------------------------------------
def r_actor_reference(params, obs, rnn_states, masks, available_actions):
    def ln(x, g, b, eps=1e-5):
        mu = jnp.mean(x, -1, keepdims=True)
        var = jnp.mean((x - mu) ** 2, -1, keepdims=True)
        return (x - mu) / jnp.sqrt(var + eps) * g + b

    x = ln(obs, params["ln0_g"], params["ln0_b"])
    x = jax.nn.relu(x @ params["w1"] + params["b1"])
    x = ln(x, params["ln1_g"], params["ln1_b"])
    x = jax.nn.relu(x @ params["w2"] + params["b2"])
    x = ln(x, params["ln2_g"], params["ln2_b"])

    B, H = rnn_states.shape[0], rnn_states.shape[-1]
    h = rnn_states.reshape(B, H) * masks
    gi = x @ params["w_ih"] + params["b_ih"]
    gh = h @ params["w_hh"] + params["b_hh"]
    r = jax.nn.sigmoid(gi[:, :H] + gh[:, :H])
    z = jax.nn.sigmoid(gi[:, H:2 * H] + gh[:, H:2 * H])
    n = jnp.tanh(gi[:, 2 * H:] + r * gh[:, 2 * H:])
    h_new = (1.0 - z) * n + z * h

    feat = ln(h_new, params["lnr_g"], params["lnr_b"])
    logits = feat @ params["w_act"] + params["b_act"]
    logits = jnp.where(available_actions > 0.5, logits, -1e10)
    a = jnp.argmax(logits, axis=-1)
    logp = jax.nn.log_softmax(logits, axis=-1)
    lp = jnp.take_along_axis(logp, a[:, None], axis=-1)
    return a[:, None].astype(jnp.int32), lp, h_new.reshape(B, 1, H)


# ---------------------------------------------------------------------------
if __name__ == "__main__":
    B, OBS_DIM, HIDDEN, ACT_DIM = 256, 48, 64, 10   # exercises a 2-step batch grid

    key = jax.random.PRNGKey(0)
    k_obs, k_h, k_par = jax.random.split(key, 3)

    obs = jax.random.normal(k_obs, (B, OBS_DIM), jnp.float32)
    rnn_states = jax.random.normal(k_h, (B, 1, HIDDEN), jnp.float32)
    masks = jnp.ones((B, 1), jnp.float32).at[0, 0].set(0.0)   # one env resets
    available_actions = jnp.ones((B, ACT_DIM), jnp.float32).at[:, -1].set(0.0)

    params = init_params(k_par, OBS_DIM, HIDDEN, ACT_DIM)
    kparams = prepare_params(params, OBS_DIM, HIDDEN, ACT_DIM)

    actions, action_log_probs, new_rnn_states = r_actor_forward(
        kparams, obs, rnn_states, masks, available_actions,
        obs_dim=OBS_DIM, hidden=HIDDEN, action_dim=ACT_DIM)
    jax.block_until_ready((actions, action_log_probs, new_rnn_states))

    # reference check
    a_ref, lp_ref, h_ref = r_actor_reference(
        params, obs, rnn_states.astype(jnp.float32), masks, available_actions)

    assert actions.shape == (B, 1) and actions.dtype == jnp.int32
    assert action_log_probs.shape == (B, 1)
    assert new_rnn_states.shape == (B, 1, HIDDEN)
    assert bool(jnp.all(actions < ACT_DIM - 1))          # masked action never picked
    assert bool(jnp.all(actions == a_ref))
    assert bool(jnp.allclose(action_log_probs, lp_ref, atol=2e-4, rtol=1e-3))
    assert bool(jnp.allclose(new_rnn_states, h_ref, atol=2e-4, rtol=1e-3))

    print("KERNEL_OK")
</pallas_src>

<mosaic_0001>
module attributes {stable_mosaic.version = 11 : i64} {
  func.func @r_actor_kernel(%arg0: i32, %arg1: memref<128x128xf32, #tpu.memory_space<vmem>>, %arg2: memref<128x128xf32, #tpu.memory_space<vmem>>, %arg3: memref<128x128xf32, #tpu.memory_space<vmem>>, %arg4: memref<1x128xf32, #tpu.memory_space<vmem>>, %arg5: memref<1x128xf32, #tpu.memory_space<vmem>>, %arg6: memref<128x128xf32, #tpu.memory_space<vmem>>, %arg7: memref<1x128xf32, #tpu.memory_space<vmem>>, %arg8: memref<1x128xf32, #tpu.memory_space<vmem>>, %arg9: memref<1x128xf32, #tpu.memory_space<vmem>>, %arg10: memref<128x128xf32, #tpu.memory_space<vmem>>, %arg11: memref<1x128xf32, #tpu.memory_space<vmem>>, %arg12: memref<1x128xf32, #tpu.memory_space<vmem>>, %arg13: memref<1x128xf32, #tpu.memory_space<vmem>>, %arg14: memref<128x512xf32, #tpu.memory_space<vmem>>, %arg15: memref<128x512xf32, #tpu.memory_space<vmem>>, %arg16: memref<1x512xf32, #tpu.memory_space<vmem>>, %arg17: memref<1x128xf32, #tpu.memory_space<vmem>>, %arg18: memref<1x128xf32, #tpu.memory_space<vmem>>, %arg19: memref<128x128xf32, #tpu.memory_space<vmem>>, %arg20: memref<1x128xf32, #tpu.memory_space<vmem>>, %arg21: memref<128x128xf32, #tpu.memory_space<vmem>>, %arg22: memref<128x128xf32, #tpu.memory_space<vmem>>) attributes {dimension_semantics = [#tpu.dimension_semantics<parallel>], iteration_bounds = array<i64: 2>, scalar_prefetch = 0 : i64, scratch_operands = 0 : i64, tpu.core_type = #tpu.core_type<tc>, window_params = [{transform_indices = @transform_0, window_bounds = array<i64: 128, 128>}, {transform_indices = @transform_1, window_bounds = array<i64: 128, 128>}, {transform_indices = @transform_2, window_bounds = array<i64: 128, 128>}, {pipeline_mode = #tpu.pipeline_mode<synchronous>, transform_indices = @transform_3, window_bounds = array<i64: 1, 128>}, {pipeline_mode = #tpu.pipeline_mode<synchronous>, transform_indices = @transform_4, window_bounds = array<i64: 1, 128>}, {pipeline_mode = #tpu.pipeline_mode<synchronous>, transform_indices = @transform_5, window_bounds = array<i64: 128, 128>}, {pipeline_mode = #tpu.pipeline_mode<synchronous>, transform_indices = @transform_6, window_bounds = array<i64: 1, 128>}, {pipeline_mode = #tpu.pipeline_mode<synchronous>, transform_indices = @transform_7, window_bounds = array<i64: 1, 128>}, {pipeline_mode = #tpu.pipeline_mode<synchronous>, transform_indices = @transform_8, window_bounds = array<i64: 1, 128>}, {pipeline_mode = #tpu.pipeline_mode<synchronous>, transform_indices = @transform_9, window_bounds = array<i64: 128, 128>}, {pipeline_mode = #tpu.pipeline_mode<synchronous>, transform_indices = @transform_10, window_bounds = array<i64: 1, 128>}, {pipeline_mode = #tpu.pipeline_mode<synchronous>, transform_indices = @transform_11, window_bounds = array<i64: 1, 128>}, {pipeline_mode = #tpu.pipeline_mode<synchronous>, transform_indices = @transform_12, window_bounds = array<i64: 1, 128>}, {pipeline_mode = #tpu.pipeline_mode<synchronous>, transform_indices = @transform_13, window_bounds = array<i64: 128, 512>}, {pipeline_mode = #tpu.pipeline_mode<synchronous>, transform_indices = @transform_14, window_bounds = array<i64: 128, 512>}, {pipeline_mode = #tpu.pipeline_mode<synchronous>, transform_indices = @transform_15, window_bounds = array<i64: 1, 512>}, {pipeline_mode = #tpu.pipeline_mode<synchronous>, transform_indices = @transform_16, window_bounds = array<i64: 1, 128>}, {pipeline_mode = #tpu.pipeline_mode<synchronous>, transform_indices = @transform_17, window_bounds = array<i64: 1, 128>}, {pipeline_mode = #tpu.pipeline_mode<synchronous>, transform_indices = @transform_18, window_bounds = array<i64: 128, 128>}, {pipeline_mode = #tpu.pipeline_mode<synchronous>, transform_indices = @transform_19, window_bounds = array<i64: 1, 128>}, {transform_indices = @transform_20, window_bounds = array<i64: 128, 128>}, {transform_indices = @transform_21, window_bounds = array<i64: 128, 128>}]} {
    %c0 = arith.constant 0 : index
    %c0_0 = arith.constant 0 : index
    %0 = vector.load %arg1[%c0, %c0_0] : memref<128x128xf32, #tpu.memory_space<vmem>>, vector<128x128xf32>
    %c0_1 = arith.constant 0 : index
    %c0_2 = arith.constant 0 : index
    %1 = vector.load %arg4[%c0_1, %c0_2] : memref<1x128xf32, #tpu.memory_space<vmem>>, vector<1x128xf32>
    %c0_3 = arith.constant 0 : index
    %c0_4 = arith.constant 0 : index
    %2 = vector.load %arg5[%c0_3, %c0_4] : memref<1x128xf32, #tpu.memory_space<vmem>>, vector<1x128xf32>
    %cst = arith.constant dense<0.000000e+00> : vector<128xf32>
    %3 = vector.multi_reduction <add>, %0, %cst [1] : vector<128x128xf32> to vector<128xf32>
    %4 = vector.shape_cast %3 : vector<128xf32> to vector<128x1xf32>
    %cst_5 = arith.constant 0.020833334 : f32
    %5 = vector.broadcast %cst_5 : f32 to vector<128x1xf32>
    %6 = arith.mulf %4, %5 : vector<128x1xf32>
    %7 = vector.broadcast %6 : vector<128x1xf32> to vector<128x128xf32>
    %8 = arith.subf %0, %7 : vector<128x128xf32>
    %9 = tpu.iota {dimensions = array<i32: 1>} : vector<128x128xi32>
    %c48_i32 = arith.constant 48 : i32
    %10 = vector.broadcast %c48_i32 : i32 to vector<128x128xi32>
    %11 = arith.cmpi slt, %9, %10 : vector<128x128xi32>
    %cst_6 = arith.constant 0.000000e+00 : f32
    %12 = vector.broadcast %cst_6 : f32 to vector<128x128xf32>
    %13 = arith.select %11, %8, %12 : vector<128x128xi1>, vector<128x128xf32>
    %14 = arith.mulf %13, %13 : vector<128x128xf32>
    %cst_7 = arith.constant dense<0.000000e+00> : vector<128xf32>
    %15 = vector.multi_reduction <add>, %14, %cst_7 [1] : vector<128x128xf32> to vector<128xf32>
    %16 = vector.shape_cast %15 : vector<128xf32> to vector<128x1xf32>
    %cst_8 = arith.constant 0.020833334 : f32
    %17 = vector.broadcast %cst_8 : f32 to vector<128x1xf32>
    %18 = arith.mulf %16, %17 : vector<128x1xf32>
    %cst_9 = arith.constant 9.99999974E-6 : f32
    %19 = vector.broadcast %cst_9 : f32 to vector<128x1xf32>
    %20 = arith.addf %18, %19 : vector<128x1xf32>
    %21 = math.rsqrt %20 : vector<128x1xf32>
    %22 = vector.broadcast %21 : vector<128x1xf32> to vector<128x128xf32>
    %23 = arith.mulf %13, %22 : vector<128x128xf32>
    %24 = vector.broadcast %1 : vector<1x128xf32> to vector<128x128xf32>
    %25 = arith.mulf %23, %24 : vector<128x128xf32>
    %26 = vector.broadcast %2 : vector<1x128xf32> to vector<128x128xf32>
    %27 = arith.addf %25, %26 : vector<128x128xf32>
    %c0_10 = arith.constant 0 : index
    %c0_11 = arith.constant 0 : index
    %28 = vector.load %arg6[%c0_10, %c0_11] : memref<128x128xf32, #tpu.memory_space<vmem>>, vector<128x128xf32>
    %cst_12 = arith.constant dense<0.000000e+00> : vector<128x128xf32>
    %29 = tpu.matmul %27, %28, %cst_12 {dimension_numbers = #tpu.dot_dimension_numbers<[1], [0], [0], [1], [0, 0, 1, 1], [], []>} : vector<128x128xf32>, vector<128x128xf32>, vector<128x128xf32> -> vector<128x128xf32>
    %c0_13 = arith.constant 0 : index
    %c0_14 = arith.constant 0 : index
    %30 = vector.load %arg7[%c0_13, %c0_14] : memref<1x128xf32, #tpu.memory_space<vmem>>, vector<1x128xf32>
    %31 = vector.broadcast %30 : vector<1x128xf32> to vector<128x128xf32>
    %32 = arith.addf %29, %31 : vector<128x128xf32>
    %cst_15 = arith.constant 0.000000e+00 : f32
    %33 = vector.broadcast %cst_15 : f32 to vector<128x128xf32>
    %34 = arith.maximumf %32, %33 : vector<128x128xf32>
    %c0_16 = arith.constant 0 : index
    %c0_17 = arith.constant 0 : index
    %35 = vector.load %arg8[%c0_16, %c0_17] : memref<1x128xf32, #tpu.memory_space<vmem>>, vector<1x128xf32>
    %c0_18 = arith.constant 0 : index
    %c0_19 = arith.constant 0 : index
    %36 = vector.load %arg9[%c0_18, %c0_19] : memref<1x128xf32, #tpu.memory_space<vmem>>, vector<1x128xf32>
    %cst_20 = arith.constant dense<0.000000e+00> : vector<128xf32>
    %37 = vector.multi_reduction <add>, %34, %cst_20 [1] : vector<128x128xf32> to vector<128xf32>
    %38 = vector.shape_cast %37 : vector<128xf32> to vector<128x1xf32>
    %cst_21 = arith.constant 1.562500e-02 : f32
    %39 = vector.broadcast %cst_21 : f32 to vector<128x1xf32>
    %40 = arith.mulf %38, %39 : vector<128x1xf32>
    %41 = vector.broadcast %40 : vector<128x1xf32> to vector<128x128xf32>
    %42 = arith.subf %34, %41 : vector<128x128xf32>
    %43 = tpu.iota {dimensions = array<i32: 1>} : vector<128x128xi32>
    %c64_i32 = arith.constant 64 : i32
    %44 = vector.broadcast %c64_i32 : i32 to vector<128x128xi32>
    %45 = arith.cmpi slt, %43, %44 : vector<128x128xi32>
    %cst_22 = arith.constant 0.000000e+00 : f32
    %46 = vector.broadcast %cst_22 : f32 to vector<128x128xf32>
    %47 = arith.select %45, %42, %46 : vector<128x128xi1>, vector<128x128xf32>
    %48 = arith.mulf %47, %47 : vector<128x128xf32>
    %cst_23 = arith.constant dense<0.000000e+00> : vector<128xf32>
    %49 = vector.multi_reduction <add>, %48, %cst_23 [1] : vector<128x128xf32> to vector<128xf32>
    %50 = vector.shape_cast %49 : vector<128xf32> to vector<128x1xf32>
    %cst_24 = arith.constant 1.562500e-02 : f32
    %51 = vector.broadcast %cst_24 : f32 to vector<128x1xf32>
    %52 = arith.mulf %50, %51 : vector<128x1xf32>
    %cst_25 = arith.constant 9.99999974E-6 : f32
    %53 = vector.broadcast %cst_25 : f32 to vector<128x1xf32>
    %54 = arith.addf %52, %53 : vector<128x1xf32>
    %55 = math.rsqrt %54 : vector<128x1xf32>
    %56 = vector.broadcast %55 : vector<128x1xf32> to vector<128x128xf32>
    %57 = arith.mulf %47, %56 : vector<128x128xf32>
    %58 = vector.broadcast %35 : vector<1x128xf32> to vector<128x128xf32>
    %59 = arith.mulf %57, %58 : vector<128x128xf32>
    %60 = vector.broadcast %36 : vector<1x128xf32> to vector<128x128xf32>
    %61 = arith.addf %59, %60 : vector<128x128xf32>
    %c0_26 = arith.constant 0 : index
    %c0_27 = arith.constant 0 : index
    %62 = vector.load %arg10[%c0_26, %c0_27] : memref<128x128xf32, #tpu.memory_space<vmem>>, vector<128x128xf32>
    %cst_28 = arith.constant dense<0.000000e+00> : vector<128x128xf32>
    %63 = tpu.matmul %61, %62, %cst_28 {dimension_numbers = #tpu.dot_dimension_numbers<[1], [0], [0], [1], [0, 0, 1, 1], [], []>} : vector<128x128xf32>, vector<128x128xf32>, vector<128x128xf32> -> vector<128x128xf32>
    %c0_29 = arith.constant 0 : index
    %c0_30 = arith.constant 0 : index
    %64 = vector.load %arg11[%c0_29, %c0_30] : memref<1x128xf32, #tpu.memory_space<vmem>>, vector<1x128xf32>
    %65 = vector.broadcast %64 : vector<1x128xf32> to vector<128x128xf32>
    %66 = arith.addf %63, %65 : vector<128x128xf32>
    %cst_31 = arith.constant 0.000000e+00 : f32
    %67 = vector.broadcast %cst_31 : f32 to vector<128x128xf32>
    %68 = arith.maximumf %66, %67 : vector<128x128xf32>
    %c0_32 = arith.constant 0 : index
    %c0_33 = arith.constant 0 : index
    %69 = vector.load %arg12[%c0_32, %c0_33] : memref<1x128xf32, #tpu.memory_space<vmem>>, vector<1x128xf32>
    %c0_34 = arith.constant 0 : index
    %c0_35 = arith.constant 0 : index
    %70 = vector.load %arg13[%c0_34, %c0_35] : memref<1x128xf32, #tpu.memory_space<vmem>>, vector<1x128xf32>
    %cst_36 = arith.constant dense<0.000000e+00> : vector<128xf32>
    %71 = vector.multi_reduction <add>, %68, %cst_36 [1] : vector<128x128xf32> to vector<128xf32>
    %72 = vector.shape_cast %71 : vector<128xf32> to vector<128x1xf32>
    %cst_37 = arith.constant 1.562500e-02 : f32
    %73 = vector.broadcast %cst_37 : f32 to vector<128x1xf32>
    %74 = arith.mulf %72, %73 : vector<128x1xf32>
    %75 = vector.broadcast %74 : vector<128x1xf32> to vector<128x128xf32>
    %76 = arith.subf %68, %75 : vector<128x128xf32>
    %77 = tpu.iota {dimensions = array<i32: 1>} : vector<128x128xi32>
    %c64_i32_38 = arith.constant 64 : i32
    %78 = vector.broadcast %c64_i32_38 : i32 to vector<128x128xi32>
    %79 = arith.cmpi slt, %77, %78 : vector<128x128xi32>
    %cst_39 = arith.constant 0.000000e+00 : f32
    %80 = vector.broadcast %cst_39 : f32 to vector<128x128xf32>
    %81 = arith.select %79, %76, %80 : vector<128x128xi1>, vector<128x128xf32>
    %82 = arith.mulf %81, %81 : vector<128x128xf32>
    %cst_40 = arith.constant dense<0.000000e+00> : vector<128xf32>
    %83 = vector.multi_reduction <add>, %82, %cst_40 [1] : vector<128x128xf32> to vector<128xf32>
    %84 = vector.shape_cast %83 : vector<128xf32> to vector<128x1xf32>
    %cst_41 = arith.constant 1.562500e-02 : f32
    %85 = vector.broadcast %cst_41 : f32 to vector<128x1xf32>
    %86 = arith.mulf %84, %85 : vector<128x1xf32>
    %cst_42 = arith.constant 9.99999974E-6 : f32
    %87 = vector.broadcast %cst_42 : f32 to vector<128x1xf32>
    %88 = arith.addf %86, %87 : vector<128x1xf32>
    %89 = math.rsqrt %88 : vector<128x1xf32>
    %90 = vector.broadcast %89 : vector<128x1xf32> to vector<128x128xf32>
    %91 = arith.mulf %81, %90 : vector<128x128xf32>
    %92 = vector.broadcast %69 : vector<1x128xf32> to vector<128x128xf32>
    %93 = arith.mulf %91, %92 : vector<128x128xf32>
    %94 = vector.broadcast %70 : vector<1x128xf32> to vector<128x128xf32>
    %95 = arith.addf %93, %94 : vector<128x128xf32>
    %c0_43 = arith.constant 0 : index
    %c0_44 = arith.constant 0 : index
    %96 = vector.load %arg2[%c0_43, %c0_44] : memref<128x128xf32, #tpu.memory_space<vmem>>, vector<128x128xf32>
    %c0_45 = arith.constant 0 : index
    %c0_46 = arith.constant 0 : index
    %97 = vector.load %arg14[%c0_45, %c0_46] : memref<128x512xf32, #tpu.memory_space<vmem>>, vector<128x512xf32>
    %cst_47 = arith.constant dense<0.000000e+00> : vector<128x512xf32>
    %98 = tpu.matmul %95, %97, %cst_47 {dimension_numbers = #tpu.dot_dimension_numbers<[1], [0], [0], [1], [0, 0, 1, 1], [], []>} : vector<128x128xf32>, vector<128x512xf32>, vector<128x512xf32> -> vector<128x512xf32>
    %c0_48 = arith.constant 0 : index
    %c0_49 = arith.constant 0 : index
    %99 = vector.load %arg15[%c0_48, %c0_49] : memref<128x512xf32, #tpu.memory_space<vmem>>, vector<128x512xf32>
    %cst_50 = arith.constant dense<0.000000e+00> : vector<128x512xf32>
    %100 = tpu.matmul %96, %99, %cst_50 {dimension_numbers = #tpu.dot_dimension_numbers<[1], [0], [0], [1], [0, 0, 1, 1], [], []>} : vector<128x128xf32>, vector<128x512xf32>, vector<128x512xf32> -> vector<128x512xf32>
    %101 = arith.addf %98, %100 : vector<128x512xf32>
    %c0_51 = arith.constant 0 : index
    %c0_52 = arith.constant 0 : index
    %102 = vector.load %arg16[%c0_51, %c0_52] : memref<1x512xf32, #tpu.memory_space<vmem>>, vector<1x512xf32>
    %103 = vector.broadcast %102 : vector<1x512xf32> to vector<128x512xf32>
    %104 = arith.addf %101, %103 : vector<128x512xf32>
    %105 = vector.extract_strided_slice %104 {offsets = [0, 0], sizes = [128, 128], strides = [1, 1]} : vector<128x512xf32> to vector<128x128xf32>
    %106 = arith.negf %105 : vector<128x128xf32>
    %107 = math.exp %106 : vector<128x128xf32>
    %cst_53 = arith.constant 1.000000e+00 : f32
    %108 = vector.broadcast %cst_53 : f32 to vector<128x128xf32>
    %109 = arith.addf %108, %107 : vector<128x128xf32>
    %110 = arith.divf %108, %109 : vector<128x128xf32>
    %111 = vector.extract_strided_slice %104 {offsets = [0, 128], sizes = [128, 128], strides = [1, 1]} : vector<128x512xf32> to vector<128x128xf32>
    %112 = arith.negf %111 : vector<128x128xf32>
    %113 = math.exp %112 : vector<128x128xf32>
    %cst_54 = arith.constant 1.000000e+00 : f32
    %114 = vector.broadcast %cst_54 : f32 to vector<128x128xf32>
    %115 = arith.addf %114, %113 : vector<128x128xf32>
    %116 = arith.divf %114, %115 : vector<128x128xf32>
    %117 = vector.extract_strided_slice %104 {offsets = [0, 256], sizes = [128, 128], strides = [1, 1]} : vector<128x512xf32> to vector<128x128xf32>
    %118 = vector.extract_strided_slice %104 {offsets = [0, 384], sizes = [128, 128], strides = [1, 1]} : vector<128x512xf32> to vector<128x128xf32>
    %119 = arith.mulf %110, %118 : vector<128x128xf32>
    %120 = arith.addf %117, %119 : vector<128x128xf32>
    %121 = math.tanh %120 : vector<128x128xf32>
    %cst_55 = arith.constant 1.000000e+00 : f32
    %122 = vector.broadcast %cst_55 : f32 to vector<128x128xf32>
    %123 = arith.subf %122, %116 : vector<128x128xf32>
    %124 = arith.mulf %123, %121 : vector<128x128xf32>
    %125 = arith.mulf %116, %96 : vector<128x128xf32>
    %126 = arith.addf %124, %125 : vector<128x128xf32>
    %c0_56 = arith.constant 0 : index
    %c0_57 = arith.constant 0 : index
    %127 = vector.load %arg21[%c0_56, %c0_57] : memref<128x128xf32, #tpu.memory_space<vmem>>, vector<128x128xf32>
    tpu.vector_store %arg21[%c0_56, %c0_57], %126 {strides = array<i32>} : memref<128x128xf32, #tpu.memory_space<vmem>>, vector<128x128xf32>,
    %c0_58 = arith.constant 0 : index
    %c0_59 = arith.constant 0 : index
    %128 = vector.load %arg17[%c0_58, %c0_59] : memref<1x128xf32, #tpu.memory_space<vmem>>, vector<1x128xf32>
    %c0_60 = arith.constant 0 : index
    %c0_61 = arith.constant 0 : index
    %129 = vector.load %arg18[%c0_60, %c0_61] : memref<1x128xf32, #tpu.memory_space<vmem>>, vector<1x128xf32>
    %cst_62 = arith.constant dense<0.000000e+00> : vector<128xf32>
    %130 = vector.multi_reduction <add>, %126, %cst_62 [1] : vector<128x128xf32> to vector<128xf32>
    %131 = vector.shape_cast %130 : vector<128xf32> to vector<128x1xf32>
    %cst_63 = arith.constant 1.562500e-02 : f32
    %132 = vector.broadcast %cst_63 : f32 to vector<128x1xf32>
    %133 = arith.mulf %131, %132 : vector<128x1xf32>
    %134 = vector.broadcast %133 : vector<128x1xf32> to vector<128x128xf32>
    %135 = arith.subf %126, %134 : vector<128x128xf32>
    %136 = tpu.iota {dimensions = array<i32: 1>} : vector<128x128xi32>
    %c64_i32_64 = arith.constant 64 : i32
    %137 = vector.broadcast %c64_i32_64 : i32 to vector<128x128xi32>
    %138 = arith.cmpi slt, %136, %137 : vector<128x128xi32>
    %cst_65 = arith.constant 0.000000e+00 : f32
    %139 = vector.broadcast %cst_65 : f32 to vector<128x128xf32>
    %140 = arith.select %138, %135, %139 : vector<128x128xi1>, vector<128x128xf32>
    %141 = arith.mulf %140, %140 : vector<128x128xf32>
    %cst_66 = arith.constant dense<0.000000e+00> : vector<128xf32>
    %142 = vector.multi_reduction <add>, %141, %cst_66 [1] : vector<128x128xf32> to vector<128xf32>
    %143 = vector.shape_cast %142 : vector<128xf32> to vector<128x1xf32>
    %cst_67 = arith.constant 1.562500e-02 : f32
    %144 = vector.broadcast %cst_67 : f32 to vector<128x1xf32>
    %145 = arith.mulf %143, %144 : vector<128x1xf32>
    %cst_68 = arith.constant 9.99999974E-6 : f32
    %146 = vector.broadcast %cst_68 : f32 to vector<128x1xf32>
    %147 = arith.addf %145, %146 : vector<128x1xf32>
    %148 = math.rsqrt %147 : vector<128x1xf32>
    %149 = vector.broadcast %148 : vector<128x1xf32> to vector<128x128xf32>
    %150 = arith.mulf %140, %149 : vector<128x128xf32>
    %151 = vector.broadcast %128 : vector<1x128xf32> to vector<128x128xf32>
    %152 = arith.mulf %150, %151 : vector<128x128xf32>
    %153 = vector.broadcast %129 : vector<1x128xf32> to vector<128x128xf32>
    %154 = arith.addf %152, %153 : vector<128x128xf32>
    %c0_69 = arith.constant 0 : index
    %c0_70 = arith.constant 0 : index
    %155 = vector.load %arg19[%c0_69, %c0_70] : memref<128x128xf32, #tpu.memory_space<vmem>>, vector<128x128xf32>
    %cst_71 = arith.constant dense<0.000000e+00> : vector<128x128xf32>
    %156 = tpu.matmul %154, %155, %cst_71 {dimension_numbers = #tpu.dot_dimension_numbers<[1], [0], [0], [1], [0, 0, 1, 1], [], []>} : vector<128x128xf32>, vector<128x128xf32>, vector<128x128xf32> -> vector<128x128xf32>
    %c0_72 = arith.constant 0 : index
    %c0_73 = arith.constant 0 : index
    %157 = vector.load %arg20[%c0_72, %c0_73] : memref<1x128xf32, #tpu.memory_space<vmem>>, vector<1x128xf32>
    %158 = vector.broadcast %157 : vector<1x128xf32> to vector<128x128xf32>
    %159 = arith.addf %156, %158 : vector<128x128xf32>
    %c0_74 = arith.constant 0 : index
    %c0_75 = arith.constant 0 : index
    %160 = vector.load %arg3[%c0_74, %c0_75] : memref<128x128xf32, #tpu.memory_space<vmem>>, vector<128x128xf32>
    %cst_76 = arith.constant 5.000000e-01 : f32
    %161 = vector.broadcast %cst_76 : f32 to vector<128x128xf32>
    %162 = arith.cmpf ogt, %160, %161 : vector<128x128xf32>
    %cst_77 = arith.constant -1.000000e+10 : f32
    %163 = vector.broadcast %cst_77 : f32 to vector<128x128xf32>
    %164 = arith.select %162, %159, %163 : vector<128x128xi1>, vector<128x128xf32>
    %cst_78 = arith.constant dense<0xFF800000> : vector<128xf32>
    %165 = vector.multi_reduction <maximumf>, %164, %cst_78 [1] : vector<128x128xf32> to vector<128xf32>
    %166 = vector.shape_cast %165 : vector<128xf32> to vector<128x1xf32>
    %167 = vector.broadcast %166 : vector<128x1xf32> to vector<128x128xf32>
    %168 = arith.subf %164, %167 : vector<128x128xf32>
    %169 = math.exp %168 : vector<128x128xf32>
    %cst_79 = arith.constant dense<0.000000e+00> : vector<128xf32>
    %170 = vector.multi_reduction <add>, %169, %cst_79 [1] : vector<128x128xf32> to vector<128xf32>
    %171 = vector.shape_cast %170 : vector<128xf32> to vector<128x1xf32>
    %172 = math.log %171 : vector<128x1xf32>
    %173 = arith.addf %172, %166 : vector<128x1xf32>
    %174 = tpu.iota {dimensions = array<i32: 1>} : vector<128x128xi32>
    %175 = vector.broadcast %166 : vector<128x1xf32> to vector<128x128xf32>
    %176 = arith.cmpf oge, %164, %175 : vector<128x128xf32>
    %c128_i32 = arith.constant 128 : i32
    %177 = vector.broadcast %c128_i32 : i32 to vector<128x128xi32>
    %178 = arith.select %176, %174, %177 : vector<128x128xi1>, vector<128x128xi32>
    %cst_80 = arith.constant dense<2147483647> : vector<128xi32>
    %179 = vector.multi_reduction <minsi>, %178, %cst_80 [1] : vector<128x128xi32> to vector<128xi32>
    %180 = vector.shape_cast %179 : vector<128xi32> to vector<128x1xi32>
    %181 = tpu.iota {dimensions = array<i32: 1>} : vector<128x128xi32>
    %c0_i32 = arith.constant 0 : i32
    %182 = vector.broadcast %c0_i32 : i32 to vector<128x128xi32>
    %183 = arith.cmpi eq, %181, %182 : vector<128x128xi32>
    %184 = arith.sitofp %180 : vector<128x1xi32> to vector<128x1xf32>
    %c1_i32 = arith.constant 1 : i32
    %185 = vector.broadcast %c1_i32 : i32 to vector<128x128xi32>
    %186 = arith.cmpi eq, %181, %185 : vector<128x128xi32>
    %187 = arith.subf %166, %173 : vector<128x1xf32>
    %cst_81 = arith.constant 0.000000e+00 : f32
    %188 = vector.shape_cast %187 : vector<128x1xf32> to vector<128x1xf32>
    %189 = vector.broadcast %188 : vector<128x1xf32> to vector<128x128xf32>
    %190 = vector.broadcast %cst_81 : f32 to vector<128x128xf32>
    %191 = arith.select %186, %189, %190 : vector<128x128xi1>, vector<128x128xf32>
    %192 = vector.shape_cast %184 : vector<128x1xf32> to vector<128x1xf32>
    %193 = vector.broadcast %192 : vector<128x1xf32> to vector<128x128xf32>
    %194 = arith.select %183, %193, %191 : vector<128x128xi1>, vector<128x128xf32>
    %c0_82 = arith.constant 0 : index
    %c0_83 = arith.constant 0 : index
    %195 = vector.load %arg22[%c0_82, %c0_83] : memref<128x128xf32, #tpu.memory_space<vmem>>, vector<128x128xf32>
    tpu.vector_store %arg22[%c0_82, %c0_83], %194 {strides = array<i32>} : memref<128x128xf32, #tpu.memory_space<vmem>>, vector<128x128xf32>,
    return
  }
  func.func @transform_0(%arg0: i32) -> (i32, i32) {
    %c0_i32 = arith.constant 0 : i32
    %c0_i32_0 = arith.constant 0 : i32
    return %arg0, %c0_i32 : i32, i32
  }
  func.func @transform_1(%arg0: i32) -> (i32, i32) {
    %c0_i32 = arith.constant 0 : i32
    %c0_i32_0 = arith.constant 0 : i32
    return %arg0, %c0_i32 : i32, i32
  }
  func.func @transform_2(%arg0: i32) -> (i32, i32) {
    %c0_i32 = arith.constant 0 : i32
    %c0_i32_0 = arith.constant 0 : i32
    return %arg0, %c0_i32 : i32, i32
  }
  func.func @transform_3(%arg0: i32) -> (i32, i32) {
    %c0_i32 = arith.constant 0 : i32
    %c0_i32_0 = arith.constant 0 : i32
    %c0_i32_1 = arith.constant 0 : i32
    return %c0_i32, %c0_i32_0 : i32, i32
  }
  func.func @transform_4(%arg0: i32) -> (i32, i32) {
    %c0_i32 = arith.constant 0 : i32
    %c0_i32_0 = arith.constant 0 : i32
    %c0_i32_1 = arith.constant 0 : i32
    return %c0_i32, %c0_i32_0 : i32, i32
  }
  func.func @transform_5(%arg0: i32) -> (i32, i32) {
    %c0_i32 = arith.constant 0 : i32
    %c0_i32_0 = arith.constant 0 : i32
    %c0_i32_1 = arith.constant 0 : i32
    return %c0_i32, %c0_i32_0 : i32, i32
  }
  func.func @transform_6(%arg0: i32) -> (i32, i32) {
    %c0_i32 = arith.constant 0 : i32
    %c0_i32_0 = arith.constant 0 : i32
    %c0_i32_1 = arith.constant 0 : i32
    return %c0_i32, %c0_i32_0 : i32, i32
  }
  func.func @transform_7(%arg0: i32) -> (i32, i32) {
    %c0_i32 = arith.constant 0 : i32
    %c0_i32_0 = arith.constant 0 : i32
    %c0_i32_1 = arith.constant 0 : i32
    return %c0_i32, %c0_i32_0 : i32, i32
  }
  func.func @transform_8(%arg0: i32) -> (i32, i32) {
    %c0_i32 = arith.constant 0 : i32
    %c0_i32_0 = arith.constant 0 : i32
    %c0_i32_1 = arith.constant 0 : i32
    return %c0_i32, %c0_i32_0 : i32, i32
  }
  func.func @transform_9(%arg0: i32) -> (i32, i32) {
    %c0_i32 = arith.constant 0 : i32
    %c0_i32_0 = arith.constant 0 : i32
    %c0_i32_1 = arith.constant 0 : i32
    return %c0_i32, %c0_i32_0 : i32, i32
  }
  func.func @transform_10(%arg0: i32) -> (i32, i32) {
    %c0_i32 = arith.constant 0 : i32
    %c0_i32_0 = arith.constant 0 : i32
    %c0_i32_1 = arith.constant 0 : i32
    return %c0_i32, %c0_i32_0 : i32, i32
  }
  func.func @transform_11(%arg0: i32) -> (i32, i32) {
    %c0_i32 = arith.constant 0 : i32
    %c0_i32_0 = arith.constant 0 : i32
    %c0_i32_1 = arith.constant 0 : i32
    return %c0_i32, %c0_i32_0 : i32, i32
  }
  func.func @transform_12(%arg0: i32) -> (i32, i32) {
    %c0_i32 = arith.constant 0 : i32
    %c0_i32_0 = arith.constant 0 : i32
    %c0_i32_1 = arith.constant 0 : i32
    return %c0_i32, %c0_i32_0 : i32, i32
  }
  func.func @transform_13(%arg0: i32) -> (i32, i32) {
    %c0_i32 = arith.constant 0 : i32
    %c0_i32_0 = arith.constant 0 : i32
    %c0_i32_1 = arith.constant 0 : i32
    return %c0_i32, %c0_i32_0 : i32, i32
  }
  func.func @transform_14(%arg0: i32) -> (i32, i32) {
    %c0_i32 = arith.constant 0 : i32
    %c0_i32_0 = arith.constant 0 : i32
    %c0_i32_1 = arith.constant 0 : i32
    return %c0_i32, %c0_i32_0 : i32, i32
  }
  func.func @transform_15(%arg0: i32) -> (i32, i32) {
    %c0_i32 = arith.constant 0 : i32
    %c0_i32_0 = arith.constant 0 : i32
    %c0_i32_1 = arith.constant 0 : i32
    return %c0_i32, %c0_i32_0 : i32, i32
  }
  func.func @transform_16(%arg0: i32) -> (i32, i32) {
    %c0_i32 = arith.constant 0 : i32
    %c0_i32_0 = arith.constant 0 : i32
    %c0_i32_1 = arith.constant 0 : i32
    return %c0_i32, %c0_i32_0 : i32, i32
  }
  func.func @transform_17(%arg0: i32) -> (i32, i32) {
    %c0_i32 = arith.constant 0 : i32
    %c0_i32_0 = arith.constant 0 : i32
    %c0_i32_1 = arith.constant 0 : i32
    return %c0_i32, %c0_i32_0 : i32, i32
  }
  func.func @transform_18(%arg0: i32) -> (i32, i32) {
    %c0_i32 = arith.constant 0 : i32
    %c0_i32_0 = arith.constant 0 : i32
    %c0_i32_1 = arith.constant 0 : i32
    return %c0_i32, %c0_i32_0 : i32, i32
  }
  func.func @transform_19(%arg0: i32) -> (i32, i32) {
    %c0_i32 = arith.constant 0 : i32
    %c0_i32_0 = arith.constant 0 : i32
    %c0_i32_1 = arith.constant 0 : i32
    return %c0_i32, %c0_i32_0 : i32, i32
  }
  func.func @transform_20(%arg0: i32) -> (i32, i32) {
    %c0_i32 = arith.constant 0 : i32
    %c0_i32_0 = arith.constant 0 : i32
    return %arg0, %c0_i32 : i32, i32
  }
  func.func @transform_21(%arg0: i32) -> (i32, i32) {
    %c0_i32 = arith.constant 0 : i32
    %c0_i32_0 = arith.constant 0 : i32
    return %arg0, %c0_i32 : i32, i32
  }
}

</mosaic_0001>

<bundles_post_ra>
// kernel: r_actor_forward.1
= control target key start
LH: loop header
LB: loop body
LE: loop exit
PB: predicated region body
PF: predicated region fallthrough
CT: control target
= control target key end

     0   :  { %s7665_s0 = inlined_call_operand.vmem [shape: f32[256,128], index: 0, kind: input, shape index: {}]   ;;  %s7666_s1 = inlined_call_operand.vmem [shape: f32[256,128], index: 1, kind: input, shape index: {}, may-alias: {1,20}]   ;;  %s7667_s2 = inlined_call_operand.vmem [shape: f32[256,128], index: 2, kind: input, shape index: {}]   ;;  %s7668_s3 = inlined_call_operand.vmem [shape: f32[1,128], index: 3, kind: input, shape index: {}]   ;;  %s7669_s4 = inlined_call_operand.vmem [shape: f32[1,128], index: 4, kind: input, shape index: {}]   ;;  %s7670_s5 = inlined_call_operand.vmem [shape: f32[128,128], index: 5, kind: input, shape index: {}]   ;;  %s7671_s6 = inlined_call_operand.vmem [shape: f32[1,128], index: 6, kind: input, shape index: {}]   ;;  %s7672_s7 = inlined_call_operand.vmem [shape: f32[1,128], index: 7, kind: input, shape index: {}]   ;;  %s7673_s8 = inlined_call_operand.vmem [shape: f32[1,128], index: 8, kind: input, shape index: {}]   ;;  %s7674_s9 = inlined_call_operand.vmem [shape: f32[128,128], index: 9, kind: input, shape index: {}]   ;;  %s7675_s10 = inlined_call_operand.vmem [shape: f32[1,128], index: 10, kind: input, shape index: {}]   ;;  %s7676_s11 = inlined_call_operand.vmem [shape: f32[1,128], index: 11, kind: input, shape index: {}]   ;;  %s7677_s12 = inlined_call_operand.vmem [shape: f32[1,128], index: 12, kind: input, shape index: {}]   ;;  %s7678_s13 = inlined_call_operand.vmem [shape: f32[128,512], index: 13, kind: input, shape index: {}]   ;;  %s7679_s14 = inlined_call_operand.vmem [shape: f32[128,512], index: 14, kind: input, shape index: {}]   ;;  %s7680_s15 = inlined_call_operand.vmem [shape: f32[1,512], index: 15, kind: input, shape index: {}]   ;;  %s7681_s16 = inlined_call_operand.vmem [shape: f32[1,128], index: 16, kind: input, shape index: {}]   ;;  %s7682_s17 = inlined_call_operand.vmem [shape: f32[1,128], index: 17, kind: input, shape index: {}]   ;;  %s7683_s18 = inlined_call_operand.vmem [shape: f32[128,128], index: 18, kind: input, shape index: {}]   ;;  %s7684_s19 = inlined_call_operand.vmem [shape: f32[1,128], index: 19, kind: input, shape index: {}]   ;;  %s7685_s20 = inlined_call_operand.vmem [shape: f32[256,128], index: 20, kind: output, shape index: {0}, may-alias: {1,20}]   ;;  %s7686_s21 = inlined_call_operand.vmem [shape: f32[256,128], index: 21, kind: output, shape index: {1}]  }
   0x1   :  { %7699 = sst [smem:[#allocation8_spill]] %s7665_s0 }
   0x2   :  { %7700 = sst [smem:[#allocation9_spill]] %s7666_s1 }
   0x3   :  { %7701 = sst [smem:[#allocation10_spill]] %s7667_s2  ;;  %s5189_s2 = smov 0  }
   0x4   :  { %7702 = sst [smem:[#allocation11_spill]] %s7668_s3 }
   0x5   :  { %7703 = sst [smem:[#allocation12_spill]] %s7669_s4 }
   0x6   :  { %7704 = sst [smem:[#allocation13_spill]] %s7670_s5 }
   0x7 LB: > { %s4080_s25 = sadd.s32 4294967295, %s5076_s2   ;;  %p4084_p0 = scmp.ge.s32.totalorder %s5076_s2, 1  ;;  %s5076_s2 = sphi %s5189_s2, %s32_s2  }
   0x8   : > { %p613_p1 = scmp.lt.s32.totalorder %s5076_s2, 3 }
   0xa   : > { %p614_p2 = pnand %p4084_p0, %p613_p1 }
   0xc   : > { %617 = sbr.rel (%p614_p2) target bundleno = 2705 (0xa91), region = 100 }
  0x13   : > { %s4085_s26 = sshll.u32 %s4080_s25, 4  ;;  %s7705_s29 = sld [smem:[#allocation8_spill]]  ;;  %v800_v22 = vlaneseq }
  0x14   : > { %p689_p3 = scmp.lt.s32.totalorder %s4085_s26, 31  ;;  %s7706_s5 = sld [smem:[#allocation13_spill]] }
  0x15   : > { %v5258_v23 = vand.u32 127, %v800_v22  ;;  %s7708_s30 = sld [smem:[#allocation12_spill]]  ;;  %s7710_s4 = sld [smem:[#allocation10_spill]] }
  0x16   : > { %s7724_s26 = smov (!%p689_p3, %s4085_s26), 31 }
  0x17   : > { %s5197_s27 = sshll.u32 %s7724_s26, 3  ;;  %vm802_vm0 = vcmp.lt.s32.totalorder %v5258_v23, 48  ;;  %vm1225_vm1 = vcmp.lt.s32.totalorder %v5258_v23, 64 }
  0x18   : > { %s6716_s28 = scalar_lea.vmem %s7685_s20, %s5197_s27  ;;  %s7531_s25 = scalar_lea.vmem %s7686_s21, %s5197_s27 }
  0x19   : > { %s692_s0 = scalar_lea.vmem %s7705_s29, %s5197_s27  ;;  %s7707_s29 = sld [smem:[#allocation11_spill]] }
  0x1a   : > { %v718_v0 = vld [vmem:[%s692_s0] sm:$0xff]  ;;  %v720_v1 = vld [vmem:[%s692_s0 + $0x10] sm:$0xff]  ;;  %v5203_v2 = vld [vmem:[%s692_s0 + $0x8] sm:$0xff] }
  0x1b   : > { %736 = vadd.xlane.f32.xlu0 %v718_v0  ;;  %740 = vadd.xlane.f32.xlu1 %v720_v1  ;;  %v5205_v3 = vld [vmem:[%s692_s0 + $0x18] sm:$0xff]  ;;  %v5209_v4 = vld [vmem:[%s692_s0 + $0x20] sm:$0xff]  ;;  %v5211_v5 = vld [vmem:[%s692_s0 + $0x28] sm:$0xff] }
  0x1c   : > { %v5215_v6 = vld [vmem:[%s692_s0 + $0x30] sm:$0xff]  ;;  %v5217_v7 = vld [vmem:[%s692_s0 + $0x38] sm:$0xff]  ;;  %v5221_v8 = vld [vmem:[%s692_s0 + $0x40] sm:$0xff] }
  0x1d   : > { %v5223_v9 = vld [vmem:[%s692_s0 + $0x48] sm:$0xff]  ;;  %v5227_v10 = vld [vmem:[%s692_s0 + $0x50] sm:$0xff]  ;;  %v5229_v11 = vld [vmem:[%s692_s0 + $0x58] sm:$0xff] }
  0x1e   : > { %v5233_v12 = vld [vmem:[%s692_s0 + $0x60] sm:$0xff]  ;;  %v5235_v13 = vld [vmem:[%s692_s0 + $0x68] sm:$0xff]  ;;  %v5239_v14 = vld [vmem:[%s692_s0 + $0x70] sm:$0xff] }
  0x1f   : > { %738 = vadd.xlane.f32.xlu0 %v5203_v2  ;;  %742 = vadd.xlane.f32.xlu1 %v5205_v3  ;;  %v5241_v15 = vld [vmem:[%s692_s0 + $0x78] sm:$0xff]  ;;  %v975_v16 = vld [vmem:[%s7706_s5] sm:$0xff]  ;;  %v976_v17 = vld [vmem:[%s7706_s5 + $0x8] sm:$0xff] }
  0x20   : > { %v977_v18 = vld [vmem:[%s7706_s5 + $0x10] sm:$0xff]  ;;  %v4404_v19 = vpack.c.bf16 %v976_v17, %v975_v16  ;;  %v978_v20 = vld [vmem:[%s7706_s5 + $0x18] sm:$0xff]  ;;  %v979_v16 = vld [vmem:[%s7706_s5 + $0x20] sm:$0xff] }
  0x21   : > { %v4408_v21 = vpack.c.bf16 %v978_v20, %v977_v18  ;;  %v980_v17 = vld [vmem:[%s7706_s5 + $0x28] sm:$0xff] }
  0x22   : > { %4405 = vmatprep.subr.bf16.mxu0 %v4404_v19 }
  0x23   : > { %744 = vadd.xlane.f32.xlu0 %v5209_v4  ;;  %746 = vadd.xlane.f32.xlu1 %v5211_v5 }
  0x24   : > { %4407 = vmatpush3.bf16.msra.mxu0 %v4404_v19 }
  0x25   : > { %4409 = vmatprep.subr.bf16.mxu0 %v4408_v21 }
  0x27   : > { %748 = vadd.xlane.f32.xlu0 %v5215_v6  ;;  %750 = vadd.xlane.f32.xlu1 %v5217_v7 }
  0x28   : > { %4411 = vmatpush3.bf16.msra.mxu0 %v4408_v21  ;;  %v4412_v21 = vpack.c.bf16 %v980_v17, %v979_v16 }
  0x2a   : > { %4413 = vmatprep.subr.bf16.mxu0 %v4412_v21 }
  0x2b   : > { %752 = vadd.xlane.f32.xlu0 %v5221_v8  ;;  %754 = vadd.xlane.f32.xlu1 %v5223_v9 }
  0x2c   : > { %4415 = vmatpush3.bf16.msra.mxu0 %v4412_v21 }
  0x2f   : > { %756 = vadd.xlane.f32.xlu0 %v5227_v10  ;;  %758 = vadd.xlane.f32.xlu1 %v5229_v11 }
  0x33   : > { %760 = vadd.xlane.f32.xlu0 %v5233_v12  ;;  %762 = vadd.xlane.f32.xlu1 %v5235_v13 }
  0x37   : > { %764 = vadd.xlane.f32.xlu0 %v5239_v14  ;;  %766 = vadd.xlane.f32.xlu1 %v5241_v15 }
  0xa8   : > { %v737_v24 = vpop.xlane.xlu0 %736  ;;  %v741_v25 = vpop.xlane.xlu1 %740 }
  0xa9   : > { %v768_v26 = vmul.f32 0.020833334, %v737_v24  ;;  %v770_v27 = vmul.f32 0.020833334, %v741_v25 }
  0xab   : > { %v784_v28 = vsub.f32 %v718_v0, %v768_v26  ;;  %v786_v29 = vsub.f32 %v720_v1, %v770_v27 }
  0xac   : > { %v739_v30 = vpop.xlane.xlu0 %738  ;;  %v743_v31 = vpop.xlane.xlu1 %742 }
  0xad   : > { %v769_v32 = vmul.f32 0.020833334, %v739_v30  ;;  %v771_v33 = vmul.f32 0.020833334, %v743_v31  ;;  %v5263_v34 = vsel %vm802_vm0, %v784_v28, 0.0  ;;  %v5267_v35 = vsel %vm802_vm0, %v786_v29, 0.0 }
  0xae   : > { %v819_v36 = vmul.f32 %v5263_v34, %v5263_v34  ;;  %v821_v41 = vmul.f32 %v5267_v35, %v5267_v35 }
  0xaf   : > { %v785_v37 = vsub.f32 %v5203_v2, %v769_v32  ;;  %v787_v38 = vsub.f32 %v5205_v3, %v771_v33  ;;  %v982_v33 = vld [vmem:[%s7706_s5 + $0x38] sm:$0xff] }
  0xb0   : > { %835 = vadd.xlane.f32.xlu0 %v819_v36  ;;  %v745_v39 = vpop.xlane.xlu0 %744  ;;  %v747_v40 = vpop.xlane.xlu1 %746 }
  0xb1   : > { %v772_v42 = vmul.f32 0.020833334, %v745_v39  ;;  %v773_v43 = vmul.f32 0.020833334, %v747_v40  ;;  %v5277_v44 = vsel %vm802_vm0, %v785_v37, 0.0  ;;  %v5281_v45 = vsel %vm802_vm0, %v787_v38, 0.0 }
  0xb2   : > { %v820_v46 = vmul.f32 %v5277_v44, %v5277_v44  ;;  %v822_v51 = vmul.f32 %v5281_v45, %v5281_v45 }
  0xb3   : > { %v788_v47 = vsub.f32 %v5209_v4, %v772_v42  ;;  %v789_v48 = vsub.f32 %v5211_v5, %v773_v43 }
  0xb4   : > { %839 = vadd.xlane.f32.xlu0 %v821_v41  ;;  %837 = vadd.xlane.f32.xlu1 %v820_v46  ;;  %v749_v49 = vpop.xlane.xlu0 %748  ;;  %v751_v50 = vpop.xlane.xlu1 %750 }
  0xb5   : > { %v774_v52 = vmul.f32 0.020833334, %v749_v49  ;;  %v775_v53 = vmul.f32 0.020833334, %v751_v50  ;;  %v5291_v54 = vsel %vm802_vm0, %v788_v47, 0.0  ;;  %v5295_v55 = vsel %vm802_vm0, %v789_v48, 0.0 }
  0xb6   : > { %v823_v56 = vmul.f32 %v5291_v54, %v5291_v54  ;;  %v824_v61 = vmul.f32 %v5295_v55, %v5295_v55  ;;  %v984_v48 = vld [vmem:[%s7706_s5 + $0x48] sm:$0xff] }
  0xb7   : > { %v790_v57 = vsub.f32 %v5215_v6, %v774_v52  ;;  %v791_v58 = vsub.f32 %v5217_v7, %v775_v53 }
  0xb8   : > { %841 = vadd.xlane.f32.xlu1 %v822_v51  ;;  %843 = vadd.xlane.f32.xlu0 %v823_v56  ;;  %v753_v59 = vpop.xlane.xlu0 %752  ;;  %v755_v60 = vpop.xlane.xlu1 %754 }
  0xb9   : > { %v776_v62 = vmul.f32 0.020833334, %v753_v59  ;;  %v777_v63 = vmul.f32 0.020833334, %v755_v60  ;;  %v5305_v0 = vsel %vm802_vm0, %v790_v57, 0.0  ;;  %v5309_v1 = vsel %vm802_vm0, %v791_v58, 0.0 }
  0xba   : > { %v825_v2 = vmul.f32 %v5305_v0, %v5305_v0  ;;  %v826_v7 = vmul.f32 %v5309_v1, %v5309_v1  ;;  %v987_v60 = vld [vmem:[%s7706_s5 + $0x60] sm:$0xff] }
  0xbb   : > { %v792_v3 = vsub.f32 %v5221_v8, %v776_v62  ;;  %v793_v4 = vsub.f32 %v5223_v9, %v777_v63  ;;  %v989_v63 = vld [vmem:[%s7706_s5 + $0x70] sm:$0xff] }
  0xbc   : > { %845 = vadd.xlane.f32.xlu1 %v824_v61  ;;  %847 = vadd.xlane.f32.xlu0 %v825_v2  ;;  %v757_v5 = vpop.xlane.xlu0 %756  ;;  %v759_v6 = vpop.xlane.xlu1 %758  ;;  %v988_v61 = vld [vmem:[%s7706_s5 + $0x68] sm:$0xff]  ;;  %v990_v2 = vld [vmem:[%s7706_s5 + $0x78] sm:$0xff] }
  0xbd   : > { %v778_v18 = vmul.f32 0.020833334, %v757_v5  ;;  %v779_v19 = vmul.f32 0.020833334, %v759_v6  ;;  %v5325_v8 = vsel %vm802_vm0, %v792_v3, 0.0  ;;  %v5329_v9 = vsel %vm802_vm0, %v793_v4, 0.0 }
  0xbe   : > { %v827_v20 = vmul.f32 %v5325_v8, %v5325_v8  ;;  %v828_v28 = vmul.f32 %v5329_v9, %v5329_v9  ;;  %v4428_v62 = vpack.c.bf16 %v988_v61, %v987_v60  ;;  %v4432_v3 = vpack.c.bf16 %v990_v2, %v989_v63 }
  0xbf   : > { %v794_v24 = vsub.f32 %v5227_v10, %v778_v18  ;;  %v795_v25 = vsub.f32 %v5229_v11, %v779_v19  ;;  %v981_v11 = vld [vmem:[%s7706_s5 + $0x30] sm:$0xff] }
  0xc0   : > { %849 = vadd.xlane.f32.xlu1 %v826_v7  ;;  %851 = vadd.xlane.f32.xlu0 %v827_v20  ;;  %v761_v26 = vpop.xlane.xlu0 %760  ;;  %v763_v27 = vpop.xlane.xlu1 %762  ;;  %v4416_v38 = vpack.c.bf16 %v982_v33, %v981_v11 }
  0xc1   : > { %v780_v29 = vmul.f32 0.020833334, %v761_v26  ;;  %v781_v30 = vmul.f32 0.020833334, %v763_v27  ;;  %v5339_v31 = vsel %vm802_vm0, %v794_v24, 0.0  ;;  %v5343_v32 = vsel %vm802_vm0, %v795_v25, 0.0 }
  0xc2   : > { %v829_v10 = vmul.f32 %v5339_v31, %v5339_v31  ;;  %v830_v41 = vmul.f32 %v5343_v32, %v5343_v32  ;;  %4417 = vmatprep.subr.bf16.mxu0 %v4416_v38 }
  0xc3   : > { %v796_v36 = vsub.f32 %v5233_v12, %v780_v29  ;;  %v797_v37 = vsub.f32 %v5235_v13, %v781_v30  ;;  %4419 = vmatpush3.bf16.msra.mxu0 %v4416_v38  ;;  %v983_v13 = vld [vmem:[%s7706_s5 + $0x40] sm:$0xff] }
  0xc4   : > { %853 = vadd.xlane.f32.xlu1 %v828_v28  ;;  %855 = vadd.xlane.f32.xlu0 %v829_v10  ;;  %v765_v39 = vpop.xlane.xlu0 %764  ;;  %v767_v40 = vpop.xlane.xlu1 %766  ;;  %v4420_v51 = vpack.c.bf16 %v984_v48, %v983_v13  ;;  %v5410_v38 = vld [vmem:[%s7707_s29] ss:$0 sm:$0xff]  ;;  %s7709_s29 = sld [smem:[#allocation9_spill]] }
  0xc5   : > { %v782_v42 = vmul.f32 0.020833334, %v765_v39  ;;  %v783_v43 = vmul.f32 0.020833334, %v767_v40  ;;  %v5359_v46 = vsel %vm802_vm0, %v796_v36, 0.0  ;;  %v5363_v47 = vsel %vm802_vm0, %v797_v37, 0.0 }
  0xc6   : > { %v831_v12 = vmul.f32 %v5359_v46, %v5359_v46  ;;  %v832_v52 = vmul.f32 %v5363_v47, %v5363_v47  ;;  %4421 = vmatprep.subr.bf16.mxu0 %v4420_v51 }
  0xc7   : > { %v798_v49 = vsub.f32 %v5239_v14, %v782_v42  ;;  %v799_v50 = vsub.f32 %v5241_v15, %v783_v43  ;;  %v985_v14 = vld [vmem:[%s7706_s5 + $0x50] sm:$0xff]  ;;  %v986_v15 = vld [vmem:[%s7706_s5 + $0x58] sm:$0xff]  ;;  %4423 = vmatpush3.bf16.msra.mxu0 %v4420_v51 }
  0xc8   : > { %857 = vadd.xlane.f32.xlu1 %v830_v41  ;;  %859 = vadd.xlane.f32.xlu0 %v831_v12  ;;  %v4424_v58 = vpack.c.bf16 %v986_v15, %v985_v14  ;;  %v5416_v12 = vld [vmem:[%s7708_s30] ss:$0 sm:$0xff]  ;;  %s7127_s30 = scalar_lea.vmem %s7710_s4, %s5197_s27 }
  0xc9   : > { %v5379_v53 = vsel %vm802_vm0, %v798_v49, 0.0  ;;  %v5383_v56 = vsel %vm802_vm0, %v799_v50, 0.0 }
  0xca   : > { %v833_v57 = vmul.f32 %v5379_v53, %v5379_v53  ;;  %v834_v59 = vmul.f32 %v5383_v56, %v5383_v56  ;;  %4425 = vmatprep.subr.bf16.mxu0 %v4424_v58  ;;  %s6073_s0 = scalar_lea.vmem %s7709_s29, %s5197_s27 }
  0xcb   : > { %4427 = vmatpush3.bf16.msra.mxu0 %v4424_v58 }
  0xcc   : > { %861 = vadd.xlane.f32.xlu1 %v832_v52  ;;  %863 = vadd.xlane.f32.xlu0 %v833_v57 }
  0xcd   : > { %4429 = vmatprep.subr.bf16.mxu0 %v4428_v62 }
  0xcf   : > { %4431 = vmatpush3.bf16.msra.mxu0 %v4428_v62 }
  0xd0   : > { %865 = vadd.xlane.f32.xlu1 %v834_v59  ;;  %4433 = vmatprep.subr.bf16.mxu0 %v4432_v3 }
  0xd3   : > { %4435 = vmatpush3.bf16.msra.mxu0 %v4432_v3 }
 0x13d   : > { %v836_v4 = vpop.xlane.xlu0 %835 }
 0x13e   : > { %v867_v5 = vmul.f32 0.020833334, %v836_v4 }
 0x140   : > { %v883_v6 = vadd.f32 1e-05, %v867_v5 }
 0x141   : > { %v838_v7 = vpop.xlane.xlu1 %837  ;;  %v840_v16 = vpop.xlane.xlu0 %839 }
 0x142   : > { %4717 = vrsqrt.f32 %v883_v6  ;;  %v868_v17 = vmul.f32 0.020833334, %v838_v7  ;;  %v869_v18 = vmul.f32 0.020833334, %v840_v16 }
 0x144   : > { %v884_v19 = vadd.f32 1e-05, %v868_v17  ;;  %v885_v20 = vadd.f32 1e-05, %v869_v18 }
 0x145   : > { %v842_v21 = vpop.xlane.xlu1 %841  ;;  %v844_v24 = vpop.xlane.xlu0 %843 }
 0x146   : > { %4719 = vrsqrt.f32 %v884_v19  ;;  %v870_v25 = vmul.f32 0.020833334, %v842_v21  ;;  %v871_v26 = vmul.f32 0.020833334, %v844_v24 }
 0x147   : > { %4721 = vrsqrt.f32 %v885_v20 }
 0x148   : > { %v886_v27 = vadd.f32 1e-05, %v870_v25  ;;  %v887_v28 = vadd.f32 1e-05, %v871_v26 }
 0x149   : > { %v846_v29 = vpop.xlane.xlu1 %845  ;;  %v848_v30 = vpop.xlane.xlu0 %847 }
 0x14a   : > { %4723 = vrsqrt.f32 %v886_v27  ;;  %v872_v10 = vmul.f32 0.020833334, %v846_v29  ;;  %v873_v11 = vmul.f32 0.020833334, %v848_v30 }
 0x14b   : > { %4725 = vrsqrt.f32 %v887_v28 }
 0x14c   : > { %v4718_v33 = vpop.eup %4717  ;;  %v888_v36 = vadd.f32 1e-05, %v872_v10  ;;  %v889_v37 = vadd.f32 1e-05, %v873_v11 }
 0x14d   : > { %v850_v39 = vpop.xlane.xlu1 %849  ;;  %v852_v40 = vpop.xlane.xlu0 %851  ;;  %v915_v41 = vmul.f32 %v4718_v33, %v5263_v34 }
 0x14e   : > { %4727 = vrsqrt.f32 %v888_v36  ;;  %v874_v42 = vmul.f32 0.020833334, %v850_v39  ;;  %v875_v43 = vmul.f32 0.020833334, %v852_v40 }
 0x14f   : > { %4729 = vrsqrt.f32 %v889_v37  ;;  %v937_v13 = vmul.f32 %v5410_v38, %v915_v41 }
 0x150   : > { %v4720_v48 = vpop.eup %4719  ;;  %v890_v49 = vadd.f32 1e-05, %v874_v42  ;;  %v891_v50 = vadd.f32 1e-05, %v875_v43 }
 0x151   : > { %v4722_v51 = vpop.eup %4721  ;;  %v854_v52 = vpop.xlane.xlu1 %853  ;;  %v959_v15 = vadd.f32 %v5416_v12, %v937_v13  ;;  %v916_v34 = vmul.f32 %v4720_v48, %v5277_v44 }
 0x152   : > { %v856_v14 = vpop.xlane.xlu0 %855  ;;  %4731 = vrsqrt.f32 %v890_v49  ;;  %v876_v57 = vmul.f32 0.020833334, %v854_v52  ;;  %v917_v59 = vmul.f32 %v4722_v51, %v5267_v35 }
 0x153   : > { %v877_v58 = vmul.f32 0.020833334, %v856_v14  ;;  %4733 = vrsqrt.f32 %v891_v50  ;;  %4268 = vmatprep.mubr.f32.mxu0 %v959_v15  ;;  %v938_v60 = vmul.f32 %v5410_v38, %v916_v34 }
 0x154   : > { %v4724_v61 = vpop.eup %4723  ;;  %v892_v62 = vadd.f32 1e-05, %v876_v57  ;;  %v939_v2 = vmul.f32 %v5410_v38, %v917_v59 }
 0x155   : > { %v893_v63 = vadd.f32 1e-05, %v877_v58  ;;  %v4726_v3 = vpop.eup %4725  ;;  %v858_v4 = vpop.xlane.xlu1 %857  ;;  %v960_v6 = vadd.f32 %v5416_v12, %v938_v60  ;;  %v918_v44 = vmul.f32 %v4724_v61, %v5281_v45 }
 0x156   : > { %v860_v5 = vpop.xlane.xlu0 %859  ;;  %4735 = vrsqrt.f32 %v892_v62  ;;  %v878_v7 = vmul.f32 0.020833334, %v858_v4  ;;  %v961_v35 = vadd.f32 %v5416_v12, %v939_v2  ;;  %v919_v18 = vmul.f32 %v4726_v3, %v5291_v54 }
 0x157   : > { %v879_v16 = vmul.f32 0.020833334, %v860_v5  ;;  %4737 = vrsqrt.f32 %v893_v63  ;;  %4269 = vmatmul.mubr.f32.vlgmr.msra.gmra.mrb[0].mxu0 %v960_v6  ;;  %v940_v17 = vmul.f32 %v5410_v38, %v918_v44 }
 0x158   : > { %v4728_v19 = vpop.eup %4727  ;;  %v894_v20 = vadd.f32 1e-05, %v878_v7  ;;  %4271 = vmatprep.mubr.f32.mxu0 %v961_v35  ;;  %v941_v27 = vmul.f32 %v5410_v38, %v919_v18 }
 0x159   : > { %v895_v21 = vadd.f32 1e-05, %v879_v16  ;;  %v4730_v24 = vpop.eup %4729  ;;  %v862_v25 = vpop.xlane.xlu1 %861  ;;  %v962_v45 = vadd.f32 %v5416_v12, %v940_v17  ;;  %v920_v28 = vmul.f32 %v4728_v19, %v5295_v55 }
 0x15a   : > { %v864_v26 = vpop.xlane.xlu0 %863  ;;  %4739 = vrsqrt.f32 %v894_v20  ;;  %v880_v29 = vmul.f32 0.020833334, %v862_v25  ;;  %v921_v10 = vmul.f32 %v4730_v24, %v5305_v0  ;;  %v963_v54 = vadd.f32 %v5416_v12, %v941_v27 }
 0x15b   : > { %v881_v30 = vmul.f32 0.020833334, %v864_v26  ;;  %4741 = vrsqrt.f32 %v895_v21  ;;  %4272 = vmatmul.mubr.f32.gmra.mrb[2].mxu0 %v962_v45  ;;  %v942_v11 = vmul.f32 %v5410_v38, %v920_v28 }
 0x15c   : > { %v4732_v33 = vpop.eup %4731  ;;  %v896_v36 = vadd.f32 1e-05, %v880_v29  ;;  %v943_v39 = vmul.f32 %v5410_v38, %v921_v10  ;;  %4274 = vmatprep.mubr.f32.mxu0 %v963_v54 }
 0x15d   : > { %v897_v37 = vadd.f32 1e-05, %v881_v30  ;;  %v4734_v40 = vpop.eup %4733  ;;  %v866_v41 = vpop.xlane.xlu1 %865  ;;  %v964_v55 = vadd.f32 %v5416_v12, %v942_v11  ;;  %v922_v42 = vmul.f32 %v4732_v33, %v5309_v1 }
 0x15e   : > { %4743 = vrsqrt.f32 %v896_v36  ;;  %v882_v0 = vmul.f32 0.020833334, %v866_v41  ;;  %v965_v43 = vadd.f32 %v5416_v12, %v943_v39  ;;  %v923_v13 = vmul.f32 %v4734_v40, %v5325_v8 }
 0x15f   : > { %4745 = vrsqrt.f32 %v897_v37  ;;  %4275 = vmatmul.mubr.f32.gmra.mrb[4].mxu0 %v964_v55  ;;  %v944_v48 = vmul.f32 %v5410_v38, %v922_v42 }
 0x160   : > { %v4736_v49 = vpop.eup %4735  ;;  %v898_v50 = vadd.f32 1e-05, %v882_v0  ;;  %4277 = vmatprep.mubr.f32.mxu0 %v965_v43  ;;  %v945_v51 = vmul.f32 %v5410_v38, %v923_v13 }
 0x161   : > { %v4738_v52 = vpop.eup %4737  ;;  %v966_v14 = vadd.f32 %v5416_v12, %v944_v48  ;;  %v924_v1 = vmul.f32 %v4736_v49, %v5329_v9 }
 0x162   : > { %4747 = vrsqrt.f32 %v898_v50  ;;  %v967_v15 = vadd.f32 %v5416_v12, %v945_v51  ;;  %v925_v34 = vmul.f32 %v4738_v52, %v5339_v31 }
 0x163   : > { %4278 = vmatmul.mubr.f32.gmra.mrb[6].mxu0 %v966_v14  ;;  %v946_v8 = vmul.f32 %v5410_v38, %v924_v1 }
 0x164   : > { %v4740_v57 = vpop.eup %4739  ;;  %4280 = vmatprep.mubr.f32.mxu0 %v967_v15  ;;  %v947_v58 = vmul.f32 %v5410_v38, %v925_v34 }
 0x165   : > { %v4742_v59 = vpop.eup %4741  ;;  %v968_v60 = vadd.f32 %v5416_v12, %v946_v8  ;;  %v926_v61 = vmul.f32 %v4740_v57, %v5343_v32 }
 0x166   : > { %v969_v62 = vadd.f32 %v5416_v12, %v947_v58  ;;  %v927_v9 = vmul.f32 %v4742_v59, %v5359_v46 }
 0x167   : > { %4281 = vmatmul.mubr.f32.gmra.mrb[8].mxu0 %v968_v60  ;;  %v948_v63 = vmul.f32 %v5410_v38, %v926_v61 }
 0x168   : > { %v4744_v31 = vpop.eup %4743  ;;  %4283 = vmatprep.mubr.f32.mxu0 %v969_v62  ;;  %v949_v2 = vmul.f32 %v5410_v38, %v927_v9 }
 0x169   : > { %v4746_v3 = vpop.eup %4745  ;;  %v970_v4 = vadd.f32 %v5416_v12, %v948_v63  ;;  %v928_v5 = vmul.f32 %v4744_v31, %v5363_v47 }
 0x16a   : > { %v971_v6 = vadd.f32 %v5416_v12, %v949_v2  ;;  %v929_v32 = vmul.f32 %v4746_v3, %v5379_v53  ;;  %v4097_v53 = vld [vmem:[%s7671_s6] ss:$0 sm:$0xff] }
 0x16b   : > { %4284 = vmatmul.mubr.f32.gmra.mrb[10].mxu0 %v970_v4  ;;  %v950_v44 = vmul.f32 %v5410_v38, %v928_v5  ;;  %v1398_v3 = vld [vmem:[%s7674_s9] sm:$0xff]  ;;  %v1399_v4 = vld [vmem:[%s7674_s9 + $0x8] sm:$0xff]  ;;  %v1400_v5 = vld [vmem:[%s7674_s9 + $0x10] sm:$0xff] }
 0x16c   : > { %v4748_v46 = vpop.eup %4747  ;;  %4286 = vmatprep.mubr.f32.mxu0 %v971_v6  ;;  %v951_v7 = vmul.f32 %v5410_v38, %v929_v32  ;;  %v4436_v6 = vpack.c.bf16 %v1399_v4, %v1398_v3  ;;  %v1401_v32 = vld [vmem:[%s7674_s9 + $0x18] sm:$0xff] }
 0x16d   : > { %v972_v16 = vadd.f32 %v5416_v12, %v950_v44  ;;  %v930_v35 = vmul.f32 %v4748_v46, %v5383_v56  ;;  %v4440_v44 = vpack.c.bf16 %v1401_v32, %v1400_v5  ;;  %v1402_v46 = vld [vmem:[%s7674_s9 + $0x20] sm:$0xff] }
 0x16e   : > { %v973_v17 = vadd.f32 %v5416_v12, %v951_v7  ;;  %v1403_v7 = vld [vmem:[%s7674_s9 + $0x28] sm:$0xff]  ;;  %4437 = vmatprep.subr.bf16.mxu1 %v4436_v6 }
 0x16f   : > { %4287 = vmatmul.mubr.f32.gmra.mrb[12].mxu0 %v972_v16  ;;  %v952_v47 = vmul.f32 %v5410_v38, %v930_v35  ;;  %4439 = vmatpush3.bf16.msra.mxu1 %v4436_v6  ;;  %v4444_v16 = vpack.c.bf16 %v1403_v7, %v1402_v46 }
 0x170   : > { %4289 = vmatprep.mubr.f32.mxu0 %v973_v17  ;;  %4441 = vmatprep.subr.bf16.mxu1 %v4440_v44 }
 0x171   : > { %v974_v18 = vadd.f32 %v5416_v12, %v952_v47 }
 0x173   : > { %4290 = vmatmul.mubr.f32.gmra.mrb[14].mxu0 %v974_v18  ;;  %4443 = vmatpush3.bf16.msra.mxu1 %v4440_v44 }
 0x174   : > { %4445 = vmatprep.subr.bf16.mxu1 %v4444_v16 }
 0x177   : > { %4447 = vmatpush3.bf16.msra.mxu1 %v4444_v16 }
 0x22a   : > { %v4270_v19 = vpop.f32.mrb[0].mxu0 }
 0x22b   : > { %v5468_v20 = vadd.f32 %v4270_v19, %v4097_v53  ;;  %v1064_v21 = vpop.f32.mrb[1].mxu0 }
 0x22c   : > { %v5470_v24 = vadd.f32 %v4097_v53, %v1064_v21 }
 0x22d   : > { %v1144_v56 = vmax.f32 %v5468_v20, 0.0 }
 0x22e   : > { %v1143_v25 = vmax.f32 %v5470_v24, 0.0  ;;  %v4273_v26 = vpop.f32.mrb[2].mxu0 }
 0x22f   : > { %v5474_v38 = vadd.f32 %v4273_v26, %v4097_v53  ;;  %1163 = vadd.xlane.f32.xlu1 %v1144_v56  ;;  %v1074_v12 = vpop.f32.mrb[3].mxu0 }
 0x230   : > { %v5478_v45 = vadd.f32 %v4097_v53, %v1074_v12  ;;  %1161 = vadd.xlane.f32.xlu0 %v1143_v25 }
 0x231   : > { %v1146_v27 = vmax.f32 %v5474_v38, 0.0 }
 0x232   : > { %v1145_v28 = vmax.f32 %v5478_v45, 0.0  ;;  %v4276_v29 = vpop.f32.mrb[4].mxu0 }
 0x233   : > { %v5484_v30 = vadd.f32 %v4276_v29, %v4097_v53  ;;  %1167 = vadd.xlane.f32.xlu1 %v1146_v27  ;;  %v1084_v10 = vpop.f32.mrb[5].mxu0 }
 0x234   : > { %v5488_v54 = vadd.f32 %v4097_v53, %v1084_v10  ;;  %1165 = vadd.xlane.f32.xlu0 %v1145_v28 }
 0x235   : > { %v1148_v11 = vmax.f32 %v5484_v30, 0.0 }
 0x236   : > { %v1147_v33 = vmax.f32 %v5488_v54, 0.0  ;;  %v4279_v36 = vpop.f32.mrb[6].mxu0 }
 0x237   : > { %v5494_v37 = vadd.f32 %v4279_v36, %v4097_v53  ;;  %1171 = vadd.xlane.f32.xlu1 %v1148_v11  ;;  %v1094_v39 = vpop.f32.mrb[7].mxu0 }
 0x238   : > { %v5498_v40 = vadd.f32 %v4097_v53, %v1094_v39  ;;  %1169 = vadd.xlane.f32.xlu0 %v1147_v33 }
 0x239   : > { %v1150_v41 = vmax.f32 %v5494_v37, 0.0 }
 0x23a   : > { %v1149_v55 = vmax.f32 %v5498_v40, 0.0  ;;  %v4282_v42 = vpop.f32.mrb[8].mxu0 }
 0x23b   : > { %v5504_v0 = vadd.f32 %v4282_v42, %v4097_v53  ;;  %1175 = vadd.xlane.f32.xlu1 %v1150_v41  ;;  %v1104_v43 = vpop.f32.mrb[9].mxu0 }
 0x23c   : > { %v5508_v13 = vadd.f32 %v4097_v53, %v1104_v43  ;;  %1173 = vadd.xlane.f32.xlu0 %v1149_v55 }
 0x23d   : > { %v1152_v48 = vmax.f32 %v5504_v0, 0.0 }
 0x23e   : > { %v1151_v49 = vmax.f32 %v5508_v13, 0.0  ;;  %v4285_v50 = vpop.f32.mrb[10].mxu0 }
 0x23f   : > { %v5514_v51 = vadd.f32 %v4285_v50, %v4097_v53  ;;  %1179 = vadd.xlane.f32.xlu1 %v1152_v48  ;;  %v1114_v52 = vpop.f32.mrb[11].mxu0 }
 0x240   : > { %v5518_v14 = vadd.f32 %v4097_v53, %v1114_v52  ;;  %1177 = vadd.xlane.f32.xlu0 %v1151_v49 }
 0x241   : > { %v1154_v1 = vmax.f32 %v5514_v51, 0.0 }
 0x242   : > { %v1153_v15 = vmax.f32 %v5518_v14, 0.0  ;;  %v4288_v34 = vpop.f32.mrb[12].mxu0 }
 0x243   : > { %v5524_v8 = vadd.f32 %v4288_v34, %v4097_v53  ;;  %1183 = vadd.xlane.f32.xlu1 %v1154_v1  ;;  %v1124_v57 = vpop.f32.mrb[13].mxu0 }
 0x244   : > { %v5528_v58 = vadd.f32 %v4097_v53, %v1124_v57  ;;  %1181 = vadd.xlane.f32.xlu0 %v1153_v15 }
 0x245   : > { %v1156_v59 = vmax.f32 %v5524_v8, 0.0 }
 0x246   : > { %v1155_v60 = vmax.f32 %v5528_v58, 0.0  ;;  %v4291_v61 = vpop.f32.mrb[14].mxu0 }
 0x247   : > { %v5534_v62 = vadd.f32 %v4291_v61, %v4097_v53  ;;  %1187 = vadd.xlane.f32.xlu1 %v1156_v59  ;;  %v1134_v9 = vpop.f32.mrb[15].mxu0 }
 0x248   : > { %v5538_v63 = vadd.f32 %v4097_v53, %v1134_v9  ;;  %1185 = vadd.xlane.f32.xlu0 %v1155_v60 }
 0x249   : > { %v1158_v31 = vmax.f32 %v5534_v62, 0.0 }
 0x24a   : > { %v1157_v2 = vmax.f32 %v5538_v63, 0.0 }
 0x24b   : > { %1191 = vadd.xlane.f32.xlu1 %v1158_v31 }
 0x24c   : > { %1189 = vadd.xlane.f32.xlu0 %v1157_v2 }
 0x2bc   : > { %v1164_v35 = vpop.xlane.xlu1 %1163 }
 0x2bd   : > { %v1194_v17 = vmul.f32 0.015625, %v1164_v35  ;;  %v1162_v47 = vpop.xlane.xlu0 %1161 }
 0x2be   : > { %v1193_v18 = vmul.f32 0.015625, %v1162_v47 }
 0x2bf   : > { %v1210_v53 = vsub.f32 %v1144_v56, %v1194_v17 }
 0x2c0   : > { %v1209_v19 = vsub.f32 %v1143_v25, %v1193_v18  ;;  %v1168_v21 = vpop.xlane.xlu1 %1167 }
 0x2c1   : > { %v1196_v26 = vmul.f32 0.015625, %v1168_v21  ;;  %v1166_v12 = vpop.xlane.xlu0 %1165  ;;  %v5573_v29 = vsel %vm1225_vm1, %v1210_v53, 0.0 }
 0x2c2   : > { %v1195_v10 = vmul.f32 0.015625, %v1166_v12  ;;  %v1243_v36 = vmul.f32 %v5573_v29, %v5573_v29  ;;  %v5579_v39 = vsel %vm1225_vm1, %v1209_v19, 0.0  ;;  %v1405_v12 = vld [vmem:[%s7674_s9 + $0x38] sm:$0xff] }
 0x2c3   : > { %v1212_v20 = vsub.f32 %v1146_v27, %v1196_v26  ;;  %v1242_v24 = vmul.f32 %v5579_v39, %v5579_v39  ;;  %v1404_v26 = vld [vmem:[%s7674_s9 + $0x30] sm:$0xff] }
 0x2c4   : > { %v1211_v56 = vsub.f32 %v1145_v28, %v1195_v10  ;;  %v1172_v25 = vpop.xlane.xlu1 %1171  ;;  %1260 = vadd.xlane.f32.xlu1 %v1243_v36  ;;  %v4448_v36 = vpack.c.bf16 %v1405_v12, %v1404_v26 }
 0x2c5   : > { %v1198_v42 = vmul.f32 0.015625, %v1172_v25  ;;  %1258 = vadd.xlane.f32.xlu0 %v1242_v24  ;;  %v1170_v43 = vpop.xlane.xlu0 %1169  ;;  %v5589_v50 = vsel %vm1225_vm1, %v1212_v20, 0.0 }
 0x2c6   : > { %v1197_v52 = vmul.f32 0.015625, %v1170_v43  ;;  %v1245_v38 = vmul.f32 %v5589_v50, %v5589_v50  ;;  %v5595_v27 = vsel %vm1225_vm1, %v1211_v56, 0.0  ;;  %4449 = vmatprep.subr.bf16.mxu1 %v4448_v36  ;;  %v1406_v43 = vld [vmem:[%s7674_s9 + $0x40] sm:$0xff] }
 0x2c7   : > { %v1214_v45 = vsub.f32 %v1148_v11, %v1198_v42  ;;  %v1244_v28 = vmul.f32 %v5595_v27, %v5595_v27  ;;  %4451 = vmatpush3.bf16.msra.mxu1 %v4448_v36 }
 0x2c8   : > { %v1213_v34 = vsub.f32 %v1147_v33, %v1197_v52  ;;  %v1176_v57 = vpop.xlane.xlu1 %1175  ;;  %1264 = vadd.xlane.f32.xlu1 %v1245_v38  ;;  %v1407_v52 = vld [vmem:[%s7674_s9 + $0x48] sm:$0xff] }
 0x2c9   : > { %v1200_v61 = vmul.f32 0.015625, %v1176_v57  ;;  %1262 = vadd.xlane.f32.xlu0 %v1244_v28  ;;  %v1174_v9 = vpop.xlane.xlu0 %1173  ;;  %v5605_v3 = vsel %vm1225_vm1, %v1214_v45, 0.0  ;;  %v4452_v58 = vpack.c.bf16 %v1407_v52, %v1406_v43 }
 0x2ca   : > { %v1199_v4 = vmul.f32 0.015625, %v1174_v9  ;;  %v1247_v30 = vmul.f32 %v5605_v3, %v5605_v3  ;;  %v5611_v11 = vsel %vm1225_vm1, %v1213_v34, 0.0  ;;  %v1408_v9 = vld [vmem:[%s7674_s9 + $0x50] sm:$0xff] }
 0x2cb   : > { %v1216_v54 = vsub.f32 %v1150_v41, %v1200_v61  ;;  %v1246_v33 = vmul.f32 %v5611_v11, %v5611_v11  ;;  %4453 = vmatprep.subr.bf16.mxu1 %v4452_v58 }
 0x2cc   : > { %v1215_v5 = vsub.f32 %v1149_v55, %v1199_v4  ;;  %v1180_v6 = vpop.xlane.xlu1 %1179  ;;  %1268 = vadd.xlane.f32.xlu1 %v1247_v30  ;;  %4455 = vmatpush3.bf16.msra.mxu1 %v4452_v58  ;;  %v1409_v4 = vld [vmem:[%s7674_s9 + $0x58] sm:$0xff] }
 0x2cd   : > { %v1202_v32 = vmul.f32 0.015625, %v1180_v6  ;;  %1266 = vadd.xlane.f32.xlu0 %v1246_v33  ;;  %v1178_v44 = vpop.xlane.xlu0 %1177  ;;  %v5621_v46 = vsel %vm1225_vm1, %v1216_v54, 0.0  ;;  %v1410_v54 = vld [vmem:[%s7674_s9 + $0x60] sm:$0xff]  ;;  %v1411_v33 = vld [vmem:[%s7674_s9 + $0x68] sm:$0xff]  ;;  %v1412_v6 = vld [vmem:[%s7674_s9 + $0x70] sm:$0xff] }
 0x2ce   : > { %v1201_v7 = vmul.f32 0.015625, %v1178_v44  ;;  %v1249_v37 = vmul.f32 %v5621_v46, %v5621_v46  ;;  %v5627_v41 = vsel %vm1225_vm1, %v1215_v5, 0.0  ;;  %v4460_v5 = vpack.c.bf16 %v1411_v33, %v1410_v54 }
 0x2cf   : > { %v1218_v40 = vsub.f32 %v1152_v48, %v1202_v32  ;;  %v1248_v55 = vmul.f32 %v5627_v41, %v5627_v41  ;;  %v1413_v32 = vld [vmem:[%s7674_s9 + $0x78] sm:$0xff] }
 0x2d0   : > { %v1217_v16 = vsub.f32 %v1151_v49, %v1201_v7  ;;  %v1184_v35 = vpop.xlane.xlu1 %1183  ;;  %1272 = vadd.xlane.f32.xlu1 %v1249_v37  ;;  %v4464_v44 = vpack.c.bf16 %v1413_v32, %v1412_v6 }
 0x2d1   : > { %v1204_v17 = vmul.f32 0.015625, %v1184_v35  ;;  %1270 = vadd.xlane.f32.xlu0 %v1248_v55  ;;  %v1182_v47 = vpop.xlane.xlu0 %1181  ;;  %v5637_v18 = vsel %vm1225_vm1, %v1218_v40, 0.0 }
 0x2d2   : > { %v1203_v53 = vmul.f32 0.015625, %v1182_v47  ;;  %v1251_v0 = vmul.f32 %v5637_v18, %v5637_v18  ;;  %v5643_v48 = vsel %vm1225_vm1, %v1217_v16, 0.0 }
 0x2d3   : > { %v1220_v13 = vsub.f32 %v1154_v1, %v1204_v17  ;;  %v1250_v49 = vmul.f32 %v5643_v48, %v5643_v48 }
 0x2d4   : > { %v1219_v19 = vsub.f32 %v1153_v15, %v1203_v53  ;;  %v1188_v21 = vpop.xlane.xlu1 %1187  ;;  %1276 = vadd.xlane.f32.xlu1 %v1251_v0 }
 0x2d5   : > { %v1206_v10 = vmul.f32 0.015625, %v1188_v21  ;;  %1274 = vadd.xlane.f32.xlu0 %v1250_v49  ;;  %v1186_v51 = vpop.xlane.xlu0 %1185  ;;  %v5659_v1 = vsel %vm1225_vm1, %v1220_v13, 0.0 }
 0x2d6   : > { %v1205_v14 = vmul.f32 0.015625, %v1186_v51  ;;  %v1253_v15 = vmul.f32 %v5659_v1, %v5659_v1  ;;  %v5665_v20 = vsel %vm1225_vm1, %v1219_v19, 0.0 }
 0x2d7   : > { %v1222_v24 = vsub.f32 %v1156_v59, %v1206_v10  ;;  %v1252_v56 = vmul.f32 %v5665_v20, %v5665_v20 }
 0x2d8   : > { %v1221_v25 = vsub.f32 %v1155_v60, %v1205_v14  ;;  %1280 = vadd.xlane.f32.xlu1 %v1253_v15  ;;  %v1192_v42 = vpop.xlane.xlu1 %1191 }
 0x2d9   : > { %v1208_v8 = vmul.f32 0.015625, %v1192_v42  ;;  %1278 = vadd.xlane.f32.xlu0 %v1252_v56  ;;  %v1190_v59 = vpop.xlane.xlu0 %1189  ;;  %v5681_v38 = vsel %vm1225_vm1, %v1222_v24, 0.0  ;;  %v5728_v42 = vld [vmem:[%s7672_s7] ss:$0 sm:$0xff] }
 0x2da   : > { %v1207_v60 = vmul.f32 0.015625, %v1190_v59  ;;  %v1255_v45 = vmul.f32 %v5681_v38, %v5681_v38  ;;  %v5687_v28 = vsel %vm1225_vm1, %v1221_v25, 0.0 }
 0x2db   : > { %v1224_v34 = vsub.f32 %v1158_v31, %v1208_v8  ;;  %v1254_v57 = vmul.f32 %v5687_v28, %v5687_v28  ;;  %v4456_v31 = vpack.c.bf16 %v1409_v4, %v1408_v9 }
 0x2dc   : > { %v1223_v61 = vsub.f32 %v1157_v2, %v1207_v60  ;;  %1284 = vadd.xlane.f32.xlu1 %v1255_v45 }
 0x2dd   : > { %1282 = vadd.xlane.f32.xlu0 %v1254_v57  ;;  %v5703_v62 = vsel %vm1225_vm1, %v1224_v34, 0.0  ;;  %4457 = vmatprep.subr.bf16.mxu1 %v4456_v31  ;;  %v5735_v57 = vld [vmem:[%s7673_s8] ss:$0 sm:$0xff] }
 0x2de   : > { %v1257_v63 = vmul.f32 %v5703_v62, %v5703_v62  ;;  %v5709_v2 = vsel %vm1225_vm1, %v1223_v61, 0.0  ;;  %4459 = vmatpush3.bf16.msra.mxu1 %v4456_v31 }
 0x2df   : > { %v1256_v30 = vmul.f32 %v5709_v2, %v5709_v2  ;;  %4461 = vmatprep.subr.bf16.mxu1 %v4460_v5 }
 0x2e0   : > { %1288 = vadd.xlane.f32.xlu1 %v1257_v63 }
 0x2e1   : > { %1286 = vadd.xlane.f32.xlu0 %v1256_v30 }
 0x2e2   : > { %4463 = vmatpush3.bf16.msra.mxu1 %v4460_v5 }
 0x2e3   : > { %4465 = vmatprep.subr.bf16.mxu1 %v4464_v44 }
 0x2e6   : > { %4467 = vmatpush3.bf16.msra.mxu1 %v4464_v44 }
 0x351   : > { %v1261_v7 = vpop.xlane.xlu1 %1260 }
 0x352   : > { %v1291_v37 = vmul.f32 0.015625, %v1261_v7  ;;  %v1259_v40 = vpop.xlane.xlu0 %1258 }
 0x353   : > { %v1290_v55 = vmul.f32 0.015625, %v1259_v40 }
 0x354   : > { %v1307_v16 = vadd.f32 1e-05, %v1291_v37 }
 0x355   : > { %v1306_v35 = vadd.f32 1e-05, %v1290_v55  ;;  %v1265_v17 = vpop.xlane.xlu1 %1264 }
 0x356   : > { %4749 = vrsqrt.f32 %v1307_v16  ;;  %v1293_v47 = vmul.f32 0.015625, %v1265_v17  ;;  %v1263_v53 = vpop.xlane.xlu0 %1262 }
 0x357   : > { %4751 = vrsqrt.f32 %v1306_v35  ;;  %v1292_v0 = vmul.f32 0.015625, %v1263_v53 }
 0x358   : > { %v1309_v13 = vadd.f32 1e-05, %v1293_v47 }
 0x359   : > { %v1308_v49 = vadd.f32 1e-05, %v1292_v0  ;;  %v1269_v19 = vpop.xlane.xlu1 %1268 }
 0x35a   : > { %4753 = vrsqrt.f32 %v1309_v13  ;;  %v1295_v21 = vmul.f32 0.015625, %v1269_v19  ;;  %v1267_v26 = vpop.xlane.xlu0 %1266 }
 0x35b   : > { %4755 = vrsqrt.f32 %v1308_v49  ;;  %v1294_v12 = vmul.f32 0.015625, %v1267_v26 }
 0x35c   : > { %v1311_v10 = vadd.f32 1e-05, %v1295_v21 }
 0x35d   : > { %v1310_v51 = vadd.f32 1e-05, %v1294_v12  ;;  %v1273_v36 = vpop.xlane.xlu1 %1272 }
 0x35e   : > { %4757 = vrsqrt.f32 %v1311_v10  ;;  %v1297_v14 = vmul.f32 0.015625, %v1273_v36  ;;  %v1271_v15 = vpop.xlane.xlu0 %1270 }
 0x35f   : > { %4759 = vrsqrt.f32 %v1310_v51  ;;  %v1296_v24 = vmul.f32 0.015625, %v1271_v15 }
 0x360   : > { %v4750_v56 = vpop.eup %4749  ;;  %v1313_v25 = vadd.f32 1e-05, %v1297_v14 }
 0x361   : > { %v4752_v43 = vpop.eup %4751  ;;  %v1312_v52 = vadd.f32 1e-05, %v1296_v24  ;;  %v1277_v8 = vpop.xlane.xlu1 %1276  ;;  %v1339_v59 = vmul.f32 %v4750_v56, %v5573_v29 }
 0x362   : > { %4761 = vrsqrt.f32 %v1313_v25  ;;  %v1299_v58 = vmul.f32 0.015625, %v1277_v8  ;;  %v1275_v60 = vpop.xlane.xlu0 %1274  ;;  %v1338_v45 = vmul.f32 %v4752_v43, %v5579_v39 }
 0x363   : > { %4763 = vrsqrt.f32 %v1312_v52  ;;  %v1298_v34 = vmul.f32 0.015625, %v1275_v60  ;;  %v1361_v61 = vmul.f32 %v5728_v42, %v1339_v59 }
 0x364   : > { %v4754_v9 = vpop.eup %4753  ;;  %v1315_v4 = vadd.f32 1e-05, %v1299_v58  ;;  %v1360_v31 = vmul.f32 %v5728_v42, %v1338_v45 }
 0x365   : > { %v4756_v63 = vpop.eup %4755  ;;  %v1314_v29 = vadd.f32 1e-05, %v1298_v34  ;;  %v1281_v30 = vpop.xlane.xlu1 %1280  ;;  %v1341_v54 = vmul.f32 %v4754_v9, %v5589_v50  ;;  %v1383_v44 = vadd.f32 %v5735_v57, %v1361_v61 }
 0x366   : > { %4765 = vrsqrt.f32 %v1315_v4  ;;  %v1301_v39 = vmul.f32 0.015625, %v1281_v30  ;;  %v1279_v33 = vpop.xlane.xlu0 %1278  ;;  %v1382_v5 = vadd.f32 %v5735_v57, %v1360_v31  ;;  %v1340_v6 = vmul.f32 %v4756_v63, %v5595_v27 }
 0x367   : > { %4767 = vrsqrt.f32 %v1314_v29  ;;  %v1300_v32 = vmul.f32 0.015625, %v1279_v33  ;;  %v1363_v7 = vmul.f32 %v5728_v42, %v1341_v54 }
 0x368   : > { %v4758_v37 = vpop.eup %4757  ;;  %v1317_v40 = vadd.f32 1e-05, %v1301_v39  ;;  %4324 = vmatprep.mubr.f32.mxu1 %v1382_v5  ;;  %v1362_v55 = vmul.f32 %v5728_v42, %v1340_v6 }
 0x369   : > { %v4760_v16 = vpop.eup %4759  ;;  %v1316_v50 = vadd.f32 1e-05, %v1300_v32  ;;  %v1285_v35 = vpop.xlane.xlu1 %1284  ;;  %4325 = vmatmul.mubr.f32.vlgmr.msra.gmra.mrb[0].mxu1 %v1383_v44  ;;  %v1343_v17 = vmul.f32 %v4758_v37, %v5605_v3  ;;  %v1385_v49 = vadd.f32 %v5735_v57, %v1363_v7 }
 0x36a   : > { %4769 = vrsqrt.f32 %v1317_v40  ;;  %v1303_v47 = vmul.f32 0.015625, %v1285_v35  ;;  %v1283_v27 = vpop.xlane.xlu0 %1282  ;;  %v1384_v53 = vadd.f32 %v5735_v57, %v1362_v55  ;;  %v1342_v0 = vmul.f32 %v4760_v16, %v5611_v11 }
 0x36b   : > { %4771 = vrsqrt.f32 %v1316_v50  ;;  %v1302_v13 = vmul.f32 0.015625, %v1283_v27  ;;  %v1365_v19 = vmul.f32 %v5728_v42, %v1343_v17 }
 0x36c   : > { %v4762_v21 = vpop.eup %4761  ;;  %v1319_v26 = vadd.f32 1e-05, %v1303_v47  ;;  %4327 = vmatprep.mubr.f32.mxu1 %v1384_v53  ;;  %v1364_v12 = vmul.f32 %v5728_v42, %v1342_v0 }
 0x36d   : > { %v4764_v10 = vpop.eup %4763  ;;  %v1318_v3 = vadd.f32 1e-05, %v1302_v13  ;;  %v1289_v51 = vpop.xlane.xlu1 %1288  ;;  %4328 = vmatmul.mubr.f32.gmra.mrb[2].mxu1 %v1385_v49  ;;  %v1345_v36 = vmul.f32 %v4762_v21, %v5621_v46  ;;  %v1387_v25 = vadd.f32 %v5735_v57, %v1365_v19 }
 0x36e   : > { %4773 = vrsqrt.f32 %v1319_v26  ;;  %v1305_v14 = vmul.f32 0.015625, %v1289_v51  ;;  %v1287_v11 = vpop.xlane.xlu0 %1286  ;;  %v1386_v15 = vadd.f32 %v5735_v57, %v1364_v12  ;;  %v1344_v24 = vmul.f32 %v4764_v10, %v5627_v41 }
 0x36f   : > { %4775 = vrsqrt.f32 %v1318_v3  ;;  %v1304_v56 = vmul.f32 0.015625, %v1287_v11  ;;  %v1367_v43 = vmul.f32 %v5728_v42, %v1345_v36 }
 0x370   : > { %v4766_v52 = vpop.eup %4765  ;;  %v1321_v8 = vadd.f32 1e-05, %v1305_v14  ;;  %4330 = vmatprep.mubr.f32.mxu1 %v1386_v15  ;;  %v1366_v59 = vmul.f32 %v5728_v42, %v1344_v24 }
 0x371   : > { %v4768_v58 = vpop.eup %4767  ;;  %v1320_v46 = vadd.f32 1e-05, %v1304_v56  ;;  %4331 = vmatmul.mubr.f32.gmra.mrb[4].mxu1 %v1387_v25  ;;  %v1347_v60 = vmul.f32 %v4766_v52, %v5637_v18  ;;  %v1389_v34 = vadd.f32 %v5735_v57, %v1367_v43 }
 0x372   : > { %4777 = vrsqrt.f32 %v1321_v8  ;;  %v1388_v45 = vadd.f32 %v5735_v57, %v1366_v59  ;;  %v1346_v41 = vmul.f32 %v4768_v58, %v5643_v48 }
 0x373   : > { %4779 = vrsqrt.f32 %v1320_v46  ;;  %v1369_v61 = vmul.f32 %v5728_v42, %v1347_v60 }
 0x374   : > { %v4770_v9 = vpop.eup %4769  ;;  %4333 = vmatprep.mubr.f32.mxu1 %v1388_v45  ;;  %v1368_v4 = vmul.f32 %v5728_v42, %v1346_v41 }
 0x375   : > { %v4772_v31 = vpop.eup %4771  ;;  %4334 = vmatmul.mubr.f32.gmra.mrb[6].mxu1 %v1389_v34  ;;  %v1349_v63 = vmul.f32 %v4770_v9, %v5659_v1  ;;  %v1391_v30 = vadd.f32 %v5735_v57, %v1369_v61 }
 0x376   : > { %v1390_v18 = vadd.f32 %v5735_v57, %v1368_v4  ;;  %v1348_v29 = vmul.f32 %v4772_v31, %v5665_v20 }
 0x377   : > { %v1371_v48 = vmul.f32 %v5728_v42, %v1349_v63 }
 0x378   : > { %v4774_v54 = vpop.eup %4773  ;;  %4336 = vmatprep.mubr.f32.mxu1 %v1390_v18  ;;  %v1370_v39 = vmul.f32 %v5728_v42, %v1348_v29 }
 0x379   : > { %v4776_v33 = vpop.eup %4775  ;;  %4337 = vmatmul.mubr.f32.gmra.mrb[8].mxu1 %v1391_v30  ;;  %v1351_v5 = vmul.f32 %v4774_v54, %v5681_v38  ;;  %v1393_v32 = vadd.f32 %v5735_v57, %v1371_v48 }
 0x37a   : > { %v1392_v6 = vadd.f32 %v5735_v57, %v1370_v39  ;;  %v1350_v1 = vmul.f32 %v4776_v33, %v5687_v28 }
 0x37b   : > { %v1373_v20 = vmul.f32 %v5728_v42, %v1351_v5 }
 0x37c   : > { %v4778_v44 = vpop.eup %4777  ;;  %4339 = vmatprep.mubr.f32.mxu1 %v1392_v6  ;;  %v1372_v7 = vmul.f32 %v5728_v42, %v1350_v1 }
 0x37d   : > { %v4780_v37 = vpop.eup %4779  ;;  %4340 = vmatmul.mubr.f32.gmra.mrb[10].mxu1 %v1393_v32  ;;  %v1353_v40 = vmul.f32 %v4778_v44, %v5703_v62  ;;  %v1395_v16 = vadd.f32 %v5735_v57, %v1373_v20  ;;  %v4100_v62 = vld [vmem:[%s7675_s10] ss:$0 sm:$0xff]  ;;  %v1901_v32 = vld [vmem:[%s7679_s14 + $0x8] sm:$0xff] }
 0x37e   : > { %v1394_v55 = vadd.f32 %v5735_v57, %v1372_v7  ;;  %v1352_v38 = vmul.f32 %v4780_v37, %v5709_v2  ;;  %v1905_v20 = vld [vmem:[%s7679_s14 + $0x28] sm:$0xff]  ;;  %v1900_v44 = vld [vmem:[%s7679_s14] sm:$0xff] }
 0x37f   : > { %v1375_v28 = vmul.f32 %v5728_v42, %v1353_v40  ;;  %v4468_v7 = vpack.c.bf16 %v1905_v20, %v1901_v32  ;;  %v1904_v37 = vld [vmem:[%s7679_s14 + $0x20] sm:$0xff]  ;;  %v1903_v40 = vld [vmem:[%s7679_s14 + $0x18] sm:$0xff] }
 0x380   : > { %4342 = vmatprep.mubr.f32.mxu1 %v1394_v55  ;;  %v1374_v50 = vmul.f32 %v5728_v42, %v1352_v38  ;;  %v1907_v55 = vld [vmem:[%s7679_s14 + $0x38] sm:$0xff]  ;;  %v5078_v38 = vmov 0.0  }
 0x381   : > { %4343 = vmatmul.mubr.f32.gmra.mrb[12].mxu1 %v1395_v16  ;;  %v1397_v17 = vadd.f32 %v5735_v57, %v1375_v28  ;;  %2028 = vmatprep.mubr.f32.mxu0 %v5078_v38  ;;  %v4470_v16 = vpack.c.bf16 %v1904_v37, %v1900_v44  ;;  %v4500_v28 = vpack.c.bf16 %v1907_v55, %v1903_v40  ;;  %v1919_v32 = vld [vmem:[%s7679_s14 + $0x98] sm:$0xff]  ;;  %v1918_v44 = vld [vmem:[%s7679_s14 + $0x90] sm:$0xff]  ;;  %v1925_v55 = vld [vmem:[%s7679_s14 + $0xc8] sm:$0xff] }
 0x382   : > { %v1396_v35 = vadd.f32 %v5735_v57, %v1374_v50  ;;  %v1902_v50 = vld [vmem:[%s7679_s14 + $0x10] sm:$0xff]  ;;  %4469 = vmatprep.subr.bf16.mxu0 %v4468_v7  ;;  %v1923_v20 = vld [vmem:[%s7679_s14 + $0xb8] sm:$0xff] }
 0x383   : > { %4471 = vmatpush1.bf16.msra.mxu0 %v4470_v16  ;;  %4501 = vmatprep.subr.bf16.mxu1 %v4500_v28  ;;  %v1922_v7 = vld [vmem:[%s7679_s14 + $0xb0] sm:$0xff]  ;;  %v4508_v40 = vpack.c.bf16 %v1923_v20, %v1919_v32  ;;  %v1929_v16 = vld [vmem:[%s7679_s14 + $0xe8] sm:$0xff]  ;;  %v1924_v28 = vld [vmem:[%s7679_s14 + $0xc0] sm:$0xff] }
 0x384   : > { %4345 = vmatprep.mubr.f32.mxu1 %v1396_v35  ;;  %v1906_v35 = vld [vmem:[%s7679_s14 + $0x30] sm:$0xff]  ;;  %v1941_v32 = vld [vmem:[%s7679_s14 + $0x148] sm:$0xff] }
 0x385   : > { %4346 = vmatmul.mubr.f32.gmra.mrb[14].mxu1 %v1397_v17  ;;  %v1909_v17 = vld [vmem:[%s7679_s14 + $0x48] sm:$0xff] }
 0x386   : > { %2189 = vmatprep.mubr.f32.mxu1 %v5078_v38  ;;  %v1945_v20 = vld [vmem:[%s7679_s14 + $0x168] sm:$0xff] }
 0x43c   : > { %v4326_v47 = vpop.f32.mrb[0].mxu1 }
 0x43d   : > { %v5786_v2 = vadd.f32 %v4326_v47, %v4100_v62  ;;  %v1487_v27 = vpop.f32.mrb[1].mxu1  ;;  %v1913_v47 = vld [vmem:[%s7679_s14 + $0x68] sm:$0xff] }
 0x43e   : > { %v5788_v53 = vadd.f32 %v4100_v62, %v1487_v27  ;;  %v1908_v27 = vld [vmem:[%s7679_s14 + $0x40] sm:$0xff] }
 0x43f   : > { %v1567_v0 = vmax.f32 %v5786_v2, 0.0 }
 0x440   : > { %v1566_v42 = vmax.f32 %v5788_v53, 0.0  ;;  %v4329_v13 = vpop.f32.mrb[2].mxu1 }
 0x441   : > { %v5792_v49 = vadd.f32 %v4329_v13, %v4100_v62  ;;  %1586 = vadd.xlane.f32.xlu1 %v1567_v0  ;;  %v1497_v57 = vpop.f32.mrb[3].mxu1  ;;  %v1912_v13 = vld [vmem:[%s7679_s14 + $0x60] sm:$0xff] }
 0x442   : > { %v5796_v19 = vadd.f32 %v4100_v62, %v1497_v57  ;;  %1584 = vadd.xlane.f32.xlu0 %v1566_v42  ;;  %v4472_v57 = vpack.c.bf16 %v1913_v47, %v1909_v17  ;;  %v1928_v17 = vld [vmem:[%s7679_s14 + $0xe0] sm:$0xff]  ;;  %v1931_v47 = vld [vmem:[%s7679_s14 + $0xf8] sm:$0xff] }
 0x443   : > { %v1569_v21 = vmax.f32 %v5792_v49, 0.0 }
 0x444   : > { %v1568_v26 = vmax.f32 %v5796_v19, 0.0  ;;  %v4332_v12 = vpop.f32.mrb[4].mxu1  ;;  %4473 = vmatprep.subr.bf16.mxu0 %v4472_v57  ;;  %v1930_v57 = vld [vmem:[%s7679_s14 + $0xf0] sm:$0xff] }
 0x445   : > { %v5802_v10 = vadd.f32 %v4332_v12, %v4100_v62  ;;  %1590 = vadd.xlane.f32.xlu1 %v1569_v21  ;;  %v1507_v3 = vpop.f32.mrb[5].mxu1  ;;  %v4474_v12 = vpack.c.bf16 %v1912_v13, %v1908_v27  ;;  %v1926_v13 = vld [vmem:[%s7679_s14 + $0xd0] sm:$0xff] }
 0x446   : > { %v5806_v51 = vadd.f32 %v4100_v62, %v1507_v3  ;;  %1588 = vadd.xlane.f32.xlu0 %v1568_v26  ;;  %v1911_v3 = vld [vmem:[%s7679_s14 + $0x58] sm:$0xff] }
 0x447   : > { %v1571_v36 = vmax.f32 %v5802_v10, 0.0  ;;  %4475 = vmatpush1.bf16.msra.mxu0 %v4474_v12  ;;  %v1933_v12 = vld [vmem:[%s7679_s14 + $0x108] sm:$0xff] }
 0x448   : > { %v1570_v14 = vmax.f32 %v5806_v51, 0.0  ;;  %v4335_v11 = vpop.f32.mrb[6].mxu1 }
 0x449   : > { %v5812_v15 = vadd.f32 %v4335_v11, %v4100_v62  ;;  %1594 = vadd.xlane.f32.xlu1 %v1571_v36  ;;  %v1517_v24 = vpop.f32.mrb[7].mxu1  ;;  %v1915_v11 = vld [vmem:[%s7679_s14 + $0x78] sm:$0xff] }
 0x44a   : > { %v5816_v56 = vadd.f32 %v4100_v62, %v1517_v24  ;;  %1592 = vadd.xlane.f32.xlu0 %v1570_v14  ;;  %v1910_v24 = vld [vmem:[%s7679_s14 + $0x50] sm:$0xff] }
 0x44b   : > { %v1573_v25 = vmax.f32 %v5812_v15, 0.0 }
 0x44c   : > { %v1572_v43 = vmax.f32 %v5816_v56, 0.0  ;;  %v4338_v52 = vpop.f32.mrb[8].mxu1 }
 0x44d   : > { %v5822_v8 = vadd.f32 %v4338_v52, %v4100_v62  ;;  %1598 = vadd.xlane.f32.xlu1 %v1573_v25  ;;  %v1527_v59 = vpop.f32.mrb[9].mxu1  ;;  %v4504_v52 = vpack.c.bf16 %v1915_v11, %v1911_v3  ;;  %v1937_v3 = vld [vmem:[%s7679_s14 + $0x128] sm:$0xff]  ;;  %v4482_v11 = vpack.c.bf16 %v1928_v17, %v1924_v28  ;;  %v1944_v28 = vld [vmem:[%s7679_s14 + $0x160] sm:$0xff]  ;;  %v1946_v17 = vld [vmem:[%s7679_s14 + $0x170] sm:$0xff] }
 0x44e   : > { %v5826_v58 = vadd.f32 %v4100_v62, %v1527_v59  ;;  %1596 = vadd.xlane.f32.xlu0 %v1572_v43  ;;  %v1914_v59 = vld [vmem:[%s7679_s14 + $0x70] sm:$0xff] }
 0x44f   : > { %v1575_v46 = vmax.f32 %v5822_v8, 0.0 }
 0x450   : > { %v1574_v60 = vmax.f32 %v5826_v58, 0.0  ;;  %v4341_v45 = vpop.f32.mrb[10].mxu1 }
 0x451   : > { %v5832_v41 = vadd.f32 %v4341_v45, %v4100_v62  ;;  %1602 = vadd.xlane.f32.xlu1 %v1575_v46  ;;  %v1537_v34 = vpop.f32.mrb[11].mxu1  ;;  %v1917_v45 = vld [vmem:[%s7679_s14 + $0x88] sm:$0xff] }
 0x452   : > { %v5836_v61 = vadd.f32 %v4100_v62, %v1537_v34  ;;  %1600 = vadd.xlane.f32.xlu0 %v1574_v60  ;;  %v1921_v34 = vld [vmem:[%s7679_s14 + $0xa8] sm:$0xff] }
 0x453   : > { %v1577_v9 = vmax.f32 %v5832_v41, 0.0  ;;  %v1862_v41 = vld [vmem:[%s7678_s13 + $0xd0] sm:$0xff] }
 0x454   : > { %v1576_v4 = vmax.f32 %v5836_v61, 0.0  ;;  %v4344_v31 = vpop.f32.mrb[12].mxu1  ;;  %v6348_v61 = vld [vmem:[%s6073_s0 + $0x58] sm:$0xff] }
 0x455   : > { %v5842_v63 = vadd.f32 %v4344_v31, %v4100_v62  ;;  %1606 = vadd.xlane.f32.xlu1 %v1577_v9  ;;  %v1547_v18 = vpop.f32.mrb[13].mxu1  ;;  %v4506_v31 = vpack.c.bf16 %v1914_v59, %v1910_v24  ;;  %v1935_v24 = vld [vmem:[%s7679_s14 + $0x118] sm:$0xff]  ;;  %v4514_v59 = vpack.c.bf16 %v1930_v57, %v1926_v13 }
 0x456   : > { %v5846_v29 = vadd.f32 %v4100_v62, %v1547_v18  ;;  %1604 = vadd.xlane.f32.xlu0 %v1576_v4  ;;  %v4476_v18 = vpack.c.bf16 %v1921_v34, %v1917_v45  ;;  %v4484_v45 = vpack.c.bf16 %v1937_v3, %v1933_v12  ;;  %v1932_v34 = vld [vmem:[%s7679_s14 + $0x100] sm:$0xff]  ;;  %v1955_v13 = vld [vmem:[%s7679_s14 + $0x1b8] sm:$0xff] }
 0x457   : > { %v1579_v30 = vmax.f32 %v5842_v63, 0.0 }
 0x458   : > { %v1578_v48 = vmax.f32 %v5846_v29, 0.0  ;;  %v4347_v54 = vpop.f32.mrb[14].mxu1  ;;  %4477 = vmatprep.subr.bf16.mxu0 %v4476_v18  ;;  %v1934_v18 = vld [vmem:[%s7679_s14 + $0x110] sm:$0xff]  ;;  %v6383_v29 = vld [vmem:[%s6073_s0 + $0x60] sm:$0xff] }
 0x459   : > { %v5852_v39 = vadd.f32 %v4347_v54, %v4100_v62  ;;  %1610 = vadd.xlane.f32.xlu1 %v1579_v30  ;;  %v1557_v33 = vpop.f32.mrb[15].mxu1  ;;  %v1916_v54 = vld [vmem:[%s7679_s14 + $0x80] sm:$0xff] }
 0x45a   : > { %v5856_v5 = vadd.f32 %v4100_v62, %v1557_v33  ;;  %1608 = vadd.xlane.f32.xlu0 %v1578_v48  ;;  %v4502_v62 = vpack.c.bf16 %v1906_v35, %v1902_v50  ;;  %v1920_v33 = vld [vmem:[%s7679_s14 + $0xa0] sm:$0xff]  ;;  %v4510_v50 = vpack.c.bf16 %v1922_v7, %v1918_v44  ;;  %v4480_v35 = vpack.c.bf16 %v1929_v16, %v1925_v55  ;;  %v1943_v44 = vld [vmem:[%s7679_s14 + $0x158] sm:$0xff] }
 0x45b   : > { %v1581_v6 = vmax.f32 %v5852_v39, 0.0  ;;  %v4478_v37 = vpack.c.bf16 %v1920_v33, %v1916_v54  ;;  %v1938_v33 = vld [vmem:[%s7679_s14 + $0x130] sm:$0xff]  ;;  %v1947_v7 = vld [vmem:[%s7679_s14 + $0x178] sm:$0xff]  ;;  %v4488_v55 = vpack.c.bf16 %v1945_v20, %v1941_v32  ;;  %v1940_v16 = vld [vmem:[%s7679_s14 + $0x140] sm:$0xff] }
 0x45c   : > { %v1580_v1 = vmax.f32 %v5856_v5, 0.0  ;;  %4503 = vmatpush1.bf16.msra.mxu1 %v4502_v62  ;;  %v1927_v62 = vld [vmem:[%s7679_s14 + $0xd8] sm:$0xff]  ;;  %v4490_v57 = vpack.c.bf16 %v1944_v28, %v1940_v16  ;;  %v1837_v16 = vld [vmem:[%s7678_s13 + $0x8] sm:$0xff] }
 0x45d   : > { %1614 = vadd.xlane.f32.xlu1 %v1581_v6  ;;  %4505 = vmatprep.subr.bf16.mxu1 %v4504_v52  ;;  %v4512_v27 = vpack.c.bf16 %v1931_v47, %v1927_v62  ;;  %v1939_v52 = vld [vmem:[%s7679_s14 + $0x138] sm:$0xff]  ;;  %v1949_v62 = vld [vmem:[%s7679_s14 + $0x188] sm:$0xff] }
 0x45e   : > { %1612 = vadd.xlane.f32.xlu0 %v1580_v1  ;;  %4479 = vmatpush1.bf16.msra.mxu0 %v4478_v37  ;;  %v4516_v54 = vpack.c.bf16 %v1939_v52, %v1935_v24  ;;  %v1953_v47 = vld [vmem:[%s7679_s14 + $0x1a8] sm:$0xff]  ;;  %v1952_v24 = vld [vmem:[%s7679_s14 + $0x1a0] sm:$0xff]  ;;  %v1950_v52 = vld [vmem:[%s7679_s14 + $0x190] sm:$0xff] }
 0x45f   : > { %4481 = vmatprep.subr.bf16.mxu0 %v4480_v35  ;;  %v4520_v35 = vpack.c.bf16 %v1947_v7, %v1943_v44  ;;  %v4492_v3 = vpack.c.bf16 %v1953_v47, %v1949_v62  ;;  %v1956_v44 = vld [vmem:[%s7679_s14 + $0x1c0] sm:$0xff]  ;;  %v1841_v28 = vld [vmem:[%s7678_s13 + $0x28] sm:$0xff] }
 0x460   : > { %4507 = vmatpush1.bf16.msra.mxu1 %v4506_v31  ;;  %v1936_v31 = vld [vmem:[%s7679_s14 + $0x120] sm:$0xff]  ;;  %v4532_v62 = vpack.c.bf16 %v1841_v28, %v1837_v16  ;;  %v1859_v16 = vld [vmem:[%s7678_s13 + $0xb8] sm:$0xff]  ;;  %v6418_v5 = vld [vmem:[%s6073_s0 + $0x68] sm:$0xff] }
 0x461   : > { %4509 = vmatprep.subr.bf16.mxu1 %v4508_v40  ;;  %v4486_v37 = vpack.c.bf16 %v1936_v31, %v1932_v34  ;;  %v4518_v40 = vpack.c.bf16 %v1938_v33, %v1934_v18  ;;  %v1957_v34 = vld [vmem:[%s7679_s14 + $0x1c8] sm:$0xff]  ;;  %v1959_v18 = vld [vmem:[%s7679_s14 + $0x1d8] sm:$0xff]  ;;  %v1960_v7 = vld [vmem:[%s7679_s14 + $0x1e0] sm:$0xff] }
 0x462   : > { %4483 = vmatpush1.bf16.msra.mxu0 %v4482_v11  ;;  %v1948_v11 = vld [vmem:[%s7679_s14 + $0x180] sm:$0xff]  ;;  %v1961_v31 = vld [vmem:[%s7679_s14 + $0x1e8] sm:$0xff] }
 0x463   : > { %4485 = vmatprep.subr.bf16.mxu0 %v4484_v45  ;;  %v1954_v45 = vld [vmem:[%s7679_s14 + $0x1b0] sm:$0xff]  ;;  %v4494_v33 = vpack.c.bf16 %v1952_v24, %v1948_v11  ;;  %v4496_v20 = vpack.c.bf16 %v1961_v31, %v1957_v34  ;;  %v1840_v47 = vld [vmem:[%s7678_s13 + $0x20] sm:$0xff]  ;;  %v1851_v34 = vld [vmem:[%s7678_s13 + $0x78] sm:$0xff] }
 0x464   : > { %4511 = vmatpush1.bf16.msra.mxu1 %v4510_v50  ;;  %v1942_v50 = vld [vmem:[%s7679_s14 + $0x150] sm:$0xff]  ;;  %v4526_v32 = vpack.c.bf16 %v1954_v45, %v1950_v52  ;;  %v1820_v52 = vld [vmem:[%s6073_s0] sm:$0xff]  ;;  %v1847_v45 = vld [vmem:[%s7678_s13 + $0x58] sm:$0xff] }
 0x465   : > { %4513 = vmatprep.subr.bf16.mxu1 %v4512_v27  ;;  %v1951_v27 = vld [vmem:[%s7679_s14 + $0x198] sm:$0xff]  ;;  %v4522_v12 = vpack.c.bf16 %v1946_v17, %v1942_v50  ;;  %v4498_v50 = vpack.c.bf16 %v1960_v7, %v1956_v44  ;;  %v1838_v11 = vld [vmem:[%s7678_s13 + $0x10] sm:$0xff]  ;;  %v4568_v44 = vpack.c.bf16 %v1851_v34, %v1847_v45  ;;  %v1869_v34 = vld [vmem:[%s7678_s13 + $0x108] sm:$0xff] }
 0x466   : > { %4487 = vmatpush1.bf16.msra.mxu0 %v4486_v37  ;;  %v1958_v37 = vld [vmem:[%s7679_s14 + $0x1d0] sm:$0xff] }
 0x467   : > { %4489 = vmatprep.subr.bf16.mxu0 %v4488_v55  ;;  %v1962_v55 = vld [vmem:[%s7679_s14 + $0x1f0] sm:$0xff] }
 0x468   : > { %4515 = vmatpush1.bf16.msra.mxu1 %v4514_v59  ;;  %v4524_v59 = vpack.c.bf16 %v1955_v13, %v1951_v27  ;;  %v4530_v17 = vpack.c.bf16 %v1962_v55, %v1958_v37  ;;  %v1839_v27 = vld [vmem:[%s7678_s13 + $0x18] sm:$0xff]  ;;  %v1842_v24 = vld [vmem:[%s7678_s13 + $0x30] sm:$0xff] }
 0x469   : > { %4517 = vmatprep.subr.bf16.mxu1 %v4516_v54  ;;  %v1963_v54 = vld [vmem:[%s7679_s14 + $0x1f8] sm:$0xff]  ;;  %v1846_v7 = vld [vmem:[%s7678_s13 + $0x50] sm:$0xff] }
 0x46a   : > { %4491 = vmatpush1.bf16.msra.mxu0 %v4490_v57  ;;  %v1843_v13 = vld [vmem:[%s7678_s13 + $0x38] sm:$0xff]  ;;  %v1845_v57 = vld [vmem:[%s7678_s13 + $0x48] sm:$0xff]  ;;  %v1850_v37 = vld [vmem:[%s7678_s13 + $0x70] sm:$0xff] }
 0x46b   : > { %4493 = vmatprep.subr.bf16.mxu0 %v4492_v3  ;;  %v1849_v3 = vld [vmem:[%s7678_s13 + $0x68] sm:$0xff]  ;;  %v1855_v55 = vld [vmem:[%s7678_s13 + $0x98] sm:$0xff] }
 0x46c   : > { %4519 = vmatpush1.bf16.msra.mxu1 %v4518_v40  ;;  %v4528_v40 = vpack.c.bf16 %v1963_v54, %v1959_v18  ;;  %v4536_v31 = vpack.c.bf16 %v1849_v3, %v1845_v57  ;;  %v1844_v18 = vld [vmem:[%s7678_s13 + $0x40] sm:$0xff]  ;;  %v1854_v57 = vld [vmem:[%s7678_s13 + $0x90] sm:$0xff] }
 0x46d   : > { %4521 = vmatprep.subr.bf16.mxu1 %v4520_v35  ;;  %v1836_v35 = vld [vmem:[%s7678_s13] sm:$0xff]  ;;  %v6154_v3 = vld [vmem:[%s6073_s0 + $0x10] sm:$0xff] }
 0x46e   : > { %4495 = vmatpush1.bf16.msra.mxu0 %v4494_v33  ;;  %v1848_v54 = vld [vmem:[%s7678_s13 + $0x60] sm:$0xff]  ;;  %v1853_v33 = vld [vmem:[%s7678_s13 + $0x88] sm:$0xff] }
 0x46f   : > { %4497 = vmatprep.subr.bf16.mxu0 %v4496_v20  ;;  %v1857_v20 = vld [vmem:[%s7678_s13 + $0xa8] sm:$0xff]  ;;  %v4538_v28 = vpack.c.bf16 %v1848_v54, %v1844_v18  ;;  %v6173_v18 = vld [vmem:[%s6073_s0 + $0x18] sm:$0xff] }
 0x470   : > { %4523 = vmatpush1.bf16.msra.mxu1 %v4522_v12  ;;  %v4564_v12 = vpack.c.bf16 %v1843_v13, %v1839_v27  ;;  %v1865_v27 = vld [vmem:[%s7678_s13 + $0xe8] sm:$0xff]  ;;  %v4572_v13 = vpack.c.bf16 %v1859_v16, %v1855_v55 }
 0x471   : > { %4525 = vmatprep.subr.bf16.mxu1 %v4524_v59  ;;  %v4534_v59 = vpack.c.bf16 %v1840_v47, %v1836_v35  ;;  %v1852_v35 = vld [vmem:[%s7678_s13 + $0x80] sm:$0xff]  ;;  %v4570_v47 = vpack.c.bf16 %v1850_v37, %v1846_v7  ;;  %v1881_v7 = vld [vmem:[%s7678_s13 + $0x168] sm:$0xff] }
 0x472   : > { %4499 = vmatpush1.bf16.msra.mxu0 %v4498_v50  ;;  %v4540_v50 = vpack.c.bf16 %v1857_v20, %v1853_v33  ;;  %v1872_v20 = vld [vmem:[%s7678_s13 + $0x120] sm:$0xff] }
 0x473   : > { %4533 = vmatprep.subr.bf16.mxu0 %v4532_v62  ;;  %v1861_v62 = vld [vmem:[%s7678_s13 + $0xc8] sm:$0xff]  ;;  %v6192_v37 = vld [vmem:[%s6073_s0 + $0x20] sm:$0xff] }
 0x474   : > { %4527 = vmatpush1.bf16.msra.mxu1 %v4526_v32  ;;  %v4566_v32 = vpack.c.bf16 %v1842_v24, %v1838_v11  ;;  %v4544_v24 = vpack.c.bf16 %v1865_v27, %v1861_v62  ;;  %v6212_v62 = vld [vmem:[%s6073_s0 + $0x30] sm:$0xff]  ;;  %v6226_v27 = vld [vmem:[%s6073_s0 + $0x40] sm:$0xff] }
 0x475   : > { %4529 = vmatprep.subr.bf16.mxu1 %v4528_v40  ;;  %2029 = vmatmul.mubr.f32.vlgmr.msra.gmra.mrb[16].mxu0 %v1820_v52  ;;  %v6122_v40 = vld [vmem:[%s6073_s0 + $0x8] sm:$0xff] }
 0x476   : > { %4535 = vmatpush1.bf16.msra.mxu0 %v4534_v59  ;;  %2034 = vmatprep.mubr.f32.mxu0 %v5078_v38  ;;  %v1864_v59 = vld [vmem:[%s7678_s13 + $0xe0] sm:$0xff] }
 0x477   : > { %4537 = vmatprep.subr.bf16.mxu0 %v4536_v31  ;;  %v1873_v31 = vld [vmem:[%s7678_s13 + $0x128] sm:$0xff] }
 0x478   : > { %4531 = vmatpush1.bf16.msra.mxu1 %v4530_v17  ;;  %v1856_v17 = vld [vmem:[%s7678_s13 + $0xa0] sm:$0xff]  ;;  %v4548_v33 = vpack.c.bf16 %v1873_v31, %v1869_v34 }
 0x479   : > { %4565 = vmatprep.subr.bf16.mxu1 %v4564_v12  ;;  %2035 = vmatmul.mubr.f32.gmra.mrb[18].mxu0 %v6122_v40  ;;  %v1858_v12 = vld [vmem:[%s7678_s13 + $0xb0] sm:$0xff]  ;;  %v4542_v11 = vpack.c.bf16 %v1856_v17, %v1852_v35  ;;  %v6205_v35 = vld [vmem:[%s6073_s0 + $0x28] sm:$0xff] }
 0x47a   : > { %2040 = vmatprep.mubr.f32.mxu0 %v5078_v38  ;;  %4539 = vmatpush1.bf16.msra.mxu0 %v4538_v28  ;;  %v4574_v45 = vpack.c.bf16 %v1858_v12, %v1854_v57  ;;  %v1876_v28 = vld [vmem:[%s7678_s13 + $0x140] sm:$0xff]  ;;  %v6240_v57 = vld [vmem:[%s6073_s0 + $0x50] sm:$0xff] }
 0x47b   : > { %2190 = vmatmul.mubr.f32.vlgmr.msra.gmra.mrb[16].mxu1 %v1820_v52  ;;  %4541 = vmatprep.subr.bf16.mxu0 %v4540_v50  ;;  %v1860_v52 = vld [vmem:[%s7678_s13 + $0xc0] sm:$0xff] }
 0x47c   : > { %2195 = vmatprep.mubr.f32.mxu1 %v5078_v38  ;;  %4567 = vmatpush1.bf16.msra.mxu1 %v4566_v32  ;;  %v4546_v54 = vpack.c.bf16 %v1864_v59, %v1860_v52  ;;  %v1868_v32 = vld [vmem:[%s7678_s13 + $0x100] sm:$0xff] }
 0x47d   : > { %4569 = vmatprep.subr.bf16.mxu1 %v4568_v44  ;;  %2041 = vmatmul.mubr.f32.gmra.mrb[20].mxu0 %v6154_v3  ;;  %v1877_v44 = vld [vmem:[%s7678_s13 + $0x148] sm:$0xff]  ;;  %v4550_v55 = vpack.c.bf16 %v1872_v20, %v1868_v32  ;;  %v1880_v50 = vld [vmem:[%s7678_s13 + $0x160] sm:$0xff] }
 0x47e   : > { %2046 = vmatprep.mubr.f32.mxu0 %v5078_v38  ;;  %4543 = vmatpush1.bf16.msra.mxu0 %v4542_v11  ;;  %v4552_v16 = vpack.c.bf16 %v1881_v7, %v1877_v44  ;;  %v4554_v17 = vpack.c.bf16 %v1880_v50, %v1876_v28 }
 0x47f   : > { %2196 = vmatmul.mubr.f32.gmra.mrb[18].mxu1 %v6122_v40  ;;  %4545 = vmatprep.subr.bf16.mxu0 %v4544_v24 }
 0x480   : > { %2201 = vmatprep.mubr.f32.mxu1 %v5078_v38  ;;  %4571 = vmatpush1.bf16.msra.mxu1 %v4570_v47  ;;  %v6219_v47 = vld [vmem:[%s6073_s0 + $0x38] sm:$0xff] }
 0x481   : > { %4573 = vmatprep.subr.bf16.mxu1 %v4572_v13  ;;  %2047 = vmatmul.mubr.f32.gmra.mrb[22].mxu0 %v6173_v18  ;;  %v6233_v13 = vld [vmem:[%s6073_s0 + $0x48] sm:$0xff] }
 0x482   : > { %2052 = vmatprep.mubr.f32.mxu0 %v5078_v38  ;;  %4547 = vmatpush1.bf16.msra.mxu0 %v4546_v54 }
 0x483   : > { %2202 = vmatmul.mubr.f32.gmra.mrb[20].mxu1 %v6154_v3  ;;  %4549 = vmatprep.subr.bf16.mxu0 %v4548_v33 }
 0x484   : > { %2207 = vmatprep.mubr.f32.mxu1 %v5078_v38  ;;  %4575 = vmatpush1.bf16.msra.mxu1 %v4574_v45 }
 0x485   : > { %2053 = vmatmul.mubr.f32.gmra.mrb[24].mxu0 %v6192_v37 }
 0x486   : > { %2058 = vmatprep.mubr.f32.mxu0 %v5078_v38  ;;  %4551 = vmatpush1.bf16.msra.mxu0 %v4550_v55 }
 0x487   : > { %2208 = vmatmul.mubr.f32.gmra.mrb[22].mxu1 %v6173_v18  ;;  %4553 = vmatprep.subr.bf16.mxu0 %v4552_v16 }
 0x488   : > { %2213 = vmatprep.mubr.f32.mxu1 %v5078_v38 }
 0x489   : > { %2059 = vmatmul.mubr.f32.gmra.mrb[26].mxu0 %v6205_v35 }
 0x48a   : > { %2064 = vmatprep.mubr.f32.mxu0 %v5078_v38  ;;  %4555 = vmatpush1.bf16.msra.mxu0 %v4554_v17 }
 0x48b   : > { %2214 = vmatmul.mubr.f32.gmra.mrb[24].mxu1 %v6192_v37 }
 0x48c   : > { %2219 = vmatprep.mubr.f32.mxu1 %v5078_v38 }
 0x48d   : > { %2065 = vmatmul.mubr.f32.gmra.mrb[28].mxu0 %v6212_v62 }
 0x48e   : > { %2070 = vmatprep.mubr.f32.mxu0 %v5078_v38 }
 0x48f   : > { %2220 = vmatmul.mubr.f32.gmra.mrb[26].mxu1 %v6205_v35 }
 0x490   : > { %2225 = vmatprep.mubr.f32.mxu1 %v5078_v38 }
 0x491   : > { %2071 = vmatmul.mubr.f32.gmra.mrb[30].mxu0 %v6219_v47 }
 0x492   : > { %2076 = vmatprep.mubr.f32.mxu0 %v5078_v38 }
 0x493   : > { %2226 = vmatmul.mubr.f32.gmra.mrb[28].mxu1 %v6212_v62 }
 0x494   : > { %2231 = vmatprep.mubr.f32.mxu1 %v5078_v38 }
 0x495   : > { %2077 = vmatmul.mubr.f32.gmra.mrb[32].mxu0 %v6226_v27 }
 0x496   : > { %2082 = vmatprep.mubr.f32.mxu0 %v5078_v38 }
 0x497   : > { %2232 = vmatmul.mubr.f32.gmra.mrb[30].mxu1 %v6219_v47 }
 0x498   : > { %2237 = vmatprep.mubr.f32.mxu1 %v5078_v38 }
 0x499   : > { %2083 = vmatmul.mubr.f32.gmra.mrb[34].mxu0 %v6233_v13 }
 0x49a   : > { %2088 = vmatprep.mubr.f32.mxu0 %v5078_v38 }
 0x49b   : > { %2238 = vmatmul.mubr.f32.gmra.mrb[32].mxu1 %v6226_v27 }
 0x49c   : > { %2243 = vmatprep.mubr.f32.mxu1 %v5078_v38 }
 0x49d   : > { %2089 = vmatmul.mubr.f32.gmra.mrb[36].mxu0 %v6240_v57 }
 0x49e   : > { %2094 = vmatprep.mubr.f32.mxu0 %v5078_v38 }
 0x49f   : > { %2244 = vmatmul.mubr.f32.gmra.mrb[34].mxu1 %v6233_v13 }
 0x4a0   : > { %2249 = vmatprep.mubr.f32.mxu1 %v5078_v38 }
 0x4a1   : > { %2095 = vmatmul.mubr.f32.gmra.mrb[38].mxu0 %v6348_v61 }
 0x4a2   : > { %2100 = vmatprep.mubr.f32.mxu0 %v5078_v38 }
 0x4a3   : > { %2250 = vmatmul.mubr.f32.gmra.mrb[36].mxu1 %v6240_v57 }
 0x4a4   : > { %2255 = vmatprep.mubr.f32.mxu1 %v5078_v38 }
 0x4a5   : > { %2101 = vmatmul.mubr.f32.gmra.mrb[40].mxu0 %v6383_v29 }
 0x4a6   : > { %2106 = vmatprep.mubr.f32.mxu0 %v5078_v38 }
 0x4a7   : > { %2256 = vmatmul.mubr.f32.gmra.mrb[38].mxu1 %v6348_v61 }
 0x4a8   : > { %2261 = vmatprep.mubr.f32.mxu1 %v5078_v38 }
 0x4a9   : > { %2107 = vmatmul.mubr.f32.gmra.mrb[42].mxu0 %v6418_v5 }
 0x4aa   : > { %2112 = vmatprep.mubr.f32.mxu0 %v5078_v38 }
 0x4ab   : > { %2262 = vmatmul.mubr.f32.gmra.mrb[40].mxu1 %v6383_v29 }
 0x4ac   : > { %2267 = vmatprep.mubr.f32.mxu1 %v5078_v38 }
 0x4af   : > { %2268 = vmatmul.mubr.f32.gmra.mrb[42].mxu1 %v6418_v5 }
 0x4b0   : > { %2273 = vmatprep.mubr.f32.mxu1 %v5078_v38 }
 0x4ce   : > { %v1587_v12 = vpop.xlane.xlu1 %1586 }
 0x4cf   : > { %v1617_v11 = vmul.f32 0.015625, %v1587_v12  ;;  %v1585_v24 = vpop.xlane.xlu0 %1584 }
 0x4d0   : > { %v1616_v52 = vmul.f32 0.015625, %v1585_v24 }
 0x4d1   : > { %v1633_v59 = vsub.f32 %v1567_v0, %v1617_v11 }
 0x4d2   : > { %v1632_v45 = vsub.f32 %v1566_v42, %v1616_v52  ;;  %v1591_v34 = vpop.xlane.xlu1 %1590 }
 0x4d3   : > { %v1619_v31 = vmul.f32 0.015625, %v1591_v34  ;;  %v1589_v54 = vpop.xlane.xlu0 %1588  ;;  %v6253_v33 = vsel %vm1225_vm1, %v1633_v59, 0.0 }
 0x4d4   : > { %v1618_v32 = vmul.f32 0.015625, %v1589_v54  ;;  %v1665_v20 = vmul.f32 %v6253_v33, %v6253_v33  ;;  %v6259_v44 = vsel %vm1225_vm1, %v1632_v45, 0.0 }
 0x4d5   : > { %v1635_v2 = vsub.f32 %v1569_v21, %v1619_v31  ;;  %v1664_v53 = vmul.f32 %v6259_v44, %v6259_v44 }
 0x4d6   : > { %v1634_v0 = vsub.f32 %v1568_v26, %v1618_v32  ;;  %v1595_v42 = vpop.xlane.xlu1 %1594  ;;  %1682 = vadd.xlane.f32.xlu1 %v1665_v20 }
 0x4d7   : > { %v1621_v7 = vmul.f32 0.015625, %v1595_v42  ;;  %1680 = vadd.xlane.f32.xlu0 %v1664_v53  ;;  %v1593_v55 = vpop.xlane.xlu0 %1592  ;;  %v6269_v16 = vsel %vm1225_vm1, %v1635_v2, 0.0 }
 0x4d8   : > { %v1620_v28 = vmul.f32 0.015625, %v1593_v55  ;;  %v1667_v49 = vmul.f32 %v6269_v16, %v6269_v16  ;;  %v6275_v21 = vsel %vm1225_vm1, %v1634_v0, 0.0  ;;  %v1863_v55 = vld [vmem:[%s7678_s13 + $0xd8] sm:$0xff] }
 0x4d9   : > { %v1637_v19 = vsub.f32 %v1571_v36, %v1621_v7  ;;  %v1666_v26 = vmul.f32 %v6275_v21, %v6275_v21 }
 0x4da   : > { %v1636_v50 = vsub.f32 %v1570_v14, %v1620_v28  ;;  %v1599_v17 = vpop.xlane.xlu1 %1598  ;;  %1686 = vadd.xlane.f32.xlu1 %v1667_v49  ;;  %v1867_v28 = vld [vmem:[%s7678_s13 + $0xf8] sm:$0xff] }
 0x4db   : > { %v1623_v12 = vmul.f32 0.015625, %v1599_v17  ;;  %1684 = vadd.xlane.f32.xlu0 %v1666_v26  ;;  %v1597_v11 = vpop.xlane.xlu0 %1596  ;;  %v6285_v24 = vsel %vm1225_vm1, %v1637_v19, 0.0  ;;  %v4576_v26 = vpack.c.bf16 %v1867_v28, %v1863_v55  ;;  %v1882_v55 = vld [vmem:[%s7678_s13 + $0x170] sm:$0xff] }
 0x4dc   : > { %v1622_v52 = vmul.f32 0.015625, %v1597_v11  ;;  %v1669_v10 = vmul.f32 %v6285_v24, %v6285_v24  ;;  %v6291_v36 = vsel %vm1225_vm1, %v1636_v50, 0.0 }
 0x4dd   : > { %v1639_v51 = vsub.f32 %v1573_v25, %v1623_v12  ;;  %v1668_v14 = vmul.f32 %v6291_v36, %v6291_v36  ;;  %4577 = vmatprep.subr.bf16.mxu1 %v4576_v26 }
 0x4de   : > { %v1638_v59 = vsub.f32 %v1572_v43, %v1622_v52  ;;  %v1603_v45 = vpop.xlane.xlu1 %1602  ;;  %1690 = vadd.xlane.f32.xlu1 %v1669_v10 }
 0x4df   : > { %v1625_v34 = vmul.f32 0.015625, %v1603_v45  ;;  %1688 = vadd.xlane.f32.xlu0 %v1668_v14  ;;  %v1601_v31 = vpop.xlane.xlu0 %1600  ;;  %v6301_v54 = vsel %vm1225_vm1, %v1639_v51, 0.0  ;;  %v1875_v45 = vld [vmem:[%s7678_s13 + $0x138] sm:$0xff] }
 0x4e0   : > { %v1624_v32 = vmul.f32 0.015625, %v1601_v31  ;;  %v1671_v15 = vmul.f32 %v6301_v54, %v6301_v54  ;;  %v6307_v25 = vsel %vm1225_vm1, %v1638_v59, 0.0  ;;  %v1871_v59 = vld [vmem:[%s7678_s13 + $0x118] sm:$0xff]  ;;  %v1870_v31 = vld [vmem:[%s7678_s13 + $0x110] sm:$0xff] }
 0x4e1   : > { %v1641_v56 = vsub.f32 %v1575_v46, %v1625_v34  ;;  %v1670_v43 = vmul.f32 %v6307_v25, %v6307_v25 }
 0x4e2   : > { %v1640_v20 = vsub.f32 %v1574_v60, %v1624_v32  ;;  %v1607_v2 = vpop.xlane.xlu1 %1606  ;;  %1694 = vadd.xlane.f32.xlu1 %v1671_v15  ;;  %v1874_v32 = vld [vmem:[%s7678_s13 + $0x130] sm:$0xff] }
 0x4e3   : > { %v1627_v53 = vmul.f32 0.015625, %v1607_v2  ;;  %1692 = vadd.xlane.f32.xlu0 %v1670_v43  ;;  %v1605_v0 = vpop.xlane.xlu0 %1604  ;;  %v6317_v42 = vsel %vm1225_vm1, %v1641_v56, 0.0 }
 0x4e4   : > { %v1626_v7 = vmul.f32 0.015625, %v1605_v0  ;;  %v1673_v8 = vmul.f32 %v6317_v42, %v6317_v42  ;;  %v6323_v46 = vsel %vm1225_vm1, %v1640_v20, 0.0 }
 0x4e5   : > { %v1643_v58 = vsub.f32 %v1577_v9, %v1627_v53  ;;  %v1672_v60 = vmul.f32 %v6323_v46, %v6323_v46  ;;  %v1866_v9 = vld [vmem:[%s7678_s13 + $0xf0] sm:$0xff] }
 0x4e6   : > { %v1642_v49 = vsub.f32 %v1576_v4, %v1626_v7  ;;  %v1611_v19 = vpop.xlane.xlu1 %1610  ;;  %1698 = vadd.xlane.f32.xlu1 %v1673_v8  ;;  %v4578_v4 = vpack.c.bf16 %v1866_v9, %v1862_v41  ;;  %v1879_v8 = vld [vmem:[%s7678_s13 + $0x158] sm:$0xff]  ;;  %v1885_v41 = vld [vmem:[%s7678_s13 + $0x188] sm:$0xff] }
 0x4e7   : > { %v1629_v50 = vmul.f32 0.015625, %v1611_v19  ;;  %1696 = vadd.xlane.f32.xlu0 %v1672_v60  ;;  %v1609_v17 = vpop.xlane.xlu0 %1608  ;;  %v6345_v12 = vsel %vm1225_vm1, %v1643_v58, 0.0  ;;  %v1883_v58 = vld [vmem:[%s7678_s13 + $0x178] sm:$0xff]  ;;  %v1889_v9 = vld [vmem:[%s7678_s13 + $0x1a8] sm:$0xff] }
 0x4e8   : > { %v1628_v11 = vmul.f32 0.015625, %v1609_v17  ;;  %v1675_v52 = vmul.f32 %v6345_v12, %v6345_v12  ;;  %v6354_v10 = vsel %vm1225_vm1, %v1642_v49, 0.0  ;;  %4579 = vmatpush1.bf16.msra.mxu1 %v4578_v4  ;;  %v4584_v39 = vpack.c.bf16 %v1883_v58, %v1879_v8  ;;  %v1884_v4 = vld [vmem:[%s7678_s13 + $0x180] sm:$0xff]  ;;  %v1894_v8 = vld [vmem:[%s7678_s13 + $0x1d0] sm:$0xff] }
 0x4e9   : > { %v1645_v51 = vsub.f32 %v1579_v30, %v1629_v50  ;;  %v1674_v14 = vmul.f32 %v6354_v10, %v6354_v10  ;;  %v4580_v30 = vpack.c.bf16 %v1875_v45, %v1871_v59  ;;  %v1887_v50 = vld [vmem:[%s7678_s13 + $0x198] sm:$0xff]  ;;  %v4556_v17 = vpack.c.bf16 %v1889_v9, %v1885_v41  ;;  %v1886_v45 = vld [vmem:[%s7678_s13 + $0x190] sm:$0xff] }
 0x4ea   : > { %v1644_v34 = vsub.f32 %v1578_v48, %v1628_v11  ;;  %1702 = vadd.xlane.f32.xlu1 %v1675_v52  ;;  %v1615_v63 = vpop.xlane.xlu1 %1614  ;;  %v4582_v48 = vpack.c.bf16 %v1874_v32, %v1870_v31  ;;  %v1888_v11 = vld [vmem:[%s7678_s13 + $0x1a0] sm:$0xff]  ;;  %v1891_v52 = vld [vmem:[%s7678_s13 + $0x1b8] sm:$0xff]  ;;  %v1897_v31 = vld [vmem:[%s7678_s13 + $0x1e8] sm:$0xff] }
 0x4eb   : > { %v1631_v15 = vmul.f32 0.015625, %v1615_v63  ;;  %1700 = vadd.xlane.f32.xlu0 %v1674_v14  ;;  %v1613_v56 = vpop.xlane.xlu0 %1612  ;;  %v6379_v43 = vsel %vm1225_vm1, %v1645_v51, 0.0  ;;  %4581 = vmatprep.subr.bf16.mxu1 %v4580_v30  ;;  %v4558_v51 = vpack.c.bf16 %v1888_v11, %v1884_v4  ;;  %v6451_v14 = vld [vmem:[%s6073_s0 + $0x70] sm:$0xff]  ;;  %v4588_v59 = vpack.c.bf16 %v1891_v52, %v1887_v50  ;;  %v1893_v30 = vld [vmem:[%s7678_s13 + $0x1c8] sm:$0xff]  ;;  %v1892_v32 = vld [vmem:[%s7678_s13 + $0x1c0] sm:$0xff] }
 0x4ec   : > { %v1630_v20 = vmul.f32 0.015625, %v1613_v56  ;;  %v1677_v2 = vmul.f32 %v6379_v43, %v6379_v43  ;;  %v6389_v53 = vsel %vm1225_vm1, %v1644_v34, 0.0  ;;  %4583 = vmatpush1.bf16.msra.mxu1 %v4582_v48  ;;  %v1890_v34 = vld [vmem:[%s7678_s13 + $0x1b0] sm:$0xff]  ;;  %4557 = vmatprep.subr.bf16.mxu0 %v4556_v17  ;;  %v1896_v56 = vld [vmem:[%s7678_s13 + $0x1e0] sm:$0xff]  ;;  %v1895_v48 = vld [vmem:[%s7678_s13 + $0x1d8] sm:$0xff] }
 0x4ed   : > { %v1647_v0 = vsub.f32 %v1581_v6, %v1631_v15  ;;  %v1676_v7 = vmul.f32 %v6389_v53, %v6389_v53  ;;  %v1878_v6 = vld [vmem:[%s7678_s13 + $0x150] sm:$0xff]  ;;  %4585 = vmatprep.subr.bf16.mxu1 %v4584_v39  ;;  %2113 = vmatmul.mubr.f32.gmra.mrb[44].mxu0 %v6451_v14  ;;  %v4590_v63 = vpack.c.bf16 %v1890_v34, %v1886_v45 }
 0x4ee   : > { %v1646_v60 = vsub.f32 %v1580_v1, %v1630_v20  ;;  %1706 = vadd.xlane.f32.xlu1 %v1677_v2  ;;  %v4586_v1 = vpack.c.bf16 %v1882_v55, %v1878_v6  ;;  %4559 = vmatpush1.bf16.msra.mxu0 %v4558_v51  ;;  %v4560_v15 = vpack.c.bf16 %v1897_v31, %v1893_v30  ;;  %v1899_v20 = vld [vmem:[%s7678_s13 + $0x1f8] sm:$0xff]  ;;  %v1898_v58 = vld [vmem:[%s7678_s13 + $0x1f0] sm:$0xff] }
 0x4ef   : > { %1704 = vadd.xlane.f32.xlu0 %v1676_v7  ;;  %v6414_v28 = vsel %vm1225_vm1, %v1647_v0, 0.0  ;;  %2274 = vmatmul.mubr.f32.gmra.mrb[44].mxu1 %v6451_v14  ;;  %v4562_v2 = vpack.c.bf16 %v1896_v56, %v1892_v32  ;;  %v6482_v0 = vld [vmem:[%s6073_s0 + $0x78] sm:$0xff]  ;;  %v4592_v7 = vpack.c.bf16 %v1899_v20, %v1895_v48  ;;  %v6497_v56 = vld [vmem:[%s7676_s11] ss:$0 sm:$0xff] }
 0x4f0   : > { %v1679_v49 = vmul.f32 %v6414_v28, %v6414_v28  ;;  %v6424_v19 = vsel %vm1225_vm1, %v1646_v60, 0.0  ;;  %4587 = vmatpush1.bf16.msra.mxu1 %v4586_v1  ;;  %2118 = vmatprep.mubr.f32.mxu0 %v5078_v38  ;;  %v4594_v60 = vpack.c.bf16 %v1898_v58, %v1894_v8 }
 0x4f1   : > { %v1678_v26 = vmul.f32 %v6424_v19, %v6424_v19  ;;  %4589 = vmatprep.subr.bf16.mxu1 %v4588_v59  ;;  %2279 = vmatprep.mubr.f32.mxu1 %v5078_v38 }
 0x4f2   : > { %1710 = vadd.xlane.f32.xlu1 %v1679_v49  ;;  %4561 = vmatprep.subr.bf16.mxu0 %v4560_v15 }
 0x4f3   : > { %1708 = vadd.xlane.f32.xlu0 %v1678_v26  ;;  %2119 = vmatmul.mubr.f32.gmra.mrb[46].mxu0 %v6482_v0 }
 0x4f4   : > { %4591 = vmatpush1.bf16.msra.mxu1 %v4590_v63  ;;  %4563 = vmatpush1.bf16.msra.mxu0 %v4562_v2 }
 0x4f5   : > { %2280 = vmatmul.mubr.f32.gmra.mrb[46].mxu1 %v6482_v0  ;;  %4593 = vmatprep.subr.bf16.mxu1 %v4592_v7  ;;  %v6504_v7 = vld [vmem:[%s7677_s12] ss:$0 sm:$0xff] }
 0x4f6   : > { %2350 = vmatprep.mubr.f32.mxu0 %v5078_v38  ;;  %2511 = vmatprep.mubr.f32.mxu1 %v5078_v38 }
 0x4f8   : > { %4595 = vmatpush1.bf16.msra.mxu1 %v4594_v60 }
 0x563   : > { %v1683_v39 = vpop.xlane.xlu1 %1682 }
 0x564   : > { %v1713_v6 = vmul.f32 0.015625, %v1683_v39  ;;  %v1681_v55 = vpop.xlane.xlu0 %1680 }
 0x565   : > { %v1712_v1 = vmul.f32 0.015625, %v1681_v55 }
 0x566   : > { %v1729_v49 = vadd.f32 1e-05, %v1713_v6 }
 0x567   : > { %v1728_v26 = vadd.f32 1e-05, %v1712_v1  ;;  %v1687_v41 = vpop.xlane.xlu1 %1686 }
 0x568   : > { %4781 = vrsqrt.f32 %v1729_v49  ;;  %v1715_v9 = vmul.f32 0.015625, %v1687_v41  ;;  %v1685_v50 = vpop.xlane.xlu0 %1684 }
 0x569   : > { %4783 = vrsqrt.f32 %v1728_v26  ;;  %v1714_v17 = vmul.f32 0.015625, %v1685_v50 }
 0x56a   : > { %v1731_v4 = vadd.f32 1e-05, %v1715_v9 }
 0x56b   : > { %v1730_v11 = vadd.f32 1e-05, %v1714_v17  ;;  %v1691_v52 = vpop.xlane.xlu1 %1690 }
 0x56c   : > { %v1689_v51 = vpop.xlane.xlu0 %1688  ;;  %v1717_v45 = vmul.f32 0.015625, %v1691_v52 }
 0x56d   : > { %4785 = vrsqrt.f32 %v1730_v11  ;;  %v1716_v59 = vmul.f32 0.015625, %v1689_v51 }
 0x56e   : > { %4787 = vrsqrt.f32 %v1731_v4  ;;  %v1733_v32 = vadd.f32 1e-05, %v1717_v45 }
 0x56f   : > { %v1732_v34 = vadd.f32 1e-05, %v1716_v59  ;;  %v1695_v20 = vpop.xlane.xlu1 %1694 }
 0x570   : > { %v1693_v63 = vpop.xlane.xlu0 %1692  ;;  %v1719_v60 = vmul.f32 0.015625, %v1695_v20 }
 0x571   : > { %4789 = vrsqrt.f32 %v1732_v34  ;;  %v1718_v15 = vmul.f32 0.015625, %v1693_v63 }
 0x572   : > { %v4782_v30 = vpop.eup %4781  ;;  %4791 = vrsqrt.f32 %v1733_v32 }
 0x573   : > { %v4784_v31 = vpop.eup %4783  ;;  %v1761_v2 = vmul.f32 %v4782_v30, %v6253_v33  ;;  %v1734_v39 = vadd.f32 1e-05, %v1718_v15  ;;  %v1735_v33 = vadd.f32 1e-05, %v1719_v60  ;;  %v1699_v41 = vpop.xlane.xlu1 %1698 }
 0x574   : > { %v1760_v48 = vmul.f32 %v4784_v31, %v6259_v44  ;;  %v1697_v6 = vpop.xlane.xlu0 %1696 }
 0x575   : > { %v1783_v1 = vmul.f32 %v6497_v56, %v1761_v2  ;;  %4793 = vrsqrt.f32 %v1734_v39  ;;  %v1720_v26 = vmul.f32 0.015625, %v1697_v6 }
 0x576   : > { %v1782_v8 = vmul.f32 %v6497_v56, %v1760_v48  ;;  %4795 = vrsqrt.f32 %v1735_v33 }
 0x577   : > { %v4786_v58 = vpop.eup %4785  ;;  %v1805_v9 = vadd.f32 %v6504_v7, %v1783_v1  ;;  %v1736_v11 = vadd.f32 1e-05, %v1720_v26  ;;  %v1703_v30 = vpop.xlane.xlu1 %1702 }
 0x578   : > { %v1804_v55 = vadd.f32 %v6504_v7, %v1782_v8  ;;  %v1762_v44 = vmul.f32 %v4786_v58, %v6275_v21  ;;  %v4788_v49 = vpop.eup %4787  ;;  %v1721_v21 = vmul.f32 0.015625, %v1699_v41  ;;  %v1701_v52 = vpop.xlane.xlu0 %1700 }
 0x579   : > { %v1763_v17 = vmul.f32 %v4788_v49, %v6269_v16  ;;  %4797 = vrsqrt.f32 %v1736_v11  ;;  %v1722_v63 = vmul.f32 0.015625, %v1701_v52 }
 0x57a   : > { %2351 = vmatmul.mubr.f32.vlgmr.msra.gmra.mrb[16].mxu0 %v1804_v55  ;;  %2512 = vmatmul.mubr.f32.vlgmr.msra.gmra.mrb[16].mxu1 %v1804_v55  ;;  %v1784_v50 = vmul.f32 %v6497_v56, %v1762_v44  ;;  %v1737_v16 = vadd.f32 1e-05, %v1721_v21 }
 0x57b   : > { %2356 = vmatprep.mubr.f32.mxu0 %v5078_v38  ;;  %2517 = vmatprep.mubr.f32.mxu1 %v5078_v38  ;;  %v4790_v4 = vpop.eup %4789  ;;  %v1785_v59 = vmul.f32 %v6497_v56, %v1763_v17  ;;  %v1738_v20 = vadd.f32 1e-05, %v1722_v63  ;;  %v1707_v55 = vpop.xlane.xlu1 %1706 }
 0x57c   : > { %v1806_v51 = vadd.f32 %v6504_v7, %v1784_v50  ;;  %v1764_v45 = vmul.f32 %v4790_v4, %v6291_v36  ;;  %v4792_v34 = vpop.eup %4791  ;;  %4799 = vrsqrt.f32 %v1737_v16  ;;  %v1723_v36 = vmul.f32 0.015625, %v1703_v30  ;;  %v1705_v2 = vpop.xlane.xlu0 %1704 }
 0x57d   : > { %v1807_v31 = vadd.f32 %v6504_v7, %v1785_v59  ;;  %v1765_v15 = vmul.f32 %v4792_v34, %v6285_v24  ;;  %4801 = vrsqrt.f32 %v1738_v20  ;;  %v1724_v6 = vmul.f32 0.015625, %v1705_v2 }
 0x57e   : > { %2357 = vmatmul.mubr.f32.gmra.mrb[18].mxu0 %v1805_v9  ;;  %2518 = vmatmul.mubr.f32.gmra.mrb[18].mxu1 %v1805_v9  ;;  %v1786_v32 = vmul.f32 %v6497_v56, %v1764_v45  ;;  %v1739_v24 = vadd.f32 1e-05, %v1723_v36 }
 0x57f   : > { %2362 = vmatprep.mubr.f32.mxu0 %v5078_v38  ;;  %2523 = vmatprep.mubr.f32.mxu1 %v5078_v38  ;;  %v4794_v48 = vpop.eup %4793  ;;  %v1787_v58 = vmul.f32 %v6497_v56, %v1765_v15  ;;  %v1740_v26 = vadd.f32 1e-05, %v1724_v6  ;;  %v1711_v11 = vpop.xlane.xlu1 %1710 }
 0x580   : > { %v1808_v8 = vadd.f32 %v6504_v7, %v1786_v32  ;;  %v1766_v60 = vmul.f32 %v4794_v48, %v6307_v25  ;;  %v4796_v39 = vpop.eup %4795  ;;  %4803 = vrsqrt.f32 %v1739_v24  ;;  %v1725_v25 = vmul.f32 0.015625, %v1707_v55  ;;  %v1709_v41 = vpop.xlane.xlu0 %1708 }
 0x581   : > { %v1809_v1 = vadd.f32 %v6504_v7, %v1787_v58  ;;  %v1767_v49 = vmul.f32 %v4796_v39, %v6301_v54  ;;  %4805 = vrsqrt.f32 %v1740_v26  ;;  %v1726_v21 = vmul.f32 0.015625, %v1709_v41  ;;  %v6589_v26 = vld [vmem:[%s7680_s15] sm:$0xf] }
 0x582   : > { %2363 = vmatmul.mubr.f32.gmra.mrb[20].mxu0 %v1806_v51  ;;  %2524 = vmatmul.mubr.f32.gmra.mrb[20].mxu1 %v1806_v51  ;;  %v1788_v44 = vmul.f32 %v6497_v56, %v1766_v60  ;;  %v1741_v54 = vadd.f32 1e-05, %v1725_v25 }
 0x583   : > { %2368 = vmatprep.mubr.f32.mxu0 %v5078_v38  ;;  %2529 = vmatprep.mubr.f32.mxu1 %v5078_v38  ;;  %v4798_v33 = vpop.eup %4797  ;;  %v1789_v50 = vmul.f32 %v6497_v56, %v1767_v49  ;;  %v1742_v34 = vadd.f32 1e-05, %v1726_v21 }
 0x584   : > { %v1810_v9 = vadd.f32 %v6504_v7, %v1788_v44  ;;  %v1768_v17 = vmul.f32 %v4798_v33, %v6323_v46  ;;  %4807 = vrsqrt.f32 %v1741_v54  ;;  %v1727_v46 = vmul.f32 0.015625, %v1711_v11 }
 0x585   : > { %v1811_v52 = vadd.f32 %v6504_v7, %v1789_v50  ;;  %4809 = vrsqrt.f32 %v1742_v34 }
 0x586   : > { %2369 = vmatmul.mubr.f32.gmra.mrb[22].mxu0 %v1807_v31  ;;  %2530 = vmatmul.mubr.f32.gmra.mrb[22].mxu1 %v1807_v31  ;;  %v4800_v4 = vpop.eup %4799  ;;  %v1790_v51 = vmul.f32 %v6497_v56, %v1768_v17 }
 0x587   : > { %2374 = vmatprep.mubr.f32.mxu0 %v5078_v38  ;;  %2535 = vmatprep.mubr.f32.mxu1 %v5078_v38  ;;  %v1769_v59 = vmul.f32 %v4800_v4, %v6317_v42  ;;  %v4802_v45 = vpop.eup %4801  ;;  %v1743_v42 = vadd.f32 1e-05, %v1727_v46 }
 0x588   : > { %v1812_v16 = vadd.f32 %v6504_v7, %v1790_v51  ;;  %v1770_v30 = vmul.f32 %v4802_v45, %v6354_v10 }
 0x589   : > { %v1791_v63 = vmul.f32 %v6497_v56, %v1769_v59  ;;  %4811 = vrsqrt.f32 %v1743_v42 }
 0x58a   : > { %2375 = vmatmul.mubr.f32.gmra.mrb[24].mxu0 %v1808_v8  ;;  %2536 = vmatmul.mubr.f32.gmra.mrb[24].mxu1 %v1808_v8  ;;  %v4804_v31 = vpop.eup %4803  ;;  %v1792_v15 = vmul.f32 %v6497_v56, %v1770_v30 }
 0x58b   : > { %2380 = vmatprep.mubr.f32.mxu0 %v5078_v38  ;;  %2541 = vmatprep.mubr.f32.mxu1 %v5078_v38  ;;  %v1813_v32 = vadd.f32 %v6504_v7, %v1791_v63  ;;  %v1771_v48 = vmul.f32 %v4804_v31, %v6345_v12  ;;  %v4806_v36 = vpop.eup %4805 }
 0x58c   : > { %v1814_v10 = vadd.f32 %v6504_v7, %v1792_v15  ;;  %v1772_v2 = vmul.f32 %v4806_v36, %v6389_v53 }
 0x58d   : > { %v1793_v20 = vmul.f32 %v6497_v56, %v1771_v48 }
 0x58e   : > { %2381 = vmatmul.mubr.f32.gmra.mrb[26].mxu0 %v1809_v1  ;;  %2542 = vmatmul.mubr.f32.gmra.mrb[26].mxu1 %v1809_v1  ;;  %v4808_v8 = vpop.eup %4807  ;;  %v1794_v58 = vmul.f32 %v6497_v56, %v1772_v2 }
 0x58f   : > { %2386 = vmatprep.mubr.f32.mxu0 %v5078_v38  ;;  %2547 = vmatprep.mubr.f32.mxu1 %v5078_v38  ;;  %v1815_v12 = vadd.f32 %v6504_v7, %v1793_v20  ;;  %v1773_v60 = vmul.f32 %v4808_v8, %v6379_v43  ;;  %v4810_v39 = vpop.eup %4809 }
 0x590   : > { %v1816_v53 = vadd.f32 %v6504_v7, %v1794_v58  ;;  %v1774_v6 = vmul.f32 %v4810_v39, %v6424_v19 }
 0x591   : > { %v1795_v24 = vmul.f32 %v6497_v56, %v1773_v60 }
 0x592   : > { %2387 = vmatmul.mubr.f32.gmra.mrb[28].mxu0 %v1810_v9  ;;  %2548 = vmatmul.mubr.f32.gmra.mrb[28].mxu1 %v1810_v9  ;;  %v1796_v1 = vmul.f32 %v6497_v56, %v1774_v6 }
 0x593   : > { %2392 = vmatprep.mubr.f32.mxu0 %v5078_v38  ;;  %2553 = vmatprep.mubr.f32.mxu1 %v5078_v38  ;;  %v4812_v55 = vpop.eup %4811  ;;  %v1817_v43 = vadd.f32 %v6504_v7, %v1795_v24 }
 0x594   : > { %v1775_v44 = vmul.f32 %v4812_v55, %v6414_v28  ;;  %v1818_v19 = vadd.f32 %v6504_v7, %v1796_v1  ;;  %v6583_v28 = vshrl.u32 %v800_v22, 7 }
 0x596   : > { %2393 = vmatmul.mubr.f32.gmra.mrb[30].mxu0 %v1811_v52  ;;  %2554 = vmatmul.mubr.f32.gmra.mrb[30].mxu1 %v1811_v52  ;;  %v1797_v49 = vmul.f32 %v6497_v56, %v1775_v44  ;;  %v2612_v25 = vsub.s32 0, %v6583_v28  ;;  %v2616_v56 = vsub.s32 1, %v6583_v28 }
 0x597   : > { %2398 = vmatprep.mubr.f32.mxu0 %v5078_v38  ;;  %2559 = vmatprep.mubr.f32.mxu1 %v5078_v38 }
 0x598   : > { %v1819_v33 = vadd.f32 %v6504_v7, %v1797_v49  ;;  %v6593_v41 = vrot.slane %v6589_v26, %v2612_v25 }
 0x59a   : > { %2399 = vmatmul.mubr.f32.gmra.mrb[32].mxu0 %v1812_v16  ;;  %2560 = vmatmul.mubr.f32.gmra.mrb[32].mxu1 %v1812_v16 }
 0x59b   : > { %2404 = vmatprep.mubr.f32.mxu0 %v5078_v38  ;;  %2565 = vmatprep.mubr.f32.mxu1 %v5078_v38 }
 0x59e   : > { %2405 = vmatmul.mubr.f32.gmra.mrb[34].mxu0 %v1813_v32  ;;  %2566 = vmatmul.mubr.f32.gmra.mrb[34].mxu1 %v1813_v32 }
 0x59f   : > { %2410 = vmatprep.mubr.f32.mxu0 %v5078_v38  ;;  %2571 = vmatprep.mubr.f32.mxu1 %v5078_v38 }
 0x5a2   : > { %2411 = vmatmul.mubr.f32.gmra.mrb[36].mxu0 %v1814_v10  ;;  %2572 = vmatmul.mubr.f32.gmra.mrb[36].mxu1 %v1814_v10 }
 0x5a3   : > { %2416 = vmatprep.mubr.f32.mxu0 %v5078_v38  ;;  %2577 = vmatprep.mubr.f32.mxu1 %v5078_v38 }
 0x5a6   : > { %2417 = vmatmul.mubr.f32.gmra.mrb[38].mxu0 %v1815_v12  ;;  %2578 = vmatmul.mubr.f32.gmra.mrb[38].mxu1 %v1815_v12 }
 0x5a7   : > { %2422 = vmatprep.mubr.f32.mxu0 %v5078_v38  ;;  %2583 = vmatprep.mubr.f32.mxu1 %v5078_v38 }
 0x5aa   : > { %2423 = vmatmul.mubr.f32.gmra.mrb[40].mxu0 %v1816_v53  ;;  %2584 = vmatmul.mubr.f32.gmra.mrb[40].mxu1 %v1816_v53 }
 0x5ab   : > { %2428 = vmatprep.mubr.f32.mxu0 %v5078_v38  ;;  %2589 = vmatprep.mubr.f32.mxu1 %v5078_v38 }
 0x5ae   : > { %2429 = vmatmul.mubr.f32.gmra.mrb[42].mxu0 %v1817_v43  ;;  %2590 = vmatmul.mubr.f32.gmra.mrb[42].mxu1 %v1817_v43 }
 0x5af   : > { %2434 = vmatprep.mubr.f32.mxu0 %v5078_v38  ;;  %2595 = vmatprep.mubr.f32.mxu1 %v5078_v38 }
 0x5b2   : > { %2435 = vmatmul.mubr.f32.gmra.mrb[44].mxu0 %v1818_v19  ;;  %2596 = vmatmul.mubr.f32.gmra.mrb[44].mxu1 %v1818_v19 }
 0x5b3   : > { %2440 = vmatprep.mubr.f32.mxu0 %v5078_v38  ;;  %2601 = vmatprep.mubr.f32.mxu1 %v5078_v38  ;;  %v6596_v38 = vrot.slane %v6589_v26, %v2616_v56 }
 0x5b6   : > { %2441 = vmatmul.mubr.f32.gmra.mrb[46].mxu0 %v1819_v33  ;;  %2602 = vmatmul.mubr.f32.gmra.mrb[46].mxu1 %v1819_v33  ;;  %v2624_v33 = vsub.s32 3, %v6583_v28 }
 0x64d   : > { %v2352_v7 = vpop.f32.mrb[16].mxu0  ;;  %v6598_v9 = vpop.f32.mrb[16].mxu1 }
 0x64e   : > { %v2630_v22 = vadd.f32 %v6593_v41, %v2352_v7  ;;  %v2354_v50 = vpop.f32.mrb[17].mxu0  ;;  %v6601_v17 = vpop.f32.mrb[17].mxu1 }
 0x64f   : > { %v2631_v4 = vadd.f32 %v6596_v38, %v2354_v50 }
 0x650   : > { %v4103_v54 = vmul.f32 -1.442695, %v2630_v22 }
 0x651   : > { %v2358_v21 = vpop.f32.mrb[18].mxu0  ;;  %v6604_v11 = vpop.f32.mrb[18].mxu1  ;;  %v4119_v45 = vmul.f32 -1.442695, %v2631_v4 }
 0x652   : > { %4813 = vpow2.f32 %v4103_v54  ;;  %v2634_v52 = vadd.f32 %v6593_v41, %v2358_v21  ;;  %v2360_v51 = vpop.f32.mrb[19].mxu0  ;;  %v6607_v59 = vpop.f32.mrb[19].mxu1  ;;  %v2620_v54 = vsub.s32 2, %v6583_v28 }
 0x653   : > { %v2635_v34 = vadd.f32 %v6596_v38, %v2360_v51 }
 0x654   : > { %v4104_v46 = vmul.f32 -1.442695, %v2634_v52 }
 0x655   : > { %v2364_v16 = vpop.f32.mrb[20].mxu0  ;;  %v6610_v63 = vpop.f32.mrb[20].mxu1  ;;  %v4120_v15 = vmul.f32 -1.442695, %v2635_v34 }
 0x656   : > { %4815 = vpow2.f32 %v4104_v46  ;;  %v2638_v30 = vadd.f32 %v6593_v41, %v2364_v16  ;;  %v2366_v31 = vpop.f32.mrb[21].mxu0  ;;  %v6613_v42 = vpop.f32.mrb[21].mxu1  ;;  %v6637_v16 = vrot.slane %v6589_v26, %v2624_v33 }
 0x657   : > { %4817 = vpow2.f32 %v4119_v45  ;;  %v2639_v32 = vadd.f32 %v6596_v38, %v2366_v31 }
 0x658   : > { %v4105_v48 = vmul.f32 -1.442695, %v2638_v30 }
 0x659   : > { %v4121_v36 = vmul.f32 -1.442695, %v2639_v32  ;;  %v2370_v10 = vpop.f32.mrb[22].mxu0  ;;  %v6616_v20 = vpop.f32.mrb[22].mxu1 }
 0x65a   : > { %4819 = vpow2.f32 %v4105_v48  ;;  %v2642_v2 = vadd.f32 %v6593_v41, %v2370_v10  ;;  %v2372_v8 = vpop.f32.mrb[23].mxu0  ;;  %v6619_v12 = vpop.f32.mrb[23].mxu1 }
 0x65b   : > { %v2643_v58 = vadd.f32 %v6596_v38, %v2372_v8  ;;  %4821 = vpow2.f32 %v4120_v15 }
 0x65c   : > { %v4814_v60 = vpop.eup %4813  ;;  %v4106_v39 = vmul.f32 -1.442695, %v2642_v2  ;;  %4823 = vpow2.f32 %v4121_v36  ;;  %v6642_v36 = vrot.slane %v6589_v26, %v2620_v54 }
 0x65d   : > { %v2742_v53 = vadd.f32 1.0, %v4814_v60  ;;  %v4122_v24 = vmul.f32 -1.442695, %v2643_v58  ;;  %v2376_v6 = vpop.f32.mrb[24].mxu0  ;;  %v6622_v55 = vpop.f32.mrb[24].mxu1 }
 0x65e   : > { %4825 = vpow2.f32 %v4106_v39  ;;  %v2646_v43 = vadd.f32 %v6593_v41, %v2376_v6  ;;  %v2378_v1 = vpop.f32.mrb[25].mxu0  ;;  %v6625_v44 = vpop.f32.mrb[25].mxu1  ;;  %v2632_v33 = vadd.f32 %v6642_v36, %v6598_v9 }
 0x65f   : > { %4827 = vrcp.f32 %v2742_v53  ;;  %v2647_v19 = vadd.f32 %v6596_v38, %v2378_v1  ;;  %v2633_v53 = vadd.f32 %v6637_v16, %v6601_v17 }
 0x660   : > { %v4816_v49 = vpop.eup %4815  ;;  %v4107_v25 = vmul.f32 -1.442695, %v2646_v43  ;;  %4829 = vpow2.f32 %v4122_v24 }
 0x661   : > { %v4818_v56 = vpop.eup %4817  ;;  %v2743_v7 = vadd.f32 1.0, %v4816_v49  ;;  %v4123_v22 = vmul.f32 -1.442695, %v2647_v19  ;;  %v2382_v50 = vpop.f32.mrb[26].mxu0 }
 0x662   : > { %v6629_v4 = vpop.f32.mrb[26].mxu1  ;;  %4831 = vpow2.f32 %v4107_v25  ;;  %v2650_v21 = vadd.f32 %v6593_v41, %v2382_v50  ;;  %v2384_v52 = vpop.f32.mrb[27].mxu0  ;;  %v2838_v34 = vadd.f32 1.0, %v4818_v56 }
 0x663   : > { %v6633_v51 = vpop.f32.mrb[27].mxu1  ;;  %4833 = vrcp.f32 %v2743_v7  ;;  %v2651_v45 = vadd.f32 %v6596_v38, %v2384_v52  ;;  %v2637_v52 = vadd.f32 %v6637_v16, %v6607_v59 }
 0x664   : > { %v4820_v46 = vpop.eup %4819  ;;  %v4108_v30 = vmul.f32 -1.442695, %v2650_v21  ;;  %4835 = vpow2.f32 %v4123_v22 }
 0x665   : > { %v2744_v31 = vadd.f32 1.0, %v4820_v46  ;;  %v4124_v32 = vmul.f32 -1.442695, %v2651_v45  ;;  %v2388_v15 = vpop.f32.mrb[28].mxu0  ;;  %v6639_v28 = vpop.f32.mrb[28].mxu1 }
 0x666   : > { %v4822_v48 = vpop.eup %4821  ;;  %4837 = vpow2.f32 %v4108_v30  ;;  %v2654_v10 = vadd.f32 %v6593_v41, %v2388_v15  ;;  %v2390_v2 = vpop.f32.mrb[29].mxu0 }
 0x667   : > { %v6645_v8 = vpop.f32.mrb[29].mxu1  ;;  %v4824_v58 = vpop.eup %4823  ;;  %4839 = vrcp.f32 %v2744_v31  ;;  %v2655_v60 = vadd.f32 %v6596_v38, %v2390_v2  ;;  %v2839_v43 = vadd.f32 1.0, %v4822_v48 }
 0x668   : > { %v4826_v39 = vpop.eup %4825  ;;  %4841 = vrcp.f32 %v2838_v34  ;;  %v4109_v24 = vmul.f32 -1.442695, %v2654_v10  ;;  %v2840_v50 = vadd.f32 1.0, %v4824_v58 }
 0x669   : > { %v4828_v6 = vpop.eup %4827  ;;  %v2745_v26 = vadd.f32 1.0, %v4826_v39  ;;  %4843 = vpow2.f32 %v4124_v32  ;;  %v4125_v1 = vmul.f32 -1.442695, %v2655_v60  ;;  %v2394_v19 = vpop.f32.mrb[30].mxu0  ;;  %v2636_v32 = vadd.f32 %v6642_v36, %v6604_v11 }
 0x66a   : > { %v6650_v49 = vpop.f32.mrb[30].mxu1  ;;  %v2886_v25 = vmul.f32 %v4828_v6, %v2633_v53  ;;  %4845 = vpow2.f32 %v4109_v24  ;;  %v2658_v56 = vadd.f32 %v6593_v41, %v2394_v19  ;;  %v2396_v7 = vpop.f32.mrb[31].mxu0  ;;  %v2641_v39 = vadd.f32 %v6637_v16, %v6613_v42 }
 0x66b   : > { %v6655_v22 = vpop.f32.mrb[31].mxu1  ;;  %v4830_v17 = vpop.eup %4829  ;;  %4847 = vrcp.f32 %v2745_v26  ;;  %v2659_v34 = vadd.f32 %v6596_v38, %v2396_v7  ;;  %v2640_v24 = vadd.f32 %v6642_v36, %v6610_v63  ;;  %v2645_v42 = vadd.f32 %v6637_v16, %v6619_v12 }
 0x66c   : > { %v4832_v54 = vpop.eup %4831  ;;  %v2902_v21 = vadd.f32 %v2886_v25, %v2632_v33  ;;  %4849 = vpow2.f32 %v4125_v1  ;;  %v4110_v9 = vmul.f32 -1.442695, %v2658_v56  ;;  %v2841_v59 = vadd.f32 1.0, %v4830_v17 }
 0x66d   : > { %v4834_v45 = vpop.eup %4833  ;;  %4851 = vrcp.f32 %v2839_v43  ;;  %v2746_v46 = vadd.f32 1.0, %v4832_v54  ;;  %v2400_v30 = vpop.f32.mrb[32].mxu0  ;;  %v4126_v11 = vmul.f32 -1.442695, %v2659_v34  ;;  %v2644_v33 = vadd.f32 %v6642_v36, %v6616_v20 }
 0x66e   : > { %v6660_v31 = vpop.f32.mrb[32].mxu1  ;;  %4853 = vtanh.f32 %v2902_v21  ;;  %v2887_v15 = vmul.f32 %v4834_v45, %v2637_v52  ;;  %v2402_v48 = vpop.f32.mrb[33].mxu0  ;;  %v2648_v63 = vadd.f32 %v6642_v36, %v6622_v55  ;;  %v2649_v52 = vadd.f32 %v6637_v16, %v6625_v44 }
 0x66f   : > { %v6664_v10 = vpop.f32.mrb[33].mxu1  ;;  %v4836_v2 = vpop.eup %4835  ;;  %4855 = vrcp.f32 %v2840_v50  ;;  %v2662_v50 = vadd.f32 %v6593_v41, %v2400_v30  ;;  %v6685_v20 = vadd.f32 %v6642_v36, %v6629_v4  ;;  %v2653_v44 = vadd.f32 %v6637_v16, %v6633_v51 }
 0x670   : > { %v4838_v58 = vpop.eup %4837  ;;  %v2903_v60 = vadd.f32 %v2887_v15, %v2636_v32  ;;  %4857 = vrcp.f32 %v2746_v46  ;;  %v2842_v17 = vadd.f32 1.0, %v4836_v2  ;;  %v6694_v15 = vadd.f32 %v6642_v36, %v6639_v28 }
 0x671   : > { %v4840_v53 = vpop.eup %4839  ;;  %v2747_v6 = vadd.f32 1.0, %v4838_v58  ;;  %4859 = vpow2.f32 %v4110_v9  ;;  %v2406_v43 = vpop.f32.mrb[34].mxu0  ;;  %v4111_v58 = vmul.f32 -1.442695, %v2662_v50  ;;  %v6701_v51 = vadd.f32 %v6637_v16, %v6645_v8  ;;  %v5069_v8 = vld [vmem:[%s6073_s0] sm:$0xff] }
 0x672   : > { %v6670_v26 = vpop.f32.mrb[34].mxu1  ;;  %v4842_v1 = vpop.eup %4841  ;;  %4861 = vtanh.f32 %v2903_v60  ;;  %v2888_v19 = vmul.f32 %v4840_v53, %v2641_v39  ;;  %v2666_v9 = vadd.f32 %v6593_v41, %v2406_v43  ;;  %v2663_v60 = vadd.f32 %v6596_v38, %v2402_v48 }
 0x673   : > { %v2408_v25 = vpop.f32.mrb[35].mxu0  ;;  %v6676_v56 = vpop.f32.mrb[35].mxu1  ;;  %4863 = vrcp.f32 %v2841_v59  ;;  %v2934_v39 = vsub.f32 1.0, %v4842_v1 }
 0x674   : > { %v4844_v7 = vpop.eup %4843  ;;  %v2904_v21 = vadd.f32 %v2888_v19, %v2640_v24  ;;  %4865 = vrcp.f32 %v2747_v6 }
 0x675   : > { %v4846_v54 = vpop.eup %4845  ;;  %v2843_v45 = vadd.f32 1.0, %v4844_v7  ;;  %4867 = vpow2.f32 %v4126_v11  ;;  %v2412_v55 = vpop.f32.mrb[36].mxu0  ;;  %v4112_v11 = vmul.f32 -1.442695, %v2666_v9 }
 0x676   : > { %v4848_v12 = vpop.eup %4847  ;;  %v2748_v46 = vadd.f32 1.0, %v4846_v54  ;;  %v6688_v34 = vpop.f32.mrb[36].mxu1  ;;  %4869 = vtanh.f32 %v2904_v21  ;;  %v2670_v43 = vadd.f32 %v6593_v41, %v2412_v55  ;;  %v2966_v54 = vmul.f32 %v5069_v8, %v4842_v1 }
 0x677   : > { %v4850_v30 = vpop.eup %4849  ;;  %v2889_v32 = vmul.f32 %v4848_v12, %v2645_v42  ;;  %v2414_v4 = vpop.f32.mrb[37].mxu0  ;;  %4871 = vrcp.f32 %v2842_v17 }
 0x678   : > { %v6696_v2 = vpop.f32.mrb[37].mxu1  ;;  %v4852_v59 = vpop.eup %4851  ;;  %4873 = vrcp.f32 %v2748_v46  ;;  %v2844_v6 = vadd.f32 1.0, %v4850_v30  ;;  %v4127_v46 = vmul.f32 -1.442695, %v2663_v60  ;;  %v2671_v9 = vadd.f32 %v6596_v38, %v2414_v4 }
 0x679   : > { %v4854_v53 = vpop.eup %4853  ;;  %v2905_v24 = vadd.f32 %v2889_v32, %v2644_v33  ;;  %4875 = vrcp.f32 %v2843_v45  ;;  %v2418_v19 = vpop.f32.mrb[38].mxu0  ;;  %v2667_v33 = vadd.f32 %v6596_v38, %v2408_v25  ;;  %v2935_v21 = vsub.f32 1.0, %v4852_v59 }
 0x67a   : > { %v6703_v28 = vpop.eup %4855  ;;  %v6706_v42 = vpop.f32.mrb[38].mxu1  ;;  %v2950_v48 = vmul.f32 %v4854_v53, %v2934_v39  ;;  %v2674_v30 = vadd.f32 %v6593_v41, %v2418_v19  ;;  %v4113_v53 = vmul.f32 -1.442695, %v2670_v43  ;;  %v6726_v4 = vadd.f32 %v6642_v36, %v6650_v49 }
 0x67b   : > { %v4858_v7 = vpop.eup %4857  ;;  %4877 = vtanh.f32 %v2905_v24  ;;  %v2420_v17 = vpop.f32.mrb[39].mxu0  ;;  %v4128_v60 = vmul.f32 -1.442695, %v2667_v33  ;;  %v4129_v49 = vmul.f32 -1.442695, %v2671_v9 }
 0x67c   : > { %v6709_v50 = vpop.f32.mrb[39].mxu1  ;;  %v4860_v12 = vpop.eup %4859  ;;  %v2890_v45 = vmul.f32 %v4858_v7, %v2649_v52  ;;  %4879 = vpow2.f32 %v4111_v58  ;;  %v6720_v32 = vadd.f32 %v2966_v54, %v2950_v48  ;;  %v2675_v48 = vadd.f32 %v6596_v38, %v2420_v17 }
 0x67d   : > { %v4862_v55 = vpop.eup %4861  ;;  %4881 = vrcp.f32 %v2844_v6  ;;  %v2749_v25 = vadd.f32 1.0, %v4860_v12  ;;  %v2424_v24 = vpop.f32.mrb[40].mxu0  ;;  %v2936_v7 = vsub.f32 1.0, %v6703_v28  ;;  %v4114_v33 = vmul.f32 -1.442695, %v2674_v30 }
 0x67e   : > { %v4864_v1 = vpop.eup %4863  ;;  %v2906_v39 = vadd.f32 %v2890_v45, %v2648_v63  ;;  %4883 = vpow2.f32 %v4112_v11  ;;  %v6722_v8 = vpop.f32.mrb[40].mxu1  ;;  %v2951_v52 = vmul.f32 %v4862_v55, %v2935_v21  ;;  %3016 = vadd.xlane.f32.xlu0 %v6720_v32  ;;  %2998 = vst [vmem:[%s6716_s28] sm:$0xff] %v6720_v32  ;;  %v2967_v63 = vmul.f32 %v4852_v59, %v6122_v40 }
 0x67f   : > { %v4866_v58 = vpop.eup %4865  ;;  %4885 = vrcp.f32 %v2749_v25  ;;  %v2426_v6 = vpop.f32.mrb[41].mxu0  ;;  %v2678_v40 = vadd.f32 %v6593_v41, %v2424_v24  ;;  %v4130_v24 = vmul.f32 -1.442695, %v2675_v48 }
 0x680   : > { %v6731_v19 = vpop.f32.mrb[41].mxu1  ;;  %v4868_v11 = vpop.eup %4867  ;;  %4887 = vtanh.f32 %v2906_v39  ;;  %v2891_v43 = vmul.f32 %v4866_v58, %v2653_v44  ;;  %v6736_v21 = vadd.f32 %v2967_v63, %v2951_v52  ;;  %v2937_v52 = vsub.f32 1.0, %v4864_v1 }
 0x681   : > { %v4870_v54 = vpop.eup %4869  ;;  %4889 = vpow2.f32 %v4127_v46  ;;  %v2430_v59 = vpop.f32.mrb[42].mxu0  ;;  %v2845_v25 = vadd.f32 1.0, %v4868_v11  ;;  %v2661_v46 = vadd.f32 %v6637_v16, %v6655_v22  ;;  %v2679_v22 = vadd.f32 %v6596_v38, %v2426_v6 }
 0x682   : > { %v6738_v12 = vpop.eup %4871  ;;  %v2907_v45 = vadd.f32 %v2891_v43, %v6685_v20  ;;  %4891 = vpow2.f32 %v4113_v53  ;;  %v6742_v44 = vpop.f32.mrb[42].mxu1  ;;  %v2952_v17 = vmul.f32 %v4870_v54, %v2936_v7  ;;  %3018 = vadd.xlane.f32.xlu0 %v6736_v21  ;;  %2999 = vst [vmem:[%s6716_s28 + $0x8] sm:$0xff] %v6736_v21  ;;  %v2968_v20 = vmul.f32 %v6703_v28, %v6154_v3 }
 0x683   : > { %v4874_v55 = vpop.eup %4873  ;;  %4893 = vpow2.f32 %v4128_v60  ;;  %v2432_v9 = vpop.f32.mrb[43].mxu0  ;;  %v2969_v63 = vmul.f32 %v4864_v1, %v6173_v18  ;;  %v4115_v3 = vmul.f32 -1.442695, %v2678_v40 }
 0x684   : > { %v6749_v30 = vpop.f32.mrb[43].mxu1  ;;  %v6753_v39 = vpop.eup %4875  ;;  %4895 = vtanh.f32 %v2907_v45  ;;  %v2892_v53 = vmul.f32 %v4874_v55, %v6701_v51  ;;  %v6757_v60 = vadd.f32 %v2968_v20, %v2952_v17  ;;  %v2938_v20 = vsub.f32 1.0, %v6738_v12 }
 0x685   : > { %v4878_v58 = vpop.eup %4877  ;;  %4897 = vpow2.f32 %v4129_v49  ;;  %v2436_v28 = vpop.f32.mrb[44].mxu0 }
 0x686   : > { %v4880_v11 = vpop.eup %4879  ;;  %v2908_v43 = vadd.f32 %v2892_v53, %v6694_v15  ;;  %4899 = vpow2.f32 %v4114_v33  ;;  %v2597_v7 = vpop.f32.mrb[44].mxu1  ;;  %v2953_v54 = vmul.f32 %v4878_v58, %v2937_v52  ;;  %3020 = vadd.xlane.f32.xlu0 %v6757_v60  ;;  %3000 = vst [vmem:[%s6716_s28 + $0x10] sm:$0xff] %v6757_v60  ;;  %v2686_v6 = vadd.f32 %v6593_v41, %v2436_v28 }
 0x687   : > { %v6761_v51 = vpop.eup %4881  ;;  %4901 = vrcp.f32 %v2845_v25  ;;  %v2750_v48 = vadd.f32 1.0, %v4880_v11  ;;  %v6768_v18 = vadd.f32 %v6642_v36, %v2597_v7  ;;  %v2438_v1 = vpop.f32.mrb[45].mxu0  ;;  %v2682_v33 = vadd.f32 %v6593_v41, %v2430_v59 }
 0x688   : > { %v2599_v15 = vpop.f32.mrb[45].mxu1  ;;  %v4884_v49 = vpop.eup %4883  ;;  %4903 = vtanh.f32 %v2908_v43  ;;  %v6772_v45 = vadd.f32 %v6596_v38, %v2438_v1  ;;  %v6777_v25 = vadd.f32 %v2969_v63, %v2953_v54  ;;  %v4131_v58 = vmul.f32 -1.442695, %v2679_v22 }
 0x689   : > { %v6775_v40 = vadd.f32 %v6637_v16, %v2599_v15  ;;  %v4886_v17 = vpop.eup %4885  ;;  %4905 = vrcp.f32 %v2750_v48  ;;  %v2751_v55 = vadd.f32 1.0, %v4884_v49  ;;  %v2683_v59 = vadd.f32 %v6596_v38, %v2432_v9  ;;  %v2442_v11 = vpop.f32.mrb[46].mxu0 }
 0x68a   : > { %v4888_v53 = vpop.eup %4887  ;;  %v2893_v52 = vmul.f32 %v4886_v17, %v2661_v46  ;;  %4907 = vpow2.f32 %v4130_v24  ;;  %v2603_v43 = vpop.f32.mrb[46].mxu1  ;;  %3022 = vadd.xlane.f32.xlu0 %v6777_v25  ;;  %3001 = vst [vmem:[%s6716_s28 + $0x18] sm:$0xff] %v6777_v25  ;;  %v6785_v7 = vadd.f32 %v6593_v41, %v2442_v11  ;;  %v2970_v1 = vmul.f32 %v6738_v12, %v6192_v37 }
 0x68b   : > { %v4890_v28 = vpop.eup %4889  ;;  %4909 = vrcp.f32 %v2751_v55  ;;  %v6788_v63 = vadd.f32 %v6642_v36, %v2603_v43  ;;  %v2444_v54 = vpop.f32.mrb[47].mxu0  ;;  %v2954_v24 = vmul.f32 %v4888_v53, %v2938_v20  ;;  %v4116_v41 = vmul.f32 -1.442695, %v2682_v33 }
 0x68c   : > { %v2605_v46 = vpop.f32.mrb[47].mxu1  ;;  %v4892_v22 = vpop.eup %4891  ;;  %v2909_v9 = vadd.f32 %v2893_v52, %v6726_v4  ;;  %4911 = vpow2.f32 %v4115_v3  ;;  %v6792_v48 = vadd.f32 %v6596_v38, %v2444_v54  ;;  %v2939_v55 = vsub.f32 1.0, %v6753_v39 }
 0x68d   : > { %v4894_v15 = vpop.eup %4893  ;;  %v2752_v49 = vadd.f32 1.0, %v4892_v22  ;;  %v6797_v17 = vadd.f32 %v6637_v16, %v2605_v46  ;;  %v2846_v53 = vadd.f32 1.0, %v4890_v28  ;;  %v6800_v4 = vadd.f32 %v2970_v1, %v2954_v24 }
 0x68e   : > { %v4896_v20 = vpop.eup %4895  ;;  %4913 = vtanh.f32 %v2909_v9  ;;  %v2971_v37 = vmul.f32 %v6753_v39, %v6205_v35  ;;  %v2847_v52 = vadd.f32 1.0, %v4894_v15  ;;  %v4132_v33 = vmul.f32 -1.442695, %v2683_v59 }
 0x68f   : > { %v4898_v3 = vpop.eup %4897  ;;  %4915 = vpow2.f32 %v4131_v58  ;;  %v2955_v38 = vmul.f32 %v4896_v20, %v2939_v55  ;;  %3024 = vadd.xlane.f32.xlu0 %v6800_v4  ;;  %3002 = vst [vmem:[%s6716_s28 + $0x20] sm:$0xff] %v6800_v4  ;;  %v2940_v58 = vsub.f32 1.0, %v6761_v51  ;;  %v2665_v35 = vadd.f32 %v6637_v16, %v6664_v10 }
 0x690   : > { %v4900_v12 = vpop.eup %4899  ;;  %4917 = vrcp.f32 %v2752_v49  ;;  %v4117_v39 = vmul.f32 -1.442695, %v2686_v6  ;;  %v2848_v24 = vadd.f32 1.0, %v4898_v3  ;;  %v2972_v22 = vmul.f32 %v6761_v51, %v6212_v62 }
 0x691   : > { %v4902_v11 = vpop.eup %4901  ;;  %v2753_v43 = vadd.f32 1.0, %v4900_v12  ;;  %4919 = vpow2.f32 %v4116_v41  ;;  %v6807_v28 = vadd.f32 %v2971_v37, %v2955_v38  ;;  %v2664_v1 = vadd.f32 %v6642_v36, %v6660_v31 }
 0x692   : > { %v4904_v54 = vpop.eup %4903  ;;  %4921 = vrcp.f32 %v2846_v53  ;;  %v2669_v10 = vadd.f32 %v6637_v16, %v6676_v56  ;;  %v2668_v62 = vadd.f32 %v6642_v36, %v6670_v26  ;;  %v2941_v53 = vsub.f32 1.0, %v4902_v11 }
 0x693   : > { %v4906_v46 = vpop.eup %4905  ;;  %4923 = vrcp.f32 %v2753_v43  ;;  %3003 = vst [vmem:[%s6716_s28 + $0x28] sm:$0xff] %v6807_v28  ;;  %v2956_v59 = vmul.f32 %v4904_v54, %v2940_v58  ;;  %3026 = vadd.xlane.f32.xlu0 %v6807_v28  ;;  %v2673_v38 = vadd.f32 %v6637_v16, %v6696_v2  ;;  %v4118_v37 = vmul.f32 -1.442695, %v6785_v7 }
 0x694   : > { %v4908_v9 = vpop.eup %4907  ;;  %v2894_v15 = vmul.f32 %v4906_v46, %v2665_v35  ;;  %4925 = vrcp.f32 %v2847_v52  ;;  %v4133_v26 = vmul.f32 -1.442695, %v6772_v45  ;;  %v2672_v54 = vadd.f32 %v6642_v36, %v6688_v34 }
 0x695   : > { %v4910_v6 = vpop.eup %4909  ;;  %4927 = vpow2.f32 %v4132_v33  ;;  %v6821_v49 = vadd.f32 %v2972_v22, %v2956_v59  ;;  %v2849_v31 = vadd.f32 1.0, %v4908_v9  ;;  %v2973_v33 = vmul.f32 %v4902_v11, %v6219_v47 }
 0x696   : > { %v4912_v41 = vpop.eup %4911  ;;  %v2910_v55 = vadd.f32 %v2894_v15, %v2664_v1  ;;  %v2895_v51 = vmul.f32 %v4910_v6, %v2669_v10  ;;  %4929 = vpow2.f32 %v4117_v39  ;;  %v2677_v39 = vadd.f32 %v6637_v16, %v6709_v50 }
 0x697   : > { %4931 = vrcp.f32 %v2848_v24  ;;  %v2754_v20 = vadd.f32 1.0, %v4912_v41  ;;  %3004 = vst [vmem:[%s6716_s28 + $0x30] sm:$0xff] %v6821_v49  ;;  %3028 = vadd.xlane.f32.xlu0 %v6821_v49  ;;  %v2676_v34 = vadd.f32 %v6642_v36, %v6706_v42  ;;  %v4134_v50 = vmul.f32 -1.442695, %v6792_v48 }
 0x698   : > { %v4914_v56 = vpop.eup %4913  ;;  %4933 = vtanh.f32 %v2910_v55  ;;  %v2911_v3 = vadd.f32 %v2895_v51, %v2668_v62  ;;  %v2681_v55 = vadd.f32 %v6637_v16, %v6731_v19 }
 0x699   : > { %v4916_v12 = vpop.eup %4915  ;;  %4935 = vrcp.f32 %v2754_v20  ;;  %v2957_v52 = vmul.f32 %v4914_v56, %v2941_v53  ;;  %v2680_v53 = vadd.f32 %v6642_v36, %v6722_v8 }
 0x69a   : > { %v4918_v43 = vpop.eup %4917  ;;  %4937 = vtanh.f32 %v2911_v3  ;;  %v2850_v47 = vadd.f32 1.0, %v4916_v12 }
 0x69b   : > { %v4920_v58 = vpop.eup %4919  ;;  %v2896_v35 = vmul.f32 %v4918_v43, %v2673_v38  ;;  %4939 = vrcp.f32 %v2849_v31  ;;  %v6835_v2 = vadd.f32 %v2973_v33, %v2957_v52  ;;  %v2685_v52 = vadd.f32 %v6637_v16, %v6749_v30 }
 0x69c   : > { %v4922_v7 = vpop.eup %4921  ;;  %v2755_v46 = vadd.f32 1.0, %v4920_v58  ;;  %4941 = vpow2.f32 %v4118_v37 }
 0x69d   : > { %v4924_v45 = vpop.eup %4923  ;;  %v2912_v24 = vadd.f32 %v2896_v35, %v2672_v54  ;;  %4943 = vpow2.f32 %v4133_v26  ;;  %3030 = vadd.xlane.f32.xlu0 %v6835_v2  ;;  %3005 = vst [vmem:[%s6716_s28 + $0x38] sm:$0xff] %v6835_v2  ;;  %v2942_v6 = vsub.f32 1.0, %v4922_v7  ;;  %v2974_v62 = vmul.f32 %v4922_v7, %v6226_v27 }
 0x69e   : > { %v4926_v11 = vpop.eup %4925  ;;  %v2897_v59 = vmul.f32 %v4924_v45, %v2677_v39  ;;  %4945 = vrcp.f32 %v2755_v46 }
 0x69f   : > { %v4928_v22 = vpop.eup %4927  ;;  %4947 = vtanh.f32 %v2912_v24  ;;  %v2943_v20 = vsub.f32 1.0, %v4926_v11  ;;  %v2975_v19 = vmul.f32 %v4926_v11, %v6233_v13  ;;  %v2684_v13 = vadd.f32 %v6642_v36, %v6742_v44 }
 0x6a0   : > { %v4930_v9 = vpop.eup %4929  ;;  %v2913_v1 = vadd.f32 %v2897_v59, %v2676_v34  ;;  %4949 = vrcp.f32 %v2850_v47  ;;  %v2851_v51 = vadd.f32 1.0, %v4928_v22 }
 0x6a1   : > { %v4932_v15 = vpop.eup %4931  ;;  %v2756_v10 = vadd.f32 1.0, %v4930_v9 }
 0x6a2   : > { %v4934_v41 = vpop.eup %4933  ;;  %4951 = vtanh.f32 %v2913_v1  ;;  %v2944_v58 = vsub.f32 1.0, %v4932_v15  ;;  %v2976_v30 = vmul.f32 %v4932_v15, %v6240_v57 }
 0x6a3   : > { %v4936_v42 = vpop.eup %4935  ;;  %4953 = vpow2.f32 %v4134_v50  ;;  %v2958_v31 = vmul.f32 %v4934_v41, %v2942_v6 }
 0x6a4   : > { %v4938_v48 = vpop.eup %4937  ;;  %v2898_v56 = vmul.f32 %v4936_v42, %v2681_v55  ;;  %4955 = vrcp.f32 %v2756_v10 }
 0x6a5   : > { %v4940_v3 = vpop.eup %4939  ;;  %v6850_v38 = vadd.f32 %v2974_v62, %v2958_v31  ;;  %v2959_v37 = vmul.f32 %v4938_v48, %v2943_v20  ;;  %4957 = vrcp.f32 %v2851_v51 }
 0x6a6   : > { %v4942_v12 = vpop.eup %4941  ;;  %v2914_v27 = vadd.f32 %v2898_v56, %v2680_v53  ;;  %v2945_v45 = vsub.f32 1.0, %v4940_v3  ;;  %v2977_v44 = vmul.f32 %v4940_v3, %v6348_v61 }
 0x6a7   : > { %v4944_v26 = vpop.eup %4943  ;;  %v2757_v33 = vadd.f32 1.0, %v4942_v12  ;;  %3032 = vadd.xlane.f32.xlu1 %v6850_v38  ;;  %3006 = vst [vmem:[%s6716_s28 + $0x40] sm:$0xff] %v6850_v38  ;;  %v6858_v8 = vadd.f32 %v2975_v19, %v2959_v37 }
 0x6a8   : > { %v4946_v43 = vpop.eup %4945  ;;  %4959 = vtanh.f32 %v2914_v27  ;;  %v2852_v46 = vadd.f32 1.0, %v4944_v26  ;;  %v3253_v27 = vld [vmem:[%s7683_s18 + $0x8] sm:$0xff]  ;;  %v3254_v26 = vld [vmem:[%s7683_s18 + $0x10] sm:$0xff] }
 0x6a9   : > { %v4948_v54 = vpop.eup %4947  ;;  %v2899_v35 = vmul.f32 %v4946_v43, %v2685_v52  ;;  %4961 = vrcp.f32 %v2757_v33  ;;  %3007 = vst [vmem:[%s6716_s28 + $0x48] sm:$0xff] %v6858_v8 }
 0x6aa   : > { %v2960_v16 = vmul.f32 %v4948_v54, %v2944_v58  ;;  %v4950_v7 = vpop.eup %4949 }
 0x6ab   : > { %v2915_v39 = vadd.f32 %v2899_v35, %v2684_v13  ;;  %3034 = vadd.xlane.f32.xlu1 %v6858_v8  ;;  %v2946_v1 = vsub.f32 1.0, %v4950_v7 }
 0x6ac   : > { %v4952_v24 = vpop.eup %4951  ;;  %v6866_v47 = vadd.f32 %v2976_v30, %v2960_v16 }
 0x6ad   : > { %v4954_v11 = vpop.eup %4953  ;;  %4963 = vtanh.f32 %v2915_v39  ;;  %v2961_v36 = vmul.f32 %v4952_v24, %v2945_v45 }
 0x6ae   : > { %v4956_v34 = vpop.eup %4955  ;;  %3008 = vst [vmem:[%s6716_s28 + $0x50] sm:$0xff] %v6866_v47  ;;  %4965 = vrcp.f32 %v2852_v46  ;;  %v2853_v22 = vadd.f32 1.0, %v4954_v11 }
 0x6af   : > { %v2900_v57 = vmul.f32 %v4956_v34, %v6775_v40  ;;  %3036 = vadd.xlane.f32.xlu1 %v6866_v47  ;;  %v6873_v59 = vadd.f32 %v2977_v44, %v2961_v36  ;;  %v4958_v50 = vpop.eup %4957  ;;  %v2978_v40 = vmul.f32 %v4950_v7, %v6383_v29 }
 0x6b0   : > { %v2947_v55 = vsub.f32 1.0, %v4958_v50  ;;  %v2979_v51 = vmul.f32 %v4958_v50, %v6418_v5 }
 0x6b1   : > { %v2916_v9 = vadd.f32 %v2900_v57, %v6768_v18  ;;  %3009 = vst [vmem:[%s6716_s28 + $0x58] sm:$0xff] %v6873_v59 }
 0x6b2   : > { %v4960_v15 = vpop.eup %4959 }
 0x6b3   : > { %v4962_v61 = vpop.eup %4961  ;;  %4967 = vtanh.f32 %v2916_v9  ;;  %3038 = vadd.xlane.f32.xlu1 %v6873_v59  ;;  %v2962_v10 = vmul.f32 %v4960_v15, %v2946_v1 }
 0x6b4   : > { %4969 = vrcp.f32 %v2853_v22  ;;  %v2901_v6 = vmul.f32 %v4962_v61, %v6797_v17 }
 0x6b5   : > { %v6881_v41 = vadd.f32 %v2978_v40, %v2962_v10 }
 0x6b6   : > { %v2917_v18 = vadd.f32 %v2901_v6, %v6788_v63 }
 0x6b7   : > { %v4964_v62 = vpop.eup %4963  ;;  %3040 = vadd.xlane.f32.xlu1 %v6881_v41  ;;  %3010 = vst [vmem:[%s6716_s28 + $0x60] sm:$0xff] %v6881_v41 }
 0x6b8   : > { %4971 = vtanh.f32 %v2917_v18  ;;  %v2963_v42 = vmul.f32 %v4964_v62, %v2947_v55  ;;  %v4966_v31 = vpop.eup %4965  ;;  %v3257_v55 = vld [vmem:[%s7683_s18 + $0x28] sm:$0xff] }
 0x6b9   : > { %v2948_v63 = vsub.f32 1.0, %v4966_v31  ;;  %v2980_v53 = vmul.f32 %v4966_v31, %v6451_v14  ;;  %v3252_v14 = vld [vmem:[%s7683_s18] sm:$0xff] }
 0x6ba   : > { %v6888_v29 = vadd.f32 %v2979_v51, %v2963_v42  ;;  %v4596_v52 = vpack.c.bf16 %v3253_v27, %v3252_v14  ;;  %v3261_v14 = vld [vmem:[%s7683_s18 + $0x48] sm:$0xff]  ;;  %v3262_v27 = vld [vmem:[%s7683_s18 + $0x50] sm:$0xff] }
 0x6bc   : > { %3042 = vadd.xlane.f32.xlu1 %v6888_v29  ;;  %3011 = vst [vmem:[%s6716_s28 + $0x68] sm:$0xff] %v6888_v29  ;;  %4597 = vmatprep.subr.bf16.mxu0 %v4596_v52 }
 0x6bd   : > { %v4968_v17 = vpop.eup %4967  ;;  %4628 = vmatprep.subr.bf16.mxu1 %v4596_v52  ;;  %4599 = vmatpush3.bf16.msra.mxu0 %v4596_v52 }
 0x6be   : > { %v4970_v20 = vpop.eup %4969  ;;  %v2964_v48 = vmul.f32 %v4968_v17, %v2948_v63  ;;  %4636 = vmatpush3.bf16.msra.mxu1 %v4596_v52  ;;  %v3263_v52 = vld [vmem:[%s7683_s18 + $0x58] sm:$0xff] }
 0x6bf   : > { %v2949_v3 = vsub.f32 1.0, %v4970_v20  ;;  %v2981_v19 = vmul.f32 %v4970_v20, %v6482_v0  ;;  %v3255_v0 = vld [vmem:[%s7683_s18 + $0x18] sm:$0xff] }
 0x6c0   : > { %v6894_v56 = vadd.f32 %v2980_v53, %v2964_v48  ;;  %v4600_v33 = vpack.c.bf16 %v3255_v0, %v3254_v26  ;;  %v3258_v53 = vld [vmem:[%s7683_s18 + $0x30] sm:$0xff] }
 0x6c2   : > { %v4972_v37 = vpop.eup %4971  ;;  %3044 = vadd.xlane.f32.xlu1 %v6894_v56  ;;  %3012 = vst [vmem:[%s6716_s28 + $0x70] sm:$0xff] %v6894_v56  ;;  %4601 = vmatprep.subr.bf16.mxu0 %v4600_v33 }
 0x6c3   : > { %v2965_v5 = vmul.f32 %v4972_v37, %v2949_v3  ;;  %4629 = vmatprep.subr.bf16.mxu1 %v4600_v33  ;;  %4603 = vmatpush3.bf16.msra.mxu0 %v4600_v33  ;;  %v3259_v3 = vld [vmem:[%s7683_s18 + $0x38] sm:$0xff] }
 0x6c4   : > { %4637 = vmatpush3.bf16.msra.mxu1 %v4600_v33  ;;  %v4608_v37 = vpack.c.bf16 %v3259_v3, %v3258_v53  ;;  %v4616_v33 = vpack.c.bf16 %v3263_v52, %v3262_v27 }
 0x6c5   : > { %v6900_v12 = vadd.f32 %v2981_v19, %v2965_v5  ;;  %v3260_v19 = vld [vmem:[%s7683_s18 + $0x40] sm:$0xff] }
 0x6c6   : > { %v4612_v26 = vpack.c.bf16 %v3261_v14, %v3260_v19 }
 0x6c7   : > { %3046 = vadd.xlane.f32.xlu1 %v6900_v12  ;;  %3013 = vst [vmem:[%s6716_s28 + $0x78] sm:$0xff] %v6900_v12 }
 0x70b   : > { %v3017_v43 = vpop.xlane.xlu0 %3016 }
 0x70c   : > { %v3048_v58 = vmul.f32 0.015625, %v3017_v43  ;;  %v3264_v43 = vld [vmem:[%s7683_s18 + $0x60] sm:$0xff] }
 0x70e   : > { %v3064_v54 = vsub.f32 %v6720_v32, %v3048_v58  ;;  %v3265_v58 = vld [vmem:[%s7683_s18 + $0x68] sm:$0xff] }
 0x70f   : > { %v3019_v13 = vpop.xlane.xlu0 %3018 }
 0x710   : > { %v6920_v35 = vsel %vm1225_vm1, %v3064_v54, 0.0  ;;  %v3049_v16 = vmul.f32 0.015625, %v3019_v13 }
 0x711   : > { %v3096_v30 = vmul.f32 %v6920_v35, %v6920_v35 }
 0x712   : > { %v3065_v7 = vsub.f32 %v6736_v21, %v3049_v16 }
 0x713   : > { %3112 = vadd.xlane.f32.xlu0 %v3096_v30  ;;  %v3021_v39 = vpop.xlane.xlu0 %3020  ;;  %v4620_v30 = vpack.c.bf16 %v3265_v58, %v3264_v43  ;;  %v7068_v58 = vld [vmem:[%s7681_s16] ss:$0 sm:$0xff] }
 0x714   : > { %v6927_v46 = vsel %vm1225_vm1, %v3065_v7, 0.0  ;;  %v3050_v45 = vmul.f32 0.015625, %v3021_v39  ;;  %v3266_v39 = vld [vmem:[%s7683_s18 + $0x70] sm:$0xff] }
 0x715   : > { %v3097_v32 = vmul.f32 %v6927_v46, %v6927_v46 }
 0x716   : > { %v3066_v24 = vsub.f32 %v6757_v60, %v3050_v45  ;;  %v3267_v45 = vld [vmem:[%s7683_s18 + $0x78] sm:$0xff] }
 0x717   : > { %3114 = vadd.xlane.f32.xlu0 %v3097_v32  ;;  %v3023_v11 = vpop.xlane.xlu0 %3022 }
 0x718   : > { %v6934_v36 = vsel %vm1225_vm1, %v3066_v24, 0.0  ;;  %v3051_v44 = vmul.f32 0.015625, %v3023_v11 }
 0x719   : > { %v3098_v21 = vmul.f32 %v6934_v36, %v6934_v36 }
 0x71a   : > { %v3067_v34 = vsub.f32 %v6777_v25, %v3051_v44  ;;  %v4624_v44 = vpack.c.bf16 %v3267_v45, %v3266_v39 }
 0x71b   : > { %3116 = vadd.xlane.f32.xlu0 %v3098_v21 }
 0x71c   : > { %v6941_v57 = vsel %vm1225_vm1, %v3067_v34, 0.0  ;;  %v3025_v22 = vpop.xlane.xlu0 %3024 }
 0x71d   : > { %v3052_v50 = vmul.f32 0.015625, %v3025_v22  ;;  %v3099_v60 = vmul.f32 %v6941_v57, %v6941_v57 }
 0x71f   : > { %v3068_v9 = vsub.f32 %v6800_v4, %v3052_v50  ;;  %3118 = vadd.xlane.f32.xlu0 %v3099_v60  ;;  %v3256_v4 = vld [vmem:[%s7683_s18 + $0x20] sm:$0xff] }
 0x720   : > { %v3027_v1 = vpop.xlane.xlu0 %3026  ;;  %v4604_v42 = vpack.c.bf16 %v3257_v55, %v3256_v4 }
 0x721   : > { %v6948_v15 = vsel %vm1225_vm1, %v3068_v9, 0.0  ;;  %v3053_v61 = vmul.f32 0.015625, %v3027_v1 }
 0x722   : > { %v3100_v25 = vmul.f32 %v6948_v15, %v6948_v15  ;;  %4605 = vmatprep.subr.bf16.mxu0 %v4604_v42  ;;  %4630 = vmatprep.subr.bf16.mxu1 %v4604_v42 }
 0x723   : > { %v3069_v10 = vsub.f32 %v6807_v28, %v3053_v61  ;;  %4607 = vmatpush3.bf16.msra.mxu0 %v4604_v42  ;;  %4638 = vmatpush3.bf16.msra.mxu1 %v4604_v42 }
 0x724   : > { %3120 = vadd.xlane.f32.xlu0 %v3100_v25  ;;  %v3029_v40 = vpop.xlane.xlu0 %3028  ;;  %4609 = vmatprep.subr.bf16.mxu0 %v4608_v37 }
 0x725   : > { %v6955_v6 = vsel %vm1225_vm1, %v3069_v10, 0.0  ;;  %v3054_v18 = vmul.f32 0.015625, %v3029_v40  ;;  %4631 = vmatprep.subr.bf16.mxu1 %v4608_v37 }
 0x726   : > { %v3101_v62 = vmul.f32 %v6955_v6, %v6955_v6 }
 0x727   : > { %v3070_v28 = vsub.f32 %v6821_v49, %v3054_v18  ;;  %4611 = vmatpush3.bf16.msra.mxu0 %v4608_v37  ;;  %4639 = vmatpush3.bf16.msra.mxu1 %v4608_v37 }
 0x728   : > { %3122 = vadd.xlane.f32.xlu0 %v3101_v62  ;;  %4613 = vmatprep.subr.bf16.mxu0 %v4612_v26 }
 0x729   : > { %v6968_v51 = vsel %vm1225_vm1, %v3070_v28, 0.0  ;;  %4632 = vmatprep.subr.bf16.mxu1 %v4612_v26 }
 0x72a   : > { %v3031_v31 = vpop.xlane.xlu0 %3030  ;;  %v3102_v17 = vmul.f32 %v6968_v51, %v6968_v51 }
 0x72b   : > { %v3055_v63 = vmul.f32 0.015625, %v3031_v31  ;;  %4615 = vmatpush3.bf16.msra.mxu0 %v4612_v26  ;;  %4640 = vmatpush3.bf16.msra.mxu1 %v4612_v26 }
 0x72c   : > { %3124 = vadd.xlane.f32.xlu0 %v3102_v17  ;;  %4617 = vmatprep.subr.bf16.mxu0 %v4616_v33 }
 0x72d   : > { %v3071_v20 = vsub.f32 %v6835_v2, %v3055_v63  ;;  %4633 = vmatprep.subr.bf16.mxu1 %v4616_v33 }
 0x72f   : > { %v6975_v49 = vsel %vm1225_vm1, %v3071_v20, 0.0  ;;  %4619 = vmatpush3.bf16.msra.mxu0 %v4616_v33  ;;  %4641 = vmatpush3.bf16.msra.mxu1 %v4616_v33 }
 0x730   : > { %v3103_v48 = vmul.f32 %v6975_v49, %v6975_v49  ;;  %4621 = vmatprep.subr.bf16.mxu0 %v4620_v30  ;;  %4634 = vmatprep.subr.bf16.mxu1 %v4620_v30 }
 0x732   : > { %3126 = vadd.xlane.f32.xlu0 %v3103_v48 }
 0x733   : > { %4623 = vmatpush3.bf16.msra.mxu0 %v4620_v30  ;;  %4642 = vmatpush3.bf16.msra.mxu1 %v4620_v30 }
 0x734   : > { %v3033_v5 = vpop.xlane.xlu1 %3032  ;;  %4625 = vmatprep.subr.bf16.mxu0 %v4624_v44  ;;  %4635 = vmatprep.subr.bf16.mxu1 %v4624_v44 }
 0x735   : > { %v3056_v2 = vmul.f32 0.015625, %v3033_v5 }
 0x737   : > { %v3072_v0 = vsub.f32 %v6850_v38, %v3056_v2  ;;  %4627 = vmatpush3.bf16.msra.mxu0 %v4624_v44  ;;  %4643 = vmatpush3.bf16.msra.mxu1 %v4624_v44 }
 0x738   : > { %v3035_v54 = vpop.xlane.xlu1 %3034 }
 0x739   : > { %v7006_v13 = vsel %vm1225_vm1, %v3072_v0, 0.0  ;;  %v3057_v16 = vmul.f32 0.015625, %v3035_v54 }
 0x73a   : > { %v3104_v38 = vmul.f32 %v7006_v13, %v7006_v13 }
 0x73b   : > { %v3073_v7 = vsub.f32 %v6858_v8, %v3057_v16 }
 0x73c   : > { %v3037_v32 = vpop.xlane.xlu1 %3036  ;;  %3128 = vadd.xlane.f32.xlu1 %v3104_v38  ;;  %v7074_v38 = vld [vmem:[%s7682_s17] ss:$0 sm:$0xff] }
 0x73d   : > { %v7019_v24 = vsel %vm1225_vm1, %v3073_v7, 0.0  ;;  %v3058_v11 = vmul.f32 0.015625, %v3037_v32 }
 0x73e   : > { %v3105_v8 = vmul.f32 %v7019_v24, %v7019_v24 }
 0x73f   : > { %v3074_v21 = vsub.f32 %v6866_v47, %v3058_v11 }
 0x740   : > { %v3039_v34 = vpop.xlane.xlu1 %3038  ;;  %3130 = vadd.xlane.f32.xlu1 %v3105_v8 }
 0x741   : > { %v7026_v22 = vsel %vm1225_vm1, %v3074_v21, 0.0  ;;  %v3059_v50 = vmul.f32 0.015625, %v3039_v34 }
 0x742   : > { %v3106_v60 = vmul.f32 %v7026_v22, %v7026_v22 }
 0x743   : > { %v3075_v9 = vsub.f32 %v6873_v59, %v3059_v50 }
 0x744   : > { %v3041_v1 = vpop.xlane.xlu1 %3040  ;;  %3132 = vadd.xlane.f32.xlu1 %v3106_v60 }
 0x745   : > { %v7033_v47 = vsel %vm1225_vm1, %v3075_v9, 0.0  ;;  %v3060_v61 = vmul.f32 0.015625, %v3041_v1 }
 0x746   : > { %v3107_v25 = vmul.f32 %v7033_v47, %v7033_v47 }
 0x747   : > { %v3076_v10 = vsub.f32 %v6881_v41, %v3060_v61 }
 0x748   : > { %3134 = vadd.xlane.f32.xlu1 %v3107_v25 }
 0x749   : > { %v7040_v40 = vsel %vm1225_vm1, %v3076_v10, 0.0  ;;  %v3043_v59 = vpop.xlane.xlu1 %3042 }
 0x74a   : > { %v3061_v18 = vmul.f32 0.015625, %v3043_v59  ;;  %v3108_v4 = vmul.f32 %v7040_v40, %v7040_v40 }
 0x74c   : > { %v3077_v55 = vsub.f32 %v6888_v29, %v3061_v18  ;;  %3136 = vadd.xlane.f32.xlu1 %v3108_v4 }
 0x74e   : > { %v7047_v62 = vsel %vm1225_vm1, %v3077_v55, 0.0 }
 0x74f   : > { %v3045_v42 = vpop.xlane.xlu1 %3044  ;;  %v3109_v41 = vmul.f32 %v7047_v62, %v7047_v62 }
 0x750   : > { %v3062_v28 = vmul.f32 0.015625, %v3045_v42 }
 0x751   : > { %3138 = vadd.xlane.f32.xlu1 %v3109_v41 }
 0x752   : > { %v3078_v31 = vsub.f32 %v6894_v56, %v3062_v28 }
 0x754   : > { %v7054_v63 = vsel %vm1225_vm1, %v3078_v31, 0.0  ;;  %v3047_v17 = vpop.xlane.xlu1 %3046 }
 0x755   : > { %v3063_v20 = vmul.f32 0.015625, %v3047_v17  ;;  %v3110_v29 = vmul.f32 %v7054_v63, %v7054_v63 }
 0x757   : > { %v3079_v48 = vsub.f32 %v6900_v12, %v3063_v20  ;;  %3140 = vadd.xlane.f32.xlu1 %v3110_v29 }
 0x759   : > { %v7061_v53 = vsel %vm1225_vm1, %v3079_v48, 0.0 }
 0x75a   : > { %v3111_v3 = vmul.f32 %v7061_v53, %v7061_v53 }
 0x75c   : > { %3142 = vadd.xlane.f32.xlu1 %v3111_v3 }
 0x7a0   : > { %v3113_v56 = vpop.xlane.xlu0 %3112 }
 0x7a1   : > { %v3144_v37 = vmul.f32 0.015625, %v3113_v56 }
 0x7a3   : > { %v3160_v5 = vadd.f32 1e-05, %v3144_v37 }
 0x7a4   : > { %v3115_v2 = vpop.xlane.xlu0 %3114 }
 0x7a5   : > { %4973 = vrsqrt.f32 %v3160_v5  ;;  %v3145_v19 = vmul.f32 0.015625, %v3115_v2 }
 0x7a7   : > { %v3161_v14 = vadd.f32 1e-05, %v3145_v19 }
 0x7a8   : > { %v3117_v27 = vpop.xlane.xlu0 %3116 }
 0x7a9   : > { %4975 = vrsqrt.f32 %v3161_v14  ;;  %v3146_v26 = vmul.f32 0.015625, %v3117_v27 }
 0x7ab   : > { %v3162_v12 = vadd.f32 1e-05, %v3146_v26 }
 0x7ac   : > { %v3119_v52 = vpop.xlane.xlu0 %3118 }
 0x7ad   : > { %4977 = vrsqrt.f32 %v3162_v12  ;;  %v3147_v0 = vmul.f32 0.015625, %v3119_v52 }
 0x7af   : > { %v4974_v33 = vpop.eup %4973  ;;  %v3163_v43 = vadd.f32 1e-05, %v3147_v0 }
 0x7b0   : > { %v3192_v54 = vmul.f32 %v4974_v33, %v6920_v35 }
 0x7b1   : > { %4979 = vrsqrt.f32 %v3163_v43  ;;  %v3121_v16 = vpop.xlane.xlu0 %3120 }
 0x7b2   : > { %v3148_v30 = vmul.f32 0.015625, %v3121_v16  ;;  %v3214_v7 = vmul.f32 %v7068_v58, %v3192_v54 }
 0x7b3   : > { %v4976_v39 = vpop.eup %4975 }
 0x7b4   : > { %v3193_v45 = vmul.f32 %v4976_v39, %v6927_v46  ;;  %v3164_v32 = vadd.f32 1e-05, %v3148_v30  ;;  %v3236_v11 = vadd.f32 %v7074_v38, %v3214_v7 }
 0x7b5   : > { %v3123_v8 = vpop.xlane.xlu0 %3122 }
 0x7b6   : > { %4981 = vrsqrt.f32 %v3164_v32  ;;  %v3149_v44 = vmul.f32 0.015625, %v3123_v8  ;;  %4380 = vmatprep.mubr.f32.mxu0 %v3236_v11  ;;  %v3215_v35 = vmul.f32 %v7068_v58, %v3193_v45 }
 0x7b7   : > { %v4978_v21 = vpop.eup %4977 }
 0x7b8   : > { %v3165_v34 = vadd.f32 1e-05, %v3149_v44  ;;  %v3237_v50 = vadd.f32 %v7074_v38, %v3215_v35  ;;  %v3194_v60 = vmul.f32 %v4978_v21, %v6934_v36 }
 0x7b9   : > { %v3125_v9 = vpop.xlane.xlu0 %3124 }
 0x7ba   : > { %4983 = vrsqrt.f32 %v3165_v34  ;;  %v3150_v1 = vmul.f32 0.015625, %v3125_v9  ;;  %4381 = vmatmul.mubr.f32.vlgmr.msra.gmra.mrb[48].mxu0 %v3237_v50  ;;  %v3216_v46 = vmul.f32 %v7068_v58, %v3194_v60 }
 0x7bb   : > { %v4980_v61 = vpop.eup %4979 }
 0x7bc   : > { %v3166_v25 = vadd.f32 1e-05, %v3150_v1  ;;  %v3238_v10 = vadd.f32 %v7074_v38, %v3216_v46  ;;  %v3195_v59 = vmul.f32 %v4980_v61, %v6941_v57 }
 0x7be   : > { %4985 = vrsqrt.f32 %v3166_v25  ;;  %4383 = vmatprep.mubr.f32.mxu0 %v3238_v10  ;;  %v3217_v4 = vmul.f32 %v7068_v58, %v3195_v59 }
 0x7bf   : > { %v3127_v18 = vpop.xlane.xlu0 %3126 }
 0x7c0   : > { %v3151_v55 = vmul.f32 0.015625, %v3127_v18  ;;  %v4982_v42 = vpop.eup %4981  ;;  %v3239_v36 = vadd.f32 %v7074_v38, %v3217_v4 }
 0x7c1   : > { %v3196_v28 = vmul.f32 %v4982_v42, %v6948_v15 }
 0x7c2   : > { %v3167_v41 = vadd.f32 1e-05, %v3151_v55  ;;  %4384 = vmatmul.mubr.f32.gmra.mrb[50].mxu0 %v3239_v36 }
 0x7c3   : > { %v3218_v31 = vmul.f32 %v7068_v58, %v3196_v28 }
 0x7c4   : > { %4987 = vrsqrt.f32 %v3167_v41  ;;  %v4984_v17 = vpop.eup %4983 }
 0x7c5   : > { %v3240_v20 = vadd.f32 %v7074_v38, %v3218_v31  ;;  %v3197_v57 = vmul.f32 %v4984_v17, %v6955_v6 }
 0x7c7   : > { %4386 = vmatprep.mubr.f32.mxu0 %v3240_v20  ;;  %v3219_v29 = vmul.f32 %v7068_v58, %v3197_v57 }
 0x7c8   : > { %v4986_v48 = vpop.eup %4985 }
 0x7c9   : > { %v3129_v3 = vpop.xlane.xlu1 %3128  ;;  %v3241_v37 = vadd.f32 %v7074_v38, %v3219_v29  ;;  %v3198_v5 = vmul.f32 %v4986_v48, %v6968_v51 }
 0x7ca   : > { %v3152_v56 = vmul.f32 0.015625, %v3129_v3 }
 0x7cb   : > { %4387 = vmatmul.mubr.f32.gmra.mrb[52].mxu0 %v3241_v37  ;;  %v3220_v2 = vmul.f32 %v7068_v58, %v3198_v5 }
 0x7cc   : > { %v3168_v15 = vadd.f32 1e-05, %v3152_v56 }
 0x7cd   : > { %v3131_v19 = vpop.xlane.xlu1 %3130  ;;  %v3242_v6 = vadd.f32 %v7074_v38, %v3220_v2  ;;  %v3420_v2 = vld [vmem:[%s7127_s30] sm:$0xff] }
 0x7ce   : > { %v4988_v14 = vpop.eup %4987  ;;  %4989 = vrsqrt.f32 %v3168_v15  ;;  %v3153_v27 = vmul.f32 0.015625, %v3131_v19  ;;  %vm3436_vm3 = vcmp.gt.f32.partialorder %v3420_v2, 0.5 }
 0x7cf   : > { %v3199_v26 = vmul.f32 %v4988_v14, %v6975_v49  ;;  %4389 = vmatprep.mubr.f32.mxu0 %v3242_v6 }
 0x7d0   : > { %v3169_v12 = vadd.f32 1e-05, %v3153_v27 }
 0x7d1   : > { %v3133_v52 = vpop.xlane.xlu1 %3132  ;;  %v3221_v0 = vmul.f32 %v7068_v58, %v3199_v26  ;;  %v3423_v26 = vld [vmem:[%s7127_s30 + $0x18] sm:$0xff] }
 0x7d2   : > { %4991 = vrsqrt.f32 %v3169_v12  ;;  %v3154_v33 = vmul.f32 0.015625, %v3133_v52  ;;  %v3422_v12 = vld [vmem:[%s7127_s30 + $0x10] sm:$0xff]  ;;  %vm3439_vm4 = vcmp.gt.f32.partialorder %v3423_v26, 0.5 }
 0x7d3   : > { %v3243_v51 = vadd.f32 %v7074_v38, %v3221_v0  ;;  %vm3438_vm5 = vcmp.gt.f32.partialorder %v3422_v12, 0.5 }
 0x7d4   : > { %v3170_v43 = vadd.f32 1e-05, %v3154_v33 }
 0x7d5   : > { %v3135_v54 = vpop.xlane.xlu1 %3134  ;;  %4390 = vmatmul.mubr.f32.gmra.mrb[54].mxu0 %v3243_v51 }
 0x7d6   : > { %4993 = vrsqrt.f32 %v3170_v43  ;;  %v3155_v16 = vmul.f32 0.015625, %v3135_v54 }
 0x7d8   : > { %v4990_v30 = vpop.eup %4989  ;;  %v3171_v7 = vadd.f32 1e-05, %v3155_v16  ;;  %v3425_v16 = vld [vmem:[%s7127_s30 + $0x28] sm:$0xff] }
 0x7d9   : > { %v3137_v39 = vpop.xlane.xlu1 %3136  ;;  %v3200_v45 = vmul.f32 %v4990_v30, %v7006_v13  ;;  %v3424_v30 = vld [vmem:[%s7127_s30 + $0x20] sm:$0xff]  ;;  %vm3441_vm6 = vcmp.gt.f32.partialorder %v3425_v16, 0.5 }
 0x7da   : > { %4995 = vrsqrt.f32 %v3171_v7  ;;  %v3156_v49 = vmul.f32 0.015625, %v3137_v39  ;;  %vm3440_vm7 = vcmp.gt.f32.partialorder %v3424_v30, 0.5 }
 0x7db   : > { %v3222_v32 = vmul.f32 %v7068_v58, %v3200_v45 }
 0x7dc   : > { %v4992_v11 = vpop.eup %4991  ;;  %v3172_v8 = vadd.f32 1e-05, %v3156_v49 }
 0x7dd   : > { %v3201_v44 = vmul.f32 %v4992_v11, %v7019_v24  ;;  %v3244_v35 = vadd.f32 %v7074_v38, %v3222_v32 }
 0x7de   : > { %4997 = vrsqrt.f32 %v3172_v8  ;;  %v3139_v21 = vpop.xlane.xlu1 %3138  ;;  %v3427_v8 = vld [vmem:[%s7127_s30 + $0x38] sm:$0xff] }
 0x7df   : > { %v3157_v34 = vmul.f32 0.015625, %v3139_v21  ;;  %4392 = vmatprep.mubr.f32.mxu1 %v3244_v35  ;;  %v3223_v50 = vmul.f32 %v7068_v58, %v3201_v44  ;;  %v3426_v44 = vld [vmem:[%s7127_s30 + $0x30] sm:$0xff]  ;;  %vm3443_vm8 = vcmp.gt.f32.partialorder %v3427_v8, 0.5 }
 0x7e0   : > { %v4994_v60 = vpop.eup %4993  ;;  %vm3442_vm9 = vcmp.gt.f32.partialorder %v3426_v44, 0.5 }
 0x7e1   : > { %v3173_v9 = vadd.f32 1e-05, %v3157_v34  ;;  %v3245_v13 = vadd.f32 %v7074_v38, %v3223_v50  ;;  %v3202_v1 = vmul.f32 %v4994_v60, %v7026_v22 }
 0x7e3   : > { %4999 = vrsqrt.f32 %v3173_v9  ;;  %4393 = vmatmul.mubr.f32.vlgmr.msra.gmra.mrb[48].mxu1 %v3245_v13  ;;  %v3224_v46 = vmul.f32 %v7068_v58, %v3202_v1  ;;  %v3429_v13 = vld [vmem:[%s7127_s30 + $0x48] sm:$0xff]  ;;  %v3428_v1 = vld [vmem:[%s7127_s30 + $0x40] sm:$0xff] }
 0x7e4   : > { %v4996_v61 = vpop.eup %4995  ;;  %v3141_v24 = vpop.xlane.xlu1 %3140  ;;  %vm3445_vm10 = vcmp.gt.f32.partialorder %v3429_v13, 0.5  ;;  %vm3444_vm11 = vcmp.gt.f32.partialorder %v3428_v1, 0.5 }
 0x7e5   : > { %v3158_v25 = vmul.f32 0.015625, %v3141_v24  ;;  %v3246_v10 = vadd.f32 %v7074_v38, %v3224_v46  ;;  %v3203_v59 = vmul.f32 %v4996_v61, %v7033_v47 }
 0x7e7   : > { %v3174_v18 = vadd.f32 1e-05, %v3158_v25  ;;  %4395 = vmatprep.mubr.f32.mxu1 %v3246_v10  ;;  %v3225_v4 = vmul.f32 %v7068_v58, %v3203_v59 }
 0x7e8   : > { %v4998_v55 = vpop.eup %4997 }
 0x7e9   : > { %5001 = vrsqrt.f32 %v3174_v18  ;;  %v3143_v42 = vpop.xlane.xlu1 %3142  ;;  %v3247_v22 = vadd.f32 %v7074_v38, %v3225_v4  ;;  %v3204_v36 = vmul.f32 %v4998_v55, %v7040_v40  ;;  %v3431_v18 = vld [vmem:[%s7127_s30 + $0x58] sm:$0xff]  ;;  %v3430_v4 = vld [vmem:[%s7127_s30 + $0x50] sm:$0xff] }
 0x7ea   : > { %v3159_v41 = vmul.f32 0.015625, %v3143_v42  ;;  %vm3447_vm12 = vcmp.gt.f32.partialorder %v3431_v18, 0.5  ;;  %vm3446_vm13 = vcmp.gt.f32.partialorder %v3430_v4, 0.5 }
 0x7eb   : > { %4396 = vmatmul.mubr.f32.gmra.mrb[50].mxu1 %v3247_v22  ;;  %v3226_v28 = vmul.f32 %v7068_v58, %v3204_v36 }
 0x7ec   : > { %v3175_v31 = vadd.f32 1e-05, %v3159_v41 }
 0x7ed   : > { %v5000_v17 = vpop.eup %4999  ;;  %v3248_v20 = vadd.f32 %v7074_v38, %v3226_v28 }
 0x7ee   : > { %5003 = vrsqrt.f32 %v3175_v31  ;;  %v3205_v47 = vmul.f32 %v5000_v17, %v7047_v62  ;;  %v3433_v31 = vld [vmem:[%s7127_s30 + $0x68] sm:$0xff]  ;;  %v3432_v17 = vld [vmem:[%s7127_s30 + $0x60] sm:$0xff] }
 0x7ef   : > { %4398 = vmatprep.mubr.f32.mxu1 %v3248_v20  ;;  %vm3449_vm14 = vcmp.gt.f32.partialorder %v3433_v31, 0.5  ;;  %vm3448_vm15 = vcmp.gt.f32.partialorder %v3432_v17, 0.5 }
 0x7f0   : > { %v3227_v57 = vmul.f32 %v7068_v58, %v3205_v47 }
 0x7f2   : > { %v3249_v29 = vadd.f32 %v7074_v38, %v3227_v57 }
 0x7f3   : > { %v5002_v48 = vpop.eup %5001 }
 0x7f4   : > { %4399 = vmatmul.mubr.f32.gmra.mrb[52].mxu1 %v3249_v29  ;;  %v3206_v40 = vmul.f32 %v5002_v48, %v7054_v63  ;;  %v3421_v63 = vld [vmem:[%s7127_s30 + $0x8] sm:$0xff] }
 0x7f5   : > { %vm3437_vm2 = vcmp.gt.f32.partialorder %v3421_v63, 0.5 }
 0x7f6   : > { %v3228_v3 = vmul.f32 %v7068_v58, %v3206_v40 }
 0x7f8   : > { %v5004_v56 = vpop.eup %5003  ;;  %v3250_v37 = vadd.f32 %v7074_v38, %v3228_v3  ;;  %v3435_v3 = vld [vmem:[%s7127_s30 + $0x78] sm:$0xff] }
 0x7f9   : > { %v3207_v5 = vmul.f32 %v5004_v56, %v7061_v53  ;;  %v7133_v53 = vld [vmem:[%s7684_s19] ss:$0 sm:$0xff]  ;;  %v3434_v56 = vld [vmem:[%s7127_s30 + $0x70] sm:$0xff]  ;;  %vm3451_vm0 = vcmp.gt.f32.partialorder %v3435_v3, 0.5 }
 0x7fa   : > { %4401 = vmatprep.mubr.f32.mxu1 %v3250_v37  ;;  %vm3450_vm1 = vcmp.gt.f32.partialorder %v3434_v56, 0.5 }
 0x7fb   : > { %v3229_v15 = vmul.f32 %v7068_v58, %v3207_v5 }
 0x7fd   : > { %v3251_v62 = vadd.f32 %v7074_v38, %v3229_v15 }
 0x7ff   : > { %4402 = vmatmul.mubr.f32.gmra.mrb[54].mxu1 %v3251_v62 }
 0x88d   : > { %v4382_v58 = vpop.f32.mrb[48].mxu0 }
 0x88e   : > { %v3347_v38 = vadd.f32 %v4382_v58, %v7133_v53  ;;  %v3341_v19 = vpop.f32.mrb[49].mxu0 }
 0x88f   : > { %v3342_v14 = vadd.f32 %v7133_v53, %v3341_v19 }
 0x890   : > { %v7138_v27 = vsel %vm3437_vm2, %v3347_v38, -1e+10 }
 0x891   : > { %3470 = vmax.xlane.f32.xlu1 %v7138_v27  ;;  %v7141_v6 = vsel %vm3436_vm3, %v3342_v14, -1e+10 }
 0x892   : > { %3468 = vmax.xlane.f32.xlu0 %v7141_v6 }
 0x895   : > { %v4385_v52 = vpop.f32.mrb[50].mxu0 }
 0x896   : > { %v3357_v0 = vadd.f32 %v4385_v52, %v7133_v53  ;;  %v3351_v33 = vpop.f32.mrb[51].mxu0 }
 0x897   : > { %v3352_v51 = vadd.f32 %v7133_v53, %v3351_v33 }
 0x898   : > { %v7148_v43 = vsel %vm3439_vm4, %v3357_v0, -1e+10 }
 0x899   : > { %3474 = vmax.xlane.f32.xlu1 %v7148_v43  ;;  %v7151_v54 = vsel %vm3438_vm5, %v3352_v51, -1e+10 }
 0x89a   : > { %3472 = vmax.xlane.f32.xlu0 %v7151_v54 }
 0x89e   : > { %v4388_v7 = vpop.f32.mrb[52].mxu0 }
 0x89f   : > { %v3367_v39 = vadd.f32 %v4388_v7, %v7133_v53  ;;  %v3361_v45 = vpop.f32.mrb[53].mxu0 }
 0x8a0   : > { %v3362_v49 = vadd.f32 %v7133_v53, %v3361_v45 }
 0x8a1   : > { %v7158_v32 = vsel %vm3441_vm6, %v3367_v39, -1e+10 }
 0x8a2   : > { %3478 = vmax.xlane.f32.xlu1 %v7158_v32  ;;  %v7161_v11 = vsel %vm3440_vm7, %v3362_v49, -1e+10 }
 0x8a3   : > { %3476 = vmax.xlane.f32.xlu0 %v7161_v11 }
 0x8a8   : > { %v4391_v35 = vpop.f32.mrb[54].mxu0 }
 0x8a9   : > { %v3377_v21 = vadd.f32 %v4391_v35, %v7133_v53  ;;  %v3371_v34 = vpop.f32.mrb[55].mxu0 }
 0x8aa   : > { %v3372_v50 = vadd.f32 %v7133_v53, %v3371_v34 }
 0x8ab   : > { %v7168_v60 = vsel %vm3443_vm8, %v3377_v21, -1e+10 }
 0x8ac   : > { %3482 = vmax.xlane.f32.xlu1 %v7168_v60  ;;  %v7171_v9 = vsel %vm3442_vm9, %v3372_v50, -1e+10 }
 0x8ad   : > { %3480 = vmax.xlane.f32.xlu0 %v7171_v9 }
 0x8b6   : > { %v4394_v46 = vpop.f32.mrb[48].mxu1 }
 0x8b7   : > { %v3387_v61 = vadd.f32 %v4394_v46, %v7133_v53  ;;  %v3381_v24 = vpop.f32.mrb[49].mxu1 }
 0x8b8   : > { %v3382_v25 = vadd.f32 %v7133_v53, %v3381_v24 }
 0x8b9   : > { %v7178_v10 = vsel %vm3445_vm10, %v3387_v61, -1e+10 }
 0x8ba   : > { %3486 = vmax.xlane.f32.xlu1 %v7178_v10  ;;  %v7181_v59 = vsel %vm3444_vm11, %v3382_v25, -1e+10 }
 0x8bb   : > { %3484 = vmax.xlane.f32.xlu0 %v7181_v59 }
 0x8be   : > { %v4397_v55 = vpop.f32.mrb[50].mxu1 }
 0x8bf   : > { %v3397_v42 = vadd.f32 %v4397_v55, %v7133_v53  ;;  %v3391_v22 = vpop.f32.mrb[51].mxu1 }
 0x8c0   : > { %v3392_v36 = vadd.f32 %v7133_v53, %v3391_v22 }
 0x8c1   : > { %v7188_v41 = vsel %vm3447_vm12, %v3397_v42, -1e+10 }
 0x8c2   : > { %3490 = vmax.xlane.f32.xlu1 %v7188_v41  ;;  %v7191_v28 = vsel %vm3446_vm13, %v3392_v36, -1e+10 }
 0x8c3   : > { %3488 = vmax.xlane.f32.xlu0 %v7191_v28 }
 0x8c7   : > { %v4400_v20 = vpop.f32.mrb[52].mxu1 }
 0x8c8   : > { %v3407_v47 = vadd.f32 %v4400_v20, %v7133_v53  ;;  %v3401_v57 = vpop.f32.mrb[53].mxu1 }
 0x8c9   : > { %v3402_v29 = vadd.f32 %v7133_v53, %v3401_v57 }
 0x8ca   : > { %v7198_v48 = vsel %vm3449_vm14, %v3407_v47, -1e+10 }
 0x8cb   : > { %3494 = vmax.xlane.f32.xlu1 %v7198_v48  ;;  %v7201_v40 = vsel %vm3448_vm15, %v3402_v29, -1e+10 }
 0x8cc   : > { %3492 = vmax.xlane.f32.xlu0 %v7201_v40 }
 0x8d2   : > { %v4403_v37 = vpop.f32.mrb[54].mxu1 }
 0x8d3   : > { %v3417_v5 = vadd.f32 %v4403_v37, %v7133_v53  ;;  %v3411_v15 = vpop.f32.mrb[55].mxu1 }
 0x8d4   : > { %v3412_v62 = vadd.f32 %v7133_v53, %v3411_v15 }
 0x8d5   : > { %v7208_v63 = vsel %vm3451_vm0, %v3417_v5, -1e+10 }
 0x8d6   : > { %3498 = vmax.xlane.f32.xlu1 %v7208_v63  ;;  %v7211_v2 = vsel %vm3450_vm1, %v3412_v62, -1e+10 }
 0x8d7   : > { %3496 = vmax.xlane.f32.xlu0 %v7211_v2 }
 0x91e   : > { %v7214_v58 = vpop.xlane.xlu1 %3470 }
 0x91f   : > { %7711 = vst [vmem:[#allocation2_spill] sm:$0xff] %v7214_v58  ;;  %vm3629_vm2 = vcmp.ge.f32.partialorder %v7138_v27, %v7214_v58  ;;  %v7218_v38 = vpop.xlane.xlu0 %3468 }
 0x920   : > { %7712 = vst [vmem:[#allocation3_spill] sm:$0xff] %v7218_v38  ;;  %vm3628_vm3 = vcmp.ge.f32.partialorder %v7141_v6, %v7218_v38  ;;  %v7223_v53 = vsel %vm3629_vm2, %v5258_v23, 128 }
 0x921   : > { %v3675_v19 = vshra.s32 %v7223_v53, 16  ;;  %v7227_v14 = vsel %vm3628_vm3, %v5258_v23, 128 }
 0x922   : > { %v3661_v26 = vshra.s32 %v7227_v14, 16 }
 0x923   : > { %v7230_v12 = vcvt.s32.f32 %v3675_v19 }
 0x924   : > { %v7232_v52 = vcvt.s32.f32 %v3661_v26 }
 0x925   : > { %3678 = vmin.xlane.f32.xlu1 %v7230_v12 }
 0x926   : > { %v7235_v0 = vpop.xlane.xlu1 %3474  ;;  %3664 = vmin.xlane.f32.xlu0 %v7232_v52 }
 0x927   : > { %vm3631_vm4 = vcmp.ge.f32.partialorder %v7148_v43, %v7235_v0  ;;  %v7240_v33 = vpop.xlane.xlu0 %3472 }
 0x928   : > { %7713 = vst [vmem:[#allocation4_spill] sm:$0xff] %v7240_v33  ;;  %vm3630_vm5 = vcmp.ge.f32.partialorder %v7151_v54, %v7240_v33  ;;  %v7245_v51 = vsel %vm3631_vm4, %v5258_v23, 128 }
 0x929   : > { %v3703_v16 = vshra.s32 %v7245_v51, 16  ;;  %v7249_v30 = vsel %vm3630_vm5, %v5258_v23, 128 }
 0x92a   : > { %v3689_v7 = vshra.s32 %v7249_v30, 16 }
 0x92b   : > { %v7252_v39 = vcvt.s32.f32 %v3703_v16 }
 0x92c   : > { %v7254_v45 = vcvt.s32.f32 %v3689_v7 }
 0x92d   : > { %3706 = vmin.xlane.f32.xlu1 %v7252_v39 }
 0x92e   : > { %3692 = vmin.xlane.f32.xlu0 %v7254_v45 }
 0x92f   : > { %v7258_v49 = vpop.xlane.xlu1 %3478 }
 0x930   : > { %7714 = vst [vmem:[#allocation5_spill] sm:$0xff] %v7258_v49  ;;  %vm3633_vm6 = vcmp.ge.f32.partialorder %v7158_v32, %v7258_v49  ;;  %v7262_v8 = vpop.xlane.xlu0 %3476 }
 0x931   : > { %7715 = vst [vmem:[#allocation6_spill] sm:$0xff] %v7262_v8  ;;  %vm3632_vm7 = vcmp.ge.f32.partialorder %v7161_v11, %v7262_v8  ;;  %v7267_v44 = vsel %vm3633_vm6, %v5258_v23, 128 }
 0x932   : > { %v3731_v35 = vshra.s32 %v7267_v44, 16  ;;  %v7271_v21 = vsel %vm3632_vm7, %v5258_v23, 128 }
 0x933   : > { %v3717_v34 = vshra.s32 %v7271_v21, 16 }
 0x934   : > { %v7274_v50 = vcvt.s32.f32 %v3731_v35  ;;  %v3501_v35 = vsub.f32 %v7138_v27, %v7214_v58  ;;  %v3502_v58 = vsub.f32 %v7151_v54, %v7240_v33 }
 0x935   : > { %v7276_v13 = vcvt.s32.f32 %v3717_v34 }
 0x936   : > { %3734 = vmin.xlane.f32.xlu1 %v7274_v50 }
 0x937   : > { %3720 = vmin.xlane.f32.xlu0 %v7276_v13 }
 0x939   : > { %v7280_v1 = vpop.xlane.xlu1 %3482 }
 0x93a   : > { %vm3635_vm8 = vcmp.ge.f32.partialorder %v7168_v60, %v7280_v1  ;;  %v7284_v46 = vpop.xlane.xlu0 %3480 }
 0x93b   : > { %vm3634_vm9 = vcmp.ge.f32.partialorder %v7171_v9, %v7284_v46  ;;  %v7289_v61 = vsel %vm3635_vm8, %v5258_v23, 128 }
 0x93c   : > { %v3759_v24 = vshra.s32 %v7289_v61, 16  ;;  %v7293_v25 = vsel %vm3634_vm9, %v5258_v23, 128 }
 0x93d   : > { %v3745_v18 = vshra.s32 %v7293_v25, 16 }
 0x93e   : > { %v7296_v4 = vcvt.s32.f32 %v3759_v24 }
 0x93f   : > { %v7298_v55 = vcvt.s32.f32 %v3745_v18  ;;  %v3500_v18 = vsub.f32 %v7141_v6, %v7218_v38 }
 0x940   : > { %3762 = vmin.xlane.f32.xlu1 %v7296_v4 }
 0x941   : > { %3748 = vmin.xlane.f32.xlu0 %v7298_v55  ;;  %v3516_v27 = vmul.f32 1.442695, %v3500_v18 }
 0x947   : > { %v7302_v42 = vpop.xlane.xlu1 %3486 }
 0x948   : > { %vm3637_vm10 = vcmp.ge.f32.partialorder %v7178_v10, %v7302_v42  ;;  %v7306_v22 = vpop.xlane.xlu0 %3484 }
 0x949   : > { %vm3636_vm11 = vcmp.ge.f32.partialorder %v7181_v59, %v7306_v22  ;;  %v7311_v36 = vsel %vm3637_vm10, %v5258_v23, 128 }
 0x94a   : > { %v3787_v31 = vshra.s32 %v7311_v36, 16  ;;  %v7315_v17 = vsel %vm3636_vm11, %v5258_v23, 128 }
 0x94b   : > { %v3773_v20 = vshra.s32 %v7315_v17, 16 }
 0x94c   : > { %v7318_v47 = vcvt.s32.f32 %v3787_v31 }
 0x94d   : > { %v7320_v57 = vcvt.s32.f32 %v3773_v20 }
 0x94e   : > { %3790 = vmin.xlane.f32.xlu1 %v7318_v47 }
 0x94f   : > { %v7323_v29 = vpop.xlane.xlu1 %3490  ;;  %3776 = vmin.xlane.f32.xlu0 %v7320_v57 }
 0x950   : > { %vm3639_vm12 = vcmp.ge.f32.partialorder %v7188_v41, %v7323_v29  ;;  %v7328_v3 = vpop.xlane.xlu0 %3488 }
 0x951   : > { %vm3638_vm13 = vcmp.ge.f32.partialorder %v7191_v28, %v7328_v3  ;;  %v7333_v56 = vsel %vm3639_vm12, %v5258_v23, 128 }
 0x952   : > { %v3815_v37 = vshra.s32 %v7333_v56, 16  ;;  %v7337_v5 = vsel %vm3638_vm13, %v5258_v23, 128 }
 0x953   : > { %v3801_v15 = vshra.s32 %v7337_v5, 16 }
 0x954   : > { %v7340_v62 = vcvt.s32.f32 %v3815_v37 }
 0x955   : > { %v7342_v19 = vcvt.s32.f32 %v3801_v15  ;;  %v3518_v15 = vmul.f32 1.442695, %v3501_v35  ;;  %v3520_v35 = vmul.f32 1.442695, %v3502_v58 }
 0x956   : > { %3818 = vmin.xlane.f32.xlu1 %v7340_v62 }
 0x957   : > { %7716 = vst [vmem:[#allocation7_spill] sm:$0xff] %v7342_v19  ;;  %3804 = vmin.xlane.f32.xlu0 %v7342_v19  ;;  %v3503_v19 = vsub.f32 %v7148_v43, %v7235_v0  ;;  %5005 = vpow2.f32 %v3518_v15  ;;  %v3504_v43 = vsub.f32 %v7161_v11, %v7262_v8  ;;  %v3507_v11 = vsub.f32 %v7168_v60, %v7280_v1 }
 0x958   : > { %v7346_v26 = vpop.xlane.xlu1 %3494  ;;  %5007 = vpow2.f32 %v3516_v27  ;;  %v3506_v27 = vsub.f32 %v7171_v9, %v7284_v46 }
 0x959   : > { %vm3641_vm14 = vcmp.ge.f32.partialorder %v7198_v48, %v7346_v26  ;;  %v7350_v16 = vpop.xlane.xlu0 %3492  ;;  %v3522_v6 = vmul.f32 1.442695, %v3503_v19  ;;  %v3524_v15 = vmul.f32 1.442695, %v3504_v43  ;;  %v3530_v33 = vmul.f32 1.442695, %v3507_v11 }
 0x95a   : > { %vm3640_vm15 = vcmp.ge.f32.partialorder %v7201_v40, %v7350_v16  ;;  %v7355_v7 = vsel %vm3641_vm14, %v5258_v23, 128  ;;  %v3528_v60 = vmul.f32 1.442695, %v3506_v27 }
 0x95b   : > { %v3843_v34 = vshra.s32 %v7355_v7, 16  ;;  %v7361_v24 = vsel %vm3640_vm15, %v5258_v23, 128  ;;  %5009 = vpow2.f32 %v3522_v6  ;;  %v3509_v6 = vsub.f32 %v7178_v10, %v7302_v42 }
 0x95c   : > { %v3829_v31 = vshra.s32 %v7361_v24, 16  ;;  %5011 = vpow2.f32 %v3520_v35  ;;  %v3510_v10 = vsub.f32 %v7191_v28, %v7328_v3 }
 0x95d   : > { %v7366_v20 = vcvt.s32.f32 %v3843_v34  ;;  %v3505_v34 = vsub.f32 %v7158_v32, %v7258_v49  ;;  %v3534_v43 = vmul.f32 1.442695, %v3509_v6 }
 0x95e   : > { %v7368_v37 = vcvt.s32.f32 %v3829_v31 }
 0x95f   : > { %3846 = vmin.xlane.f32.xlu1 %v7366_v20  ;;  %v3526_v58 = vmul.f32 1.442695, %v3505_v34  ;;  %v3508_v34 = vsub.f32 %v7181_v59, %v7306_v22  ;;  %v3513_v59 = vsub.f32 %v7198_v48, %v7346_v26 }
 0x960   : > { %3832 = vmin.xlane.f32.xlu0 %v7368_v37 }
 0x961   : > { %5013 = vpow2.f32 %v3526_v58  ;;  %v5006_v35 = vpop.eup %5005  ;;  %v3532_v58 = vmul.f32 1.442695, %v3508_v34 }
 0x962   : > { %5015 = vpow2.f32 %v3524_v15  ;;  %v5008_v9 = vpop.eup %5007 }
 0x963   : > { %v7378_v38 = vpop.xlane.xlu1 %3498  ;;  %5017 = vpow2.f32 %v3530_v33  ;;  %v3536_v33 = vmul.f32 1.442695, %v3510_v10 }
 0x964   : > { %vm3643_vm0 = vcmp.ge.f32.partialorder %v7208_v63, %v7378_v38  ;;  %v7384_v18 = vpop.xlane.xlu0 %3496  ;;  %5019 = vpow2.f32 %v3528_v60  ;;  %v3542_v60 = vmul.f32 1.442695, %v3513_v59  ;;  %v3515_v28 = vsub.f32 %v7208_v63, %v7378_v38 }
 0x965   : > { %vm3642_vm1 = vcmp.ge.f32.partialorder %v7211_v2, %v7384_v18  ;;  %v7389_v54 = vsel %vm3643_vm0, %v5258_v23, 128  ;;  %v5010_v11 = vpop.eup %5009  ;;  %5021 = vpow2.f32 %v3534_v43  ;;  %v3514_v48 = vsub.f32 %v7211_v2, %v7384_v18 }
 0x966   : > { %v3871_v32 = vshra.s32 %v7389_v54, 16  ;;  %v7393_v19 = vsel %vm3642_vm1, %v5258_v23, 128  ;;  %5023 = vpow2.f32 %v3532_v58  ;;  %v3546_v43 = vmul.f32 1.442695, %v3515_v28 }
 0x967   : > { %v3857_v31 = vshra.s32 %v7393_v19, 16  ;;  %v3674_v59 = vand.u32 65535, %v7223_v53  ;;  %v3702_v53 = vand.u32 65535, %v7245_v51  ;;  %v3730_v51 = vand.u32 65535, %v7267_v44 }
 0x968   : > { %v7400_v8 = vcvt.s32.f32 %v3871_v32  ;;  %v3511_v32 = vsub.f32 %v7188_v41, %v7323_v29  ;;  %v3512_v41 = vsub.f32 %v7201_v40, %v7350_v16  ;;  %v3544_v40 = vmul.f32 1.442695, %v3514_v48 }
 0x969   : > { %v7402_v49 = vcvt.s32.f32 %v3857_v31  ;;  %v5012_v31 = vpop.eup %5011  ;;  %v3758_v44 = vand.u32 65535, %v7289_v61  ;;  %v3786_v61 = vand.u32 65535, %v7311_v36  ;;  %v3814_v36 = vand.u32 65535, %v7333_v56 }
 0x96a   : > { %3874 = vmin.xlane.f32.xlu1 %v7400_v8  ;;  %v3538_v15 = vmul.f32 1.442695, %v3511_v32  ;;  %v3540_v34 = vmul.f32 1.442695, %v3512_v41  ;;  %v3842_v56 = vand.u32 65535, %v7355_v7  ;;  %v3870_v7 = vand.u32 65535, %v7389_v54 }
 0x96b   : > { %3860 = vmin.xlane.f32.xlu0 %v7402_v49  ;;  %v5014_v27 = vpop.eup %5013 }
 0x96c   : > { %v5016_v6 = vpop.eup %5015  ;;  %5025 = vpow2.f32 %v3538_v15 }
 0x96d   : > { %5027 = vpow2.f32 %v3536_v33  ;;  %v3660_v33 = vand.u32 65535, %v7227_v14  ;;  %v3688_v14 = vand.u32 65535, %v7249_v30  ;;  %v3716_v30 = vand.u32 65535, %v7271_v21 }
 0x96e   : > { %3550 = vadd.xlane.f32.xlu1 %v5006_v35  ;;  %v5018_v35 = vpop.eup %5017  ;;  %5029 = vpow2.f32 %v3542_v60  ;;  %v3744_v21 = vand.u32 65535, %v7293_v25  ;;  %v3772_v25 = vand.u32 65535, %v7315_v17  ;;  %v3800_v17 = vand.u32 65535, %v7337_v5 }
 0x96f   : > { %3548 = vadd.xlane.f32.xlu0 %v5008_v9  ;;  %v5020_v9 = vpop.eup %5019  ;;  %5031 = vpow2.f32 %v3540_v34  ;;  %v3662_v60 = vcvt.s32.f32 %v3660_v33  ;;  %v3828_v5 = vand.u32 65535, %v7361_v24  ;;  %v3856_v24 = vand.u32 65535, %v7393_v19 }
 0x970   : > { %v5022_v32 = vpop.eup %5021  ;;  %5033 = vpow2.f32 %v3546_v43  ;;  %v3774_v33 = vcvt.s32.f32 %v3772_v25 }
 0x971   : > { %v5024_v58 = vpop.eup %5023  ;;  %5035 = vpow2.f32 %v3544_v40 }
 0x972   : > { %3554 = vadd.xlane.f32.xlu1 %v5010_v11 }
 0x973   : > { %3552 = vadd.xlane.f32.xlu0 %v5012_v31 }
 0x976   : > { %3558 = vadd.xlane.f32.xlu1 %v5014_v27  ;;  %v5026_v63 = vpop.eup %5025  ;;  %v3676_v27 = vcvt.s32.f32 %v3674_v59  ;;  %v3788_v59 = vcvt.s32.f32 %v3786_v61 }
 0x977   : > { %3556 = vadd.xlane.f32.xlu0 %v5016_v6  ;;  %v5028_v10 = vpop.eup %5027 }
 0x978   : > { %v5030_v11 = vpop.eup %5029 }
 0x979   : > { %v5032_v2 = vpop.eup %5031 }
 0x97a   : > { %3562 = vadd.xlane.f32.xlu1 %v5018_v35  ;;  %v5034_v31 = vpop.eup %5033  ;;  %v3704_v35 = vcvt.s32.f32 %v3702_v53  ;;  %v7717_v53 = vld [vmem:[#allocation7_spill] sm:$0xff] }
 0x97b   : > { %3560 = vadd.xlane.f32.xlu0 %v5020_v9  ;;  %v5036_v15 = vpop.eup %5035  ;;  %v3690_v9 = vcvt.s32.f32 %v3688_v14 }
 0x97e   : > { %3566 = vadd.xlane.f32.xlu1 %v5022_v32  ;;  %v3732_v32 = vcvt.s32.f32 %v3730_v51 }
 0x97f   : > { %3564 = vadd.xlane.f32.xlu0 %v5024_v58  ;;  %v3718_v58 = vcvt.s32.f32 %v3716_v30 }
 0x982   : > { %3570 = vadd.xlane.f32.xlu1 %v5026_v63 }
 0x983   : > { %3568 = vadd.xlane.f32.xlu0 %v5028_v10 }
 0x986   : > { %3574 = vadd.xlane.f32.xlu1 %v5030_v11  ;;  %v3760_v11 = vcvt.s32.f32 %v3758_v44 }
 0x987   : > { %3572 = vadd.xlane.f32.xlu0 %v5032_v2  ;;  %v3746_v2 = vcvt.s32.f32 %v3744_v21 }
 0x98a   : > { %3578 = vadd.xlane.f32.xlu1 %v5034_v31 }
 0x98b   : > { %3576 = vadd.xlane.f32.xlu0 %v5036_v15 }
 0x9b2   : > { %v7424_v41 = vpop.xlane.xlu1 %3678 }
 0x9b3   : > { %vm3680_vm2 = vcmp.eq.f32.partialorder %v7230_v12, %v7424_v41  ;;  %v7428_v6 = vpop.xlane.xlu0 %3664 }
 0x9b4   : > { %vm3666_vm3 = vcmp.eq.f32.partialorder %v7232_v52, %v7428_v6  ;;  %v3681_v28 = vsel %vm3680_vm2, %v3676_v27, inf  ;;  %vm3901_vm2 = vcmp.eq.s32.totalorder %v5258_v23, 1 }
 0x9b5   : > { %3682 = vmin.xlane.f32.xlu1 %v3681_v28  ;;  %v3667_v34 = vsel %vm3666_vm3, %v3662_v60, inf  ;;  %v3816_v28 = vcvt.s32.f32 %v3814_v36  ;;  %vm3884_vm3 = vcmp.eq.s32.totalorder %v5258_v23, 0 }
 0x9b6   : > { %3668 = vmin.xlane.f32.xlu0 %v3667_v34  ;;  %v3802_v34 = vcvt.s32.f32 %v3800_v17 }
 0x9ba   : > { %v7434_v48 = vpop.xlane.xlu1 %3706 }
 0x9bb   : > { %vm3708_vm4 = vcmp.eq.f32.partialorder %v7252_v39, %v7434_v48  ;;  %v7438_v12 = vpop.xlane.xlu0 %3692 }
 0x9bc   : > { %vm3694_vm5 = vcmp.eq.f32.partialorder %v7254_v45, %v7438_v12  ;;  %v3709_v52 = vsel %vm3708_vm4, %v3704_v35, inf }
 0x9bd   : > { %3710 = vmin.xlane.f32.xlu1 %v3709_v52  ;;  %v3695_v43 = vsel %vm3694_vm5, %v3690_v9, inf  ;;  %v3844_v9 = vcvt.s32.f32 %v3842_v56  ;;  %v3830_v52 = vcvt.s32.f32 %v3828_v5  ;;  %v7719_v5 = vld [vmem:[#allocation3_spill] sm:$0xff] }
 0x9be   : > { %3696 = vmin.xlane.f32.xlu0 %v3695_v43 }
 0x9c3   : > { %v7444_v40 = vpop.xlane.xlu1 %3734 }
 0x9c4   : > { %vm3736_vm6 = vcmp.eq.f32.partialorder %v7274_v50, %v7444_v40  ;;  %v7448_v39 = vpop.xlane.xlu0 %3720 }
 0x9c5   : > { %vm3722_vm7 = vcmp.eq.f32.partialorder %v7276_v13, %v7448_v39  ;;  %v3737_v45 = vsel %vm3736_vm6, %v3732_v32, inf  ;;  %v3872_v32 = vcvt.s32.f32 %v3870_v7 }
 0x9c6   : > { %3738 = vmin.xlane.f32.xlu1 %v3737_v45  ;;  %v3723_v63 = vsel %vm3722_vm7, %v3718_v58, inf  ;;  %v3858_v58 = vcvt.s32.f32 %v3856_v24 }
 0x9c7   : > { %3724 = vmin.xlane.f32.xlu0 %v3723_v63 }
 0x9cd   : > { %v7454_v10 = vpop.xlane.xlu1 %3762 }
 0x9ce   : > { %vm3764_vm8 = vcmp.eq.f32.partialorder %v7296_v4, %v7454_v10  ;;  %v7458_v50 = vpop.xlane.xlu0 %3748 }
 0x9cf   : > { %vm3750_vm9 = vcmp.eq.f32.partialorder %v7298_v55, %v7458_v50  ;;  %v3765_v13 = vsel %vm3764_vm8, %v3760_v11, inf }
 0x9d0   : > { %3766 = vmin.xlane.f32.xlu1 %v3765_v13  ;;  %v3751_v31 = vsel %vm3750_vm9, %v3746_v2, inf }
 0x9d1   : > { %3752 = vmin.xlane.f32.xlu0 %v3751_v31 }
 0x9db   : > { %v7464_v15 = vpop.xlane.xlu1 %3790 }
 0x9dc   : > { %vm3792_vm10 = vcmp.eq.f32.partialorder %v7318_v47, %v7464_v15  ;;  %v7468_v4 = vpop.xlane.xlu0 %3776 }
 0x9dd   : > { %vm3778_vm11 = vcmp.eq.f32.partialorder %v7320_v57, %v7468_v4  ;;  %v3793_v55 = vsel %vm3792_vm10, %v3788_v59, inf }
 0x9de   : > { %3794 = vmin.xlane.f32.xlu1 %v3793_v55  ;;  %v3779_v27 = vsel %vm3778_vm11, %v3774_v33, inf }
 0x9df   : > { %3780 = vmin.xlane.f32.xlu0 %v3779_v27 }
 0x9e3   : > { %v7474_v60 = vpop.xlane.xlu1 %3818 }
 0x9e4   : > { %vm3820_vm12 = vcmp.eq.f32.partialorder %v7340_v62, %v7474_v60  ;;  %v7478_v47 = vpop.xlane.xlu0 %3804 }
 0x9e5   : > { %vm3806_vm13 = vcmp.eq.f32.partialorder %v7717_v53, %v7478_v47  ;;  %v3821_v57 = vsel %vm3820_vm12, %v3816_v28, inf  ;;  %v3685_v28 = vcvt.f32.s32 %v7424_v41  ;;  %v3671_v53 = vcvt.f32.s32 %v7428_v6 }
 0x9e6   : > { %3822 = vmin.xlane.f32.xlu1 %v3821_v57  ;;  %v3807_v14 = vsel %vm3806_vm13, %v3802_v34, inf  ;;  %v7718_v57 = vld [vmem:[#allocation2_spill] sm:$0xff] }
 0x9e7   : > { %3808 = vmin.xlane.f32.xlu0 %v3807_v14 }
 0x9ec   : > { %v7484_v35 = vpop.xlane.xlu1 %3846 }
 0x9ed   : > { %vm3848_vm14 = vcmp.eq.f32.partialorder %v7366_v20, %v7484_v35  ;;  %v7488_v62 = vpop.xlane.xlu0 %3832 }
 0x9ee   : > { %vm3834_vm15 = vcmp.eq.f32.partialorder %v7368_v37, %v7488_v62  ;;  %v3849_v43 = vsel %vm3848_vm14, %v3844_v9, inf }
 0x9ef   : > { %3850 = vmin.xlane.f32.xlu1 %v3849_v43  ;;  %v3835_v51 = vsel %vm3834_vm15, %v3830_v52, inf }
 0x9f0   : > { %3836 = vmin.xlane.f32.xlu0 %v3835_v51  ;;  %v3686_v51 = vshll.u32 %v3685_v28, 16 }
 0x9f7   : > { %v7494_v30 = vpop.xlane.xlu1 %3874 }
 0x9f8   : > { %vm3876_vm0 = vcmp.eq.f32.partialorder %v7400_v8, %v7494_v30  ;;  %v7498_v20 = vpop.xlane.xlu0 %3860 }
 0x9f9   : > { %vm3862_vm1 = vcmp.eq.f32.partialorder %v7402_v49, %v7498_v20  ;;  %v3877_v37 = vsel %vm3876_vm0, %v3872_v32, inf  ;;  %v3672_v32 = vshll.u32 %v3671_v53, 16 }
 0x9fa   : > { %3878 = vmin.xlane.f32.xlu1 %v3877_v37  ;;  %v3863_v45 = vsel %vm3862_vm1, %v3858_v58, inf }
 0x9fb   : > { %3864 = vmin.xlane.f32.xlu0 %v3863_v45  ;;  %v3551_v63 = vpop.xlane.xlu1 %3550 }
 0x9fc   : > { %v3549_v54 = vpop.xlane.xlu0 %3548  ;;  %5037 = vlog2.f32 %v3551_v63 }
 0x9fd   : > { %5039 = vlog2.f32 %v3549_v54 }
 0x9ff   : > { %v3555_v44 = vpop.xlane.xlu1 %3554 }
 0xa00   : > { %v3553_v19 = vpop.xlane.xlu0 %3552  ;;  %5041 = vlog2.f32 %v3555_v44  ;;  %v3713_v44 = vcvt.f32.s32 %v7434_v48  ;;  %v7720_v48 = vld [vmem:[#allocation4_spill] sm:$0xff] }
 0xa01   : > { %5043 = vlog2.f32 %v3553_v19 }
 0xa03   : > { %v3559_v21 = vpop.xlane.xlu1 %3558 }
 0xa04   : > { %v3557_v11 = vpop.xlane.xlu0 %3556  ;;  %5045 = vlog2.f32 %v3559_v21  ;;  %v3699_v21 = vcvt.f32.s32 %v7438_v12 }
 0xa05   : > { %5047 = vlog2.f32 %v3557_v11 }
 0xa06   : > { %v5038_v59 = vpop.eup %5037 }
 0xa07   : > { %v3563_v2 = vpop.xlane.xlu1 %3562  ;;  %v5040_v55 = vpop.eup %5039  ;;  %v3583_v27 = vmul.f32 0.6931472, %v5038_v59 }
 0xa08   : > { %v3561_v13 = vpop.xlane.xlu0 %3560  ;;  %v3581_v36 = vmul.f32 0.6931472, %v5040_v55  ;;  %5049 = vlog2.f32 %v3563_v2 }
 0xa09   : > { %v3613_v14 = vadd.f32 %v3583_v27, %v7718_v57  ;;  %5051 = vlog2.f32 %v3561_v13 }
 0xa0a   : > { %v5042_v56 = vpop.eup %5041  ;;  %v3612_v9 = vadd.f32 %v3581_v36, %v7719_v5 }
 0xa0b   : > { %v7502_v31 = vpop.xlane.xlu1 %3566  ;;  %v5044_v52 = vpop.eup %5043  ;;  %v3903_v41 = vsub.f32 %v7718_v57, %v3613_v14  ;;  %v3587_v58 = vmul.f32 0.6931472, %v5042_v56  ;;  %v3714_v56 = vshll.u32 %v3713_v44, 16 }
 0xa0c   : > { %v7504_v8 = vpop.xlane.xlu0 %3564  ;;  %v3902_v6 = vsub.f32 %v7719_v5, %v3612_v9  ;;  %v3585_v45 = vmul.f32 0.6931472, %v5044_v52  ;;  %v3700_v52 = vshll.u32 %v3699_v21, 16  ;;  %5053 = vlog2.f32 %v7502_v31 }
 0xa0d   : > { %v3919_v11 = vsel %vm3901_vm2, %v3903_v41, 0.0  ;;  %v3615_v59 = vadd.f32 %v3587_v58, %v7235_v0  ;;  %v3741_v58 = vcvt.f32.s32 %v7444_v40  ;;  %5055 = vlog2.f32 %v7504_v8 }
 0xa0e   : > { %v3918_v27 = vsel %vm3901_vm2, %v3902_v6, 0.0  ;;  %v3614_v36 = vadd.f32 %v3585_v45, %v7720_v48  ;;  %v5046_v53 = vpop.eup %5045  ;;  %v3727_v45 = vcvt.f32.s32 %v7448_v39 }
 0xa0f   : > { %v7506_v61 = vpop.xlane.xlu1 %3570  ;;  %v5048_v14 = vpop.eup %5047 }
 0xa10   : > { %v7508_v49 = vpop.xlane.xlu0 %3568  ;;  %5057 = vlog2.f32 %v7506_v61 }
 0xa11   : > { %5059 = vlog2.f32 %v7508_v49 }
 0xa13   : > { %v7510_v25 = vpop.xlane.xlu1 %3574 }
 0xa14   : > { %v7512_v33 = vpop.xlane.xlu0 %3572  ;;  %5061 = vlog2.f32 %v7510_v25 }
 0xa15   : > { %5063 = vlog2.f32 %v7512_v33 }
 0xa17   : > { %v7514_v17 = vpop.xlane.xlu1 %3578 }
 0xa18   : > { %v7517_v34 = vpop.xlane.xlu0 %3576  ;;  %5065 = vlog2.f32 %v7514_v17  ;;  %v3853_v17 = vcvt.f32.s32 %v7484_v35 }
 0xa19   : > { %5067 = vlog2.f32 %v7517_v34 }
 0xa42   : > { %v3683_v43 = vpop.xlane.xlu1 %3682 }
 0xa43   : > { %v3684_v7 = vcvt.f32.s32 %v3683_v43  ;;  %v3669_v24 = vpop.xlane.xlu0 %3668  ;;  %v3905_v43 = vsub.f32 %v7235_v0, %v3615_v59 }
 0xa44   : > { %v3670_v37 = vcvt.f32.s32 %v3669_v24  ;;  %v3589_v24 = vmul.f32 0.6931472, %v5048_v14 }
 0xa45   : > { %v3687_v63 = vadd.s32 %v3686_v51, %v3684_v7  ;;  %v3904_v51 = vsub.f32 %v7720_v48, %v3614_v36  ;;  %v3591_v7 = vmul.f32 0.6931472, %v5046_v53  ;;  %v3728_v36 = vshll.u32 %v3727_v45, 16 }
 0xa46   : > { %v3673_v54 = vadd.s32 %v3672_v32, %v3670_v37  ;;  %v3921_v37 = vsel %vm3901_vm2, %v3905_v43, 0.0 }
 0xa47   : > { %v3886_v19 = vcvt.s32.f32 %v3687_v63  ;;  %v3920_v0 = vsel %vm3901_vm2, %v3904_v51, 0.0  ;;  %v7721_v63 = vld [vmem:[#allocation5_spill] sm:$0xff]  ;;  %v3755_v51 = vcvt.f32.s32 %v7458_v50 }
 0xa48   : > { %v3885_v55 = vcvt.s32.f32 %v3673_v54  ;;  %v3617_v54 = vadd.f32 %v3591_v7, %v7721_v63 }
 0xa49   : > { %v3935_v28 = vsel %vm3884_vm3, %v3886_v19, %v3919_v11  ;;  %v7722_v19 = vld [vmem:[#allocation6_spill] sm:$0xff]  ;;  %v5050_v11 = vpop.eup %5049  ;;  %v3756_v50 = vshll.u32 %v3755_v51, 16 }
 0xa4a   : > { %3951 = vst [vmem:[%s7531_s25 + $0x8] sm:$0xff] %v3935_v28  ;;  %v3934_v12 = vsel %vm3884_vm3, %v3885_v55, %v3918_v27  ;;  %v3711_v57 = vpop.xlane.xlu1 %3710  ;;  %v3616_v21 = vadd.f32 %v3589_v24, %v7722_v19  ;;  %v5052_v55 = vpop.eup %5051  ;;  %v3742_v27 = vshll.u32 %v3741_v58, 16  ;;  %v3907_v28 = vsub.f32 %v7721_v63, %v3617_v54 }
 0xa4b   : > { %3950 = vst [vmem:[%s7531_s25] sm:$0xff] %v3934_v12  ;;  %v3712_v5 = vcvt.f32.s32 %v3711_v57  ;;  %v3697_v9 = vpop.xlane.xlu0 %3696  ;;  %v3595_v57 = vmul.f32 0.6931472, %v5050_v11  ;;  %v5054_v54 = vpop.eup %5053 }
 0xa4c   : > { %v3698_v2 = vcvt.f32.s32 %v3697_v9  ;;  %v3906_v12 = vsub.f32 %v7722_v19, %v3616_v21  ;;  %v3923_v43 = vsel %vm3901_vm2, %v3907_v28, 0.0  ;;  %v5056_v19 = vpop.eup %5055  ;;  %v3599_v11 = vmul.f32 0.6931472, %v5054_v54 }
 0xa4d   : > { %v3715_v13 = vadd.s32 %v3714_v56, %v3712_v5  ;;  %v3593_v56 = vmul.f32 0.6931472, %v5052_v55  ;;  %v3597_v49 = vmul.f32 0.6931472, %v5056_v19  ;;  %v3783_v55 = vcvt.f32.s32 %v7468_v4 }
 0xa4e   : > { %v3701_v32 = vadd.s32 %v3700_v52, %v3698_v2  ;;  %v3769_v52 = vcvt.f32.s32 %v7454_v10  ;;  %v3922_v7 = vsel %vm3901_vm2, %v3906_v12, 0.0 }
 0xa4f   : > { %v3888_v41 = vcvt.s32.f32 %v3715_v13  ;;  %v3619_v13 = vadd.f32 %v3595_v57, %v7280_v1  ;;  %v3618_v24 = vadd.f32 %v3593_v56, %v7284_v46 }
 0xa50   : > { %v3887_v6 = vcvt.s32.f32 %v3701_v32  ;;  %v3770_v32 = vshll.u32 %v3769_v52, 16 }
 0xa51   : > { %v3937_v44 = vsel %vm3884_vm3, %v3888_v41, %v3921_v37  ;;  %v3909_v37 = vsub.f32 %v7280_v1, %v3619_v13  ;;  %v3908_v45 = vsub.f32 %v7284_v46, %v3618_v24 }
 0xa52   : > { %3953 = vst [vmem:[%s7531_s25 + $0x18] sm:$0xff] %v3937_v44  ;;  %v3936_v40 = vsel %vm3884_vm3, %v3887_v6, %v3920_v0 }
 0xa53   : > { %3952 = vst [vmem:[%s7531_s25 + $0x10] sm:$0xff] %v3936_v40  ;;  %v3739_v59 = vpop.xlane.xlu1 %3738  ;;  %v3925_v21 = vsel %vm3901_vm2, %v3909_v37, 0.0  ;;  %v3924_v1 = vsel %vm3901_vm2, %v3908_v45, 0.0 }
 0xa54   : > { %v3740_v39 = vcvt.f32.s32 %v3739_v59  ;;  %v3725_v48 = vpop.xlane.xlu0 %3724  ;;  %v3797_v59 = vcvt.f32.s32 %v7464_v15 }
 0xa55   : > { %v3726_v53 = vcvt.f32.s32 %v3725_v48  ;;  %v3620_v48 = vadd.f32 %v3597_v49, %v7306_v22 }
 0xa56   : > { %v3743_v14 = vadd.s32 %v3742_v27, %v3740_v39  ;;  %v3621_v27 = vadd.f32 %v3599_v11, %v7302_v42  ;;  %v5058_v39 = vpop.eup %5057  ;;  %v3854_v11 = vshll.u32 %v3853_v17, 16 }
 0xa57   : > { %v3729_v5 = vadd.s32 %v3728_v36, %v3726_v53  ;;  %v5060_v36 = vpop.eup %5059  ;;  %v3798_v53 = vshll.u32 %v3797_v59, 16  ;;  %v3603_v15 = vmul.f32 0.6931472, %v5058_v39 }
 0xa58   : > { %v3890_v9 = vcvt.s32.f32 %v3743_v14  ;;  %v3784_v14 = vshll.u32 %v3783_v55, 16  ;;  %v3911_v56 = vsub.f32 %v7302_v42, %v3621_v27  ;;  %v5062_v24 = vpop.eup %5061 }
 0xa59   : > { %v3889_v2 = vcvt.s32.f32 %v3729_v5  ;;  %v3910_v5 = vsub.f32 %v7306_v22, %v3620_v48  ;;  %v3607_v45 = vmul.f32 0.6931472, %v5062_v24 }
 0xa5a   : > { %v3939_v31 = vsel %vm3884_vm3, %v3890_v9, %v3923_v43  ;;  %v3601_v9 = vmul.f32 0.6931472, %v5060_v36  ;;  %v3825_v43 = vcvt.f32.s32 %v7474_v60  ;;  %v3927_v51 = vsel %vm3901_vm2, %v3911_v56, 0.0 }
 0xa5b   : > { %3955 = vst [vmem:[%s7531_s25 + $0x28] sm:$0xff] %v3939_v31  ;;  %v3938_v10 = vsel %vm3884_vm3, %v3889_v2, %v3922_v7  ;;  %v3811_v2 = vcvt.f32.s32 %v7478_v47  ;;  %v3623_v7 = vadd.f32 %v3603_v15, %v7323_v29  ;;  %v3926_v13 = vsel %vm3901_vm2, %v3910_v5, 0.0 }
 0xa5c   : > { %3954 = vst [vmem:[%s7531_s25 + $0x20] sm:$0xff] %v3938_v10  ;;  %v3622_v22 = vadd.f32 %v3601_v9, %v7328_v3  ;;  %v5064_v10 = vpop.eup %5063  ;;  %v3867_v5 = vcvt.f32.s32 %v7498_v20 }
 0xa5d   : > { %v3767_v8 = vpop.xlane.xlu1 %3766 }
 0xa5e   : > { %v3768_v41 = vcvt.f32.s32 %v3767_v8  ;;  %v3753_v58 = vpop.xlane.xlu0 %3752  ;;  %v3826_v8 = vshll.u32 %v3825_v43, 16 }
 0xa5f   : > { %v3754_v6 = vcvt.f32.s32 %v3753_v58  ;;  %v3812_v58 = vshll.u32 %v3811_v2, 16 }
 0xa60   : > { %v3771_v0 = vadd.s32 %v3770_v32, %v3768_v41 }
 0xa61   : > { %v3757_v63 = vadd.s32 %v3756_v50, %v3754_v6  ;;  %v3913_v50 = vsub.f32 %v7323_v29, %v3623_v7  ;;  %v3912_v6 = vsub.f32 %v7328_v3, %v3622_v22  ;;  %v3839_v29 = vcvt.f32.s32 %v7488_v62  ;;  %v5066_v62 = vpop.eup %5065 }
 0xa62   : > { %v3892_v44 = vcvt.s32.f32 %v3771_v0  ;;  %v5068_v39 = vpop.eup %5067 }
 0xa63   : > { %v3891_v40 = vcvt.s32.f32 %v3757_v63  ;;  %v3605_v63 = vmul.f32 0.6931472, %v5064_v10  ;;  %v3929_v19 = vsel %vm3901_vm2, %v3913_v50, 0.0  ;;  %v3928_v34 = vsel %vm3901_vm2, %v3912_v6, 0.0 }
 0xa64   : > { %v3941_v46 = vsel %vm3884_vm3, %v3892_v44, %v3925_v21  ;;  %v3840_v59 = vshll.u32 %v3839_v29, 16 }
 0xa65   : > { %3957 = vst [vmem:[%s7531_s25 + $0x38] sm:$0xff] %v3941_v46  ;;  %v3940_v61 = vsel %vm3884_vm3, %v3891_v40, %v3924_v1  ;;  %v3625_v40 = vadd.f32 %v3607_v45, %v7346_v26  ;;  %v3624_v1 = vadd.f32 %v3605_v63, %v7350_v16 }
 0xa66   : > { %3956 = vst [vmem:[%s7531_s25 + $0x30] sm:$0xff] %v3940_v61 }
 0xa67   : > { %v3915_v55 = vsub.f32 %v7346_v26, %v3625_v40  ;;  %v3914_v48 = vsub.f32 %v7350_v16, %v3624_v1 }
 0xa69   : > { %v3930_v15 = vsel %vm3901_vm2, %v3914_v48, 0.0 }
 0xa6b   : > { %v3795_v28 = vpop.xlane.xlu1 %3794 }
 0xa6c   : > { %v3796_v12 = vcvt.f32.s32 %v3795_v28  ;;  %v3781_v57 = vpop.xlane.xlu0 %3780 }
 0xa6d   : > { %v3782_v4 = vcvt.f32.s32 %v3781_v57  ;;  %v3931_v57 = vsel %vm3901_vm2, %v3915_v55, 0.0 }
 0xa6e   : > { %v3799_v25 = vadd.s32 %v3798_v53, %v3796_v12  ;;  %v3611_v53 = vmul.f32 0.6931472, %v5066_v62 }
 0xa6f   : > { %v3785_v52 = vadd.s32 %v3784_v14, %v3782_v4  ;;  %v3609_v14 = vmul.f32 0.6931472, %v5068_v39  ;;  %v3881_v4 = vcvt.f32.s32 %v7494_v30 }
 0xa70   : > { %v3894_v33 = vcvt.s32.f32 %v3799_v25  ;;  %v3627_v9 = vadd.f32 %v3611_v53, %v7378_v38 }
 0xa71   : > { %v3893_v42 = vcvt.s32.f32 %v3785_v52  ;;  %v3626_v25 = vadd.f32 %v3609_v14, %v7384_v18  ;;  %v3882_v43 = vshll.u32 %v3881_v4, 16 }
 0xa72   : > { %v3943_v31 = vsel %vm3884_vm3, %v3894_v33, %v3927_v51  ;;  %v3868_v51 = vshll.u32 %v3867_v5, 16  ;;  %v3917_v30 = vsub.f32 %v7378_v38, %v3627_v9 }
 0xa73   : > { %3959 = vst [vmem:[%s7531_s25 + $0x48] sm:$0xff] %v3943_v31  ;;  %v3942_v60 = vsel %vm3884_vm3, %v3893_v42, %v3926_v13  ;;  %v3823_v47 = vpop.xlane.xlu1 %3822  ;;  %v3916_v42 = vsub.f32 %v7384_v18, %v3626_v25 }
 0xa74   : > { %3958 = vst [vmem:[%s7531_s25 + $0x40] sm:$0xff] %v3942_v60  ;;  %v3824_v32 = vcvt.f32.s32 %v3823_v47  ;;  %v3809_v41 = vpop.xlane.xlu0 %3808  ;;  %v3933_v31 = vsel %vm3901_vm2, %v3917_v30, 0.0 }
 0xa75   : > { %v3810_v37 = vcvt.f32.s32 %v3809_v41  ;;  %v3932_v47 = vsel %vm3901_vm2, %v3916_v42, 0.0 }
 0xa76   : > { %v3827_v0 = vadd.s32 %v3826_v8, %v3824_v32 }
 0xa77   : > { %v3813_v54 = vadd.s32 %v3812_v58, %v3810_v37 }
 0xa78   : > { %v3896_v44 = vcvt.s32.f32 %v3827_v0 }
 0xa79   : > { %v3895_v21 = vcvt.s32.f32 %v3813_v54 }
 0xa7a   : > { %v3945_v3 = vsel %vm3884_vm3, %v3896_v44, %v3929_v19 }
 0xa7b   : > { %3961 = vst [vmem:[%s7531_s25 + $0x58] sm:$0xff] %v3945_v3  ;;  %v3944_v35 = vsel %vm3884_vm3, %v3895_v21, %v3928_v34 }
 0xa7c   : > { %3960 = vst [vmem:[%s7531_s25 + $0x50] sm:$0xff] %v3944_v35  ;;  %v3851_v46 = vpop.xlane.xlu1 %3850 }
 0xa7d   : > { %v3852_v61 = vcvt.f32.s32 %v3851_v46  ;;  %v3837_v49 = vpop.xlane.xlu0 %3836 }
 0xa7e   : > { %v3838_v27 = vcvt.f32.s32 %v3837_v49 }
 0xa7f   : > { %v3855_v36 = vadd.s32 %v3854_v11, %v3852_v61 }
 0xa80   : > { %v3841_v28 = vadd.s32 %v3840_v59, %v3838_v27 }
 0xa81   : > { %v3898_v12 = vcvt.s32.f32 %v3855_v36 }
 0xa82   : > { %v3897_v56 = vcvt.s32.f32 %v3841_v28 }
 0xa83   : > { %v3947_v26 = vsel %vm3884_vm3, %v3898_v12, %v3931_v57 }
 0xa84   : > { %3963 = vst [vmem:[%s7531_s25 + $0x68] sm:$0xff] %v3947_v26  ;;  %v3946_v16 = vsel %vm3884_vm3, %v3897_v56, %v3930_v15 }
 0xa85   : > { %3962 = vst [vmem:[%s7531_s25 + $0x60] sm:$0xff] %v3946_v16 }
 0xa87   : > { %v3879_v52 = vpop.xlane.xlu1 %3878 }
 0xa88   : > { %v3880_v33 = vcvt.f32.s32 %v3879_v52  ;;  %v3865_v2 = vpop.xlane.xlu0 %3864 }
 0xa89   : > { %v3866_v7 = vcvt.f32.s32 %v3865_v2 }
 0xa8a   : > { %v3883_v13 = vadd.s32 %v3882_v43, %v3880_v33 }
 0xa8b   : > { %v3869_v22 = vadd.s32 %v3868_v51, %v3866_v7 }
 0xa8c   : > { %v3900_v20 = vcvt.s32.f32 %v3883_v13 }
 0xa8d   : > { %v3899_v24 = vcvt.s32.f32 %v3869_v22 }
 0xa8e   : > { %v3949_v60 = vsel %vm3884_vm3, %v3900_v20, %v3933_v31 }
 0xa8f   : > { %3965 = vst [vmem:[%s7531_s25 + $0x78] sm:$0xff] %v3949_v60  ;;  %v3948_v38 = vsel %vm3884_vm3, %v3899_v24, %v3932_v47 }
 0xa90   : > { %3964 = vst [vmem:[%s7531_s25 + $0x70] sm:$0xff] %v3948_v38 }
 0xa91 PF: > { %s32_s2 = sadd.s32 1, %s5076_s2  }
 0xa92   : > { %p29_p4 = scmp.ge.s32.totalorder %s32_s2, 4  }
 0xa94   :  { %31 = sbr.rel (!%p29_p4) target bundleno = 7 (0x7), region = 148 }

</bundles_post_ra>
